<compile_context>
chip_gen: v7x
topology: tpu7x:2x2x1
jax: 0.10.0
libtpu: 0.0.40
codegen_flags: <defaults>
</compile_context>

<pallas_src>
import numpy as np
import jax
import jax.numpy as jnp
from jax.experimental import pallas as pl
from jax.experimental.pallas import tpu as pltpu

# ----------------------------- config ----------------------------------------
N_MELS     = 16            # d_model
NUM_BLOCKS = 2
NUM_HEADS  = 4
HEAD_DIM   = N_MELS // NUM_HEADS
FF         = 32            # dim_feedforward
EMB        = 32            # embedding_size
OUT_DIM    = 6
SR         = 16000
N_FFT      = 64
HOP        = 16
N_BINS     = N_FFT // 2 + 1          # 33
BATCH      = 2
N_SAMPLES  = 256
N_FRAMES   = 1 + N_SAMPLES // HOP    # 17 (torch.stft, center=True)
WAVE_ROWS  = (N_SAMPLES + N_FFT) // HOP   # 20 rows of 16 samples (reflect-padded wave)
HOP_ROWS   = N_FFT // HOP            # 4
LN_EPS     = 1e-5
BN_EPS     = 1e-5
SCALE      = HEAD_DIM ** -0.5

OUT_SLAB   = 128
PAD_W      = OUT_SLAB - EMB - 1 - OUT_DIM            # 89

# --------------------- packed weight-slab layout (rows x 128 lanes) ----------
R_DFT  = 0                     # 64 rows: windowed DFT, cos @ lanes 0:33, sin @ 64:97
R_FB   = R_DFT + N_FFT         # 64 : 128 rows x 16 lanes mel filterbank (rows 33:128 = 0)
R_L0   = R_FB + 128            # 192
O_WQKV = 0                     # 16 rows x 48  (packed Wq|Wk|Wv)
O_WO   = 16                    # 32 rows: head h at +8h (4 rows used) x 16
O_W1   = 48                    # 16 rows x 32
O_W2   = 64                    # 32 rows x 16
O_SM   = 96                    # 8 rows of small row-vectors (biases / LN params)
LAYER_ROWS = 104
R_LAYER = tuple(R_L0 + l * LAYER_ROWS for l in range(NUM_BLOCKS))   # (192, 296)
R_NW1  = R_L0 + NUM_BLOCKS * LAYER_ROWS   # 400 : 16 x 32
R_NW2  = R_NW1 + N_MELS                   # 416 : 32 x 32
R_SW   = R_NW2 + EMB                      # 448 : 32 x 6
R_NSM  = R_SW + EMB                       # 480 : 8 rows (neck biases / BN stats)
R_TOTAL = R_NSM + 8                       # 488
assert R_TOTAL % 8 == 0 and all(r % 8 == 0 for r in R_LAYER)


# ----------------------------- fused kernel ----------------------------------
def make_kernel(bpg):
    """bpg = batch elements processed per grid step (1 on megacore chips, BATCH otherwise)."""

    def kernel(wave_ref, slab_ref, scal_ref, out_ref):
        alpha = scal_ref[0]          # PReLU alpha
        mw = scal_ref[1]             # machine-head weight
        mb = scal_ref[2]             # machine-head bias

        for i in range(bpg):
            # ---- STFT framing + mel (window folded into dft) -----------------
            w = wave_ref[i]                                           # (20, 16)
            spec = jnp.zeros((N_FRAMES, 128), jnp.float32)
            for j in range(HOP_ROWS):                                 # 4 hop-shifted partials
                spec = spec + jnp.dot(
                    w[j:j + N_FRAMES, :],
                    slab_ref[R_DFT + j * HOP:R_DFT + (j + 1) * HOP, :],
                    preferred_element_type=jnp.float32)               # (17, 128)
            p = spec * spec
            mag = jnp.sqrt(p + pltpu.roll(p, shift=64, axis=1))       # re^2+im^2 in lanes 0:33
            x = jnp.dot(mag, slab_ref[R_FB:R_FB + 128, 0:N_MELS],
                        preferred_element_type=jnp.float32)           # (17, 16)

            # ---- transformer encoder layers (unrolled, post-norm) ------------
            for l in range(NUM_BLOCKS):
                base = R_LAYER[l]
                smb = base + O_SM
                wqkv = slab_ref[base + O_WQKV:base + O_WQKV + N_MELS, 0:3 * N_MELS]
                w1   = slab_ref[base + O_W1:base + O_W1 + N_MELS, 0:FF]
                w2   = slab_ref[base + O_W2:base + O_W2 + FF, 0:N_MELS]
                bqkv = slab_ref[smb + 0:smb + 1, 0:3 * N_MELS]
                b1   = slab_ref[smb + 1:smb + 2, 0:FF]
                bo   = slab_ref[smb + 2:smb + 3, 0:N_MELS]
                g1   = slab_ref[smb + 3:smb + 4, 0:N_MELS]
                be1  = slab_ref[smb + 4:smb + 5, 0:N_MELS]
                b2   = slab_ref[smb + 5:smb + 6, 0:N_MELS]
                g2   = slab_ref[smb + 6:smb + 7, 0:N_MELS]
                be2  = slab_ref[smb + 7:smb + 8, 0:N_MELS]

                qkv = jnp.dot(x, wqkv, preferred_element_type=jnp.float32) + bqkv  # (17, 48)

                attn = jnp.zeros((N_FRAMES, N_MELS), jnp.float32)
                for h in range(NUM_HEADS):
                    qh = qkv[:, h * HEAD_DIM:(h + 1) * HEAD_DIM]
                    kh = qkv[:, N_MELS + h * HEAD_DIM:N_MELS + (h + 1) * HEAD_DIM]
                    vh = qkv[:, 2 * N_MELS + h * HEAD_DIM:2 * N_MELS + (h + 1) * HEAD_DIM]
                    s = jax.lax.dot_general(qh, kh, (((1,), (1,)), ((), ())),
                                            preferred_element_type=jnp.float32) * SCALE
                    s = s - jnp.max(s, axis=-1, keepdims=True)
                    e = jnp.exp(s)
                    prob = e / jnp.sum(e, axis=-1, keepdims=True)
                    ctx = jnp.dot(prob, vh, preferred_element_type=jnp.float32)    # (17, 4)
                    # 8-row-aligned per-head Wo slice -> no sublane rotates
                    wo_h = slab_ref[base + O_WO + 8 * h:
                                    base + O_WO + 8 * h + HEAD_DIM, 0:N_MELS]      # (4, 16)
                    attn = attn + jnp.dot(ctx, wo_h, preferred_element_type=jnp.float32)
                attn = attn + bo

                # residual + LayerNorm 1
                h1 = x + attn
                mu = jnp.mean(h1, axis=-1, keepdims=True)
                var = jnp.mean((h1 - mu) ** 2, axis=-1, keepdims=True)
                h1 = (h1 - mu) * jax.lax.rsqrt(var + LN_EPS) * g1 + be1

                # feed-forward
                # TODO(synk): PyTorch activation='gelu' is exact-erf GELU; tanh approx used here.
                ff = jnp.dot(h1, w1, preferred_element_type=jnp.float32) + b1
                ff = jax.nn.gelu(ff, approximate=True)
                ff = jnp.dot(ff, w2, preferred_element_type=jnp.float32) + b2

                # residual + LayerNorm 2
                h2 = h1 + ff
                mu2 = jnp.mean(h2, axis=-1, keepdims=True)
                var2 = jnp.mean((h2 - mu2) ** 2, axis=-1, keepdims=True)
                x = (h2 - mu2) * jax.lax.rsqrt(var2 + LN_EPS) * g2 + be2

            # ---- pooling + neck + heads --------------------------------------
            pooled = (jnp.mean(x, axis=0, keepdims=True) +
                      jnp.max(x, axis=0, keepdims=True))                           # (1, 16)

            nw1 = slab_ref[R_NW1:R_NW1 + N_MELS, 0:EMB]
            nw2 = slab_ref[R_NW2:R_NW2 + EMB, 0:EMB]
            sw  = slab_ref[R_SW:R_SW + EMB, 0:OUT_DIM]
            nb1 = slab_ref[R_NSM + 0:R_NSM + 1, 0:EMB]
            bng = slab_ref[R_NSM + 1:R_NSM + 2, 0:EMB]
            bnb = slab_ref[R_NSM + 2:R_NSM + 3, 0:EMB]
            bnm = slab_ref[R_NSM + 3:R_NSM + 4, 0:EMB]
            bnv = slab_ref[R_NSM + 4:R_NSM + 5, 0:EMB]
            nb2 = slab_ref[R_NSM + 5:R_NSM + 6, 0:EMB]

            hn = jnp.dot(pooled, nw1, preferred_element_type=jnp.float32) + nb1    # (1, 32)
            hn = (hn - bnm) * jax.lax.rsqrt(bnv + BN_EPS) * bng + bnb              # BN (eval)
            hn = jnp.where(hn >= 0.0, hn, hn * alpha)                              # PReLU
            emb = jnp.dot(hn, nw2, preferred_element_type=jnp.float32) + nb2       # (1, 32)

            m_in = jnp.sum(emb * emb, axis=-1, keepdims=True) * (1.0 / EMB)        # (1, 1)
            machine = m_in * mw + mb
            section = jnp.dot(emb, sw, preferred_element_type=jnp.float32)         # (1, 6)

            row = jnp.concatenate(
                [emb, machine, section, jnp.zeros((1, PAD_W), jnp.float32)], axis=-1)
            out_ref[i] = row                                                       # (1, 128)

    return kernel


# ----------------------------- wrapper ----------------------------------------
def _pick_batch_per_step():
    """Fold the batch on single-TensorCore chips (v5e/v6e); keep grid=(BATCH,) elsewhere."""
    try:
        kind = jax.devices()[0].device_kind.lower()
    except Exception:
        return 1
    single_core = ("lite" in kind) or ("v5e" in kind) or ("v6e" in kind)
    return BATCH if single_core else 1


def transformer_forward(x_wave, slab, scal, batch_per_step=None):
    bpg = _pick_batch_per_step() if batch_per_step is None else batch_per_step
    assert BATCH % bpg == 0

    # center=True reflect pad; hann window already folded into the packed DFT matrix.
    pad = N_FFT // 2
    xp = jnp.pad(x_wave.astype(jnp.float32), ((0, 0), (pad, pad)), mode="reflect")
    wave = xp.reshape(BATCH, WAVE_ROWS, HOP)                    # (B, 20, 16)

    out = pl.pallas_call(
        make_kernel(bpg),
        out_shape=jax.ShapeDtypeStruct((BATCH, 1, OUT_SLAB), jnp.float32),
        grid=(BATCH // bpg,),
        in_specs=[
            pl.BlockSpec((bpg, WAVE_ROWS, HOP), lambda b: (b, 0, 0)),
            pl.BlockSpec((R_TOTAL, 128), lambda b: (0, 0)),          # single packed weight DMA
            pl.BlockSpec(memory_space=pltpu.MemorySpace.SMEM),       # 3 true scalars
        ],
        out_specs=pl.BlockSpec((bpg, 1, OUT_SLAB), lambda b: (b, 0, 0)),
        compiler_params=pltpu.CompilerParams(dimension_semantics=("parallel",)),
    )(wave, slab, scal)

    embedding = out[:, 0, :EMB]
    machine = out[:, 0, EMB:EMB + 1]
    section = out[:, 0, EMB + 1:EMB + 1 + OUT_DIM]
    return {"embedding": embedding, "machine": machine, "section": section}


# ----------------------------- constants & params ------------------------------
def build_params(key):
    ks = jax.random.split(key, 64)
    it = iter(ks)

    def nrm(shape, scale=0.05):
        return np.asarray(scale * jax.random.normal(next(it), shape), dtype=np.float32)

    slab = np.zeros((R_TOTAL, 128), np.float32)

    # windowed DFT (periodic hann), cos in lanes 0:33, sin in lanes 64:97
    n = np.arange(N_FFT, dtype=np.float64)[:, None]
    k = np.arange(N_BINS, dtype=np.float64)[None, :]
    ang = 2.0 * np.pi * n * k / N_FFT
    window = 0.5 * (1.0 - np.cos(2.0 * np.pi * np.arange(N_FFT) / N_FFT))
    slab[R_DFT:R_DFT + N_FFT, 0:N_BINS] = (window[:, None] * np.cos(ang)).astype(np.float32)
    slab[R_DFT:R_DFT + N_FFT, 64:64 + N_BINS] = (window[:, None] * np.sin(ang)).astype(np.float32)

    # HTK mel filterbank (torchaudio melscale_fbanks, norm=None, mel_scale='htk')
    def hz_to_mel(f): return 2595.0 * np.log10(1.0 + f / 700.0)
    def mel_to_hz(m): return 700.0 * (10.0 ** (m / 2595.0) - 1.0)
    all_freqs = np.linspace(0.0, SR / 2.0, N_BINS)
    m_pts = np.linspace(hz_to_mel(0.0), hz_to_mel(SR / 2.0), N_MELS + 2)
    f_pts = mel_to_hz(m_pts)
    f_diff = f_pts[1:] - f_pts[:-1]
    slopes = f_pts[None, :] - all_freqs[:, None]
    down = -slopes[:, :-2] / f_diff[:-1]
    up = slopes[:, 2:] / f_diff[1:]
    fb = np.maximum(0.0, np.minimum(down, up)).astype(np.float32)        # (33, 16)
    slab[R_FB:R_FB + N_BINS, 0:N_MELS] = fb

    # transformer encoder layers
    for l in range(NUM_BLOCKS):
        base = R_LAYER[l]
        wq, wk, wv = nrm((N_MELS, N_MELS)), nrm((N_MELS, N_MELS)), nrm((N_MELS, N_MELS))
        bq, bk, bv = nrm((N_MELS,)), nrm((N_MELS,)), nrm((N_MELS,))
        wo, bo = nrm((N_MELS, N_MELS)), nrm((N_MELS,))
        w1, b1 = nrm((N_MELS, FF)), nrm((FF,))
        w2, b2 = nrm((FF, N_MELS)), nrm((N_MELS,))
        g1 = np.ones((N_MELS,), np.float32); be1 = np.zeros((N_MELS,), np.float32)
        g2 = np.ones((N_MELS,), np.float32); be2 = np.zeros((N_MELS,), np.float32)

        slab[base + O_WQKV:base + O_WQKV + N_MELS, 0:3 * N_MELS] = np.concatenate([wq, wk, wv], 1)
        for h in range(NUM_HEADS):                              # per-head Wo, 8-row aligned
            r = base + O_WO + 8 * h
            slab[r:r + HEAD_DIM, 0:N_MELS] = wo[h * HEAD_DIM:(h + 1) * HEAD_DIM, :]
        slab[base + O_W1:base + O_W1 + N_MELS, 0:FF] = w1
        slab[base + O_W2:base + O_W2 + FF, 0:N_MELS] = w2
        smb = base + O_SM
        slab[smb + 0, 0:3 * N_MELS] = np.concatenate([bq, bk, bv])
        slab[smb + 1, 0:FF] = b1
        slab[smb + 2, 0:N_MELS] = bo
        slab[smb + 3, 0:N_MELS] = g1
        slab[smb + 4, 0:N_MELS] = be1
        slab[smb + 5, 0:N_MELS] = b2
        slab[smb + 6, 0:N_MELS] = g2
        slab[smb + 7, 0:N_MELS] = be2

    # neck + heads
    nw1, nb1 = nrm((N_MELS, EMB)), nrm((EMB,))
    nw2, nb2 = nrm((EMB, EMB)), nrm((EMB,))
    sw = nrm((EMB, OUT_DIM))
    mw, mb = nrm((1,)), nrm((1,))
    slab[R_NW1:R_NW1 + N_MELS, 0:EMB] = nw1
    slab[R_NW2:R_NW2 + EMB, 0:EMB] = nw2
    slab[R_SW:R_SW + EMB, 0:OUT_DIM] = sw
    slab[R_NSM + 0, 0:EMB] = nb1
    slab[R_NSM + 1, 0:EMB] = 1.0          # BN gamma
    slab[R_NSM + 2, 0:EMB] = 0.0          # BN beta
    slab[R_NSM + 3, 0:EMB] = 0.0          # BN running mean
    slab[R_NSM + 4, 0:EMB] = 1.0          # BN running var
    slab[R_NSM + 5, 0:EMB] = nb2

    scal = np.array([0.25, float(mw[0]), float(mb[0])], np.float32)  # PReLU alpha, mach w, mach b
    return jnp.asarray(slab), jnp.asarray(scal)


# ----------------------------- main --------------------------------------------
if __name__ == "__main__":
    key = jax.random.PRNGKey(0)
    k_x, k_p = jax.random.split(key)
    x_wave = jax.random.normal(k_x, (BATCH, N_SAMPLES), dtype=jnp.float32)

    slab, scal = build_params(k_p)
    out = transformer_forward(x_wave, slab, scal)
    out = jax.block_until_ready(out)

    assert out["embedding"].shape == (BATCH, EMB)
    assert out["machine"].shape == (BATCH, 1)
    assert out["section"].shape == (BATCH, OUT_DIM)
    assert all(bool(jnp.all(jnp.isfinite(v))) for v in out.values())
    print("KERNEL_OK")
</pallas_src>

<mosaic_0001>
module attributes {stable_mosaic.version = 11 : i64} {
  func.func @kernel(%arg0: i32, %arg1: memref<1x20x16xf32, #tpu.memory_space<vmem>>, %arg2: memref<488x128xf32, #tpu.memory_space<vmem>>, %arg3: memref<3xf32, #tpu.memory_space<smem>>, %arg4: memref<1x1x128xf32, #tpu.memory_space<vmem>>) attributes {dimension_semantics = [#tpu.dimension_semantics<parallel>], iteration_bounds = array<i64: 2>, scalar_prefetch = 0 : i64, scratch_operands = 0 : i64, tpu.core_type = #tpu.core_type<tc>, window_params = [{transform_indices = @transform_0, window_bounds = array<i64: 1, 20, 16>}, {pipeline_mode = #tpu.pipeline_mode<synchronous>, transform_indices = @transform_1, window_bounds = array<i64: 488, 128>}, {transform_indices = @transform_2, window_bounds = array<i64: 3>}, {transform_indices = @transform_3, window_bounds = array<i64: 1, 1, 128>}]} {
    %c0 = arith.constant 0 : index
    %0 = memref.load %arg3[%c0] : memref<3xf32, #tpu.memory_space<smem>>
    %c1 = arith.constant 1 : index
    %1 = memref.load %arg3[%c1] : memref<3xf32, #tpu.memory_space<smem>>
    %c2 = arith.constant 2 : index
    %2 = memref.load %arg3[%c2] : memref<3xf32, #tpu.memory_space<smem>>
    %c0_0 = arith.constant 0 : index
    %c0_1 = arith.constant 0 : index
    %c0_2 = arith.constant 0 : index
    %3 = vector.load %arg1[%c0_0, %c0_1, %c0_2] : memref<1x20x16xf32, #tpu.memory_space<vmem>>, vector<1x20x16xf32>
    %4 = vector.shape_cast %3 : vector<1x20x16xf32> to vector<20x16xf32>
    %cst = arith.constant 0.000000e+00 : f32
    %5 = vector.broadcast %cst : f32 to vector<17x128xf32>
    %6 = vector.extract_strided_slice %4 {offsets = [0, 0], sizes = [17, 16], strides = [1, 1]} : vector<20x16xf32> to vector<17x16xf32>
    %c0_3 = arith.constant 0 : index
    %c0_4 = arith.constant 0 : index
    %7 = vector.load %arg2[%c0_3, %c0_4] : memref<488x128xf32, #tpu.memory_space<vmem>>, vector<16x128xf32>
    %cst_5 = arith.constant dense<0.000000e+00> : vector<17x128xf32>
    %8 = tpu.matmul %6, %7, %cst_5 {dimension_numbers = #tpu.dot_dimension_numbers<[1], [0], [0], [1], [0, 0, 1, 1], [], []>} : vector<17x16xf32>, vector<16x128xf32>, vector<17x128xf32> -> vector<17x128xf32>
    %9 = arith.addf %5, %8 : vector<17x128xf32>
    %10 = vector.extract_strided_slice %4 {offsets = [1, 0], sizes = [17, 16], strides = [1, 1]} : vector<20x16xf32> to vector<17x16xf32>
    %c16 = arith.constant 16 : index
    %c0_6 = arith.constant 0 : index
    %11 = vector.load %arg2[%c16, %c0_6] : memref<488x128xf32, #tpu.memory_space<vmem>>, vector<16x128xf32>
    %cst_7 = arith.constant dense<0.000000e+00> : vector<17x128xf32>
    %12 = tpu.matmul %10, %11, %cst_7 {dimension_numbers = #tpu.dot_dimension_numbers<[1], [0], [0], [1], [0, 0, 1, 1], [], []>} : vector<17x16xf32>, vector<16x128xf32>, vector<17x128xf32> -> vector<17x128xf32>
    %13 = arith.addf %9, %12 : vector<17x128xf32>
    %14 = vector.extract_strided_slice %4 {offsets = [2, 0], sizes = [17, 16], strides = [1, 1]} : vector<20x16xf32> to vector<17x16xf32>
    %c32 = arith.constant 32 : index
    %c0_8 = arith.constant 0 : index
    %15 = vector.load %arg2[%c32, %c0_8] : memref<488x128xf32, #tpu.memory_space<vmem>>, vector<16x128xf32>
    %cst_9 = arith.constant dense<0.000000e+00> : vector<17x128xf32>
    %16 = tpu.matmul %14, %15, %cst_9 {dimension_numbers = #tpu.dot_dimension_numbers<[1], [0], [0], [1], [0, 0, 1, 1], [], []>} : vector<17x16xf32>, vector<16x128xf32>, vector<17x128xf32> -> vector<17x128xf32>
    %17 = arith.addf %13, %16 : vector<17x128xf32>
    %18 = vector.extract_strided_slice %4 {offsets = [3, 0], sizes = [17, 16], strides = [1, 1]} : vector<20x16xf32> to vector<17x16xf32>
    %c48 = arith.constant 48 : index
    %c0_10 = arith.constant 0 : index
    %19 = vector.load %arg2[%c48, %c0_10] : memref<488x128xf32, #tpu.memory_space<vmem>>, vector<16x128xf32>
    %cst_11 = arith.constant dense<0.000000e+00> : vector<17x128xf32>
    %20 = tpu.matmul %18, %19, %cst_11 {dimension_numbers = #tpu.dot_dimension_numbers<[1], [0], [0], [1], [0, 0, 1, 1], [], []>} : vector<17x16xf32>, vector<16x128xf32>, vector<17x128xf32> -> vector<17x128xf32>
    %21 = arith.addf %17, %20 : vector<17x128xf32>
    %22 = arith.mulf %21, %21 : vector<17x128xf32>
    %c64_i32 = arith.constant 64 : i32
    %23 = tpu.dynamic_rotate %22 by %c64_i32 dim 1 : vector<17x128xf32>, i32 -> vector<17x128xf32>
    %24 = arith.addf %22, %23 : vector<17x128xf32>
    %25 = math.sqrt %24 : vector<17x128xf32>
    %c64 = arith.constant 64 : index
    %c0_12 = arith.constant 0 : index
    %26 = vector.load %arg2[%c64, %c0_12] : memref<488x128xf32, #tpu.memory_space<vmem>>, vector<128x16xf32>
    %cst_13 = arith.constant dense<0.000000e+00> : vector<17x16xf32>
    %27 = tpu.matmul %25, %26, %cst_13 {dimension_numbers = #tpu.dot_dimension_numbers<[1], [0], [0], [1], [0, 0, 1, 1], [], []>} : vector<17x128xf32>, vector<128x16xf32>, vector<17x16xf32> -> vector<17x16xf32>
    %c192 = arith.constant 192 : index
    %c0_14 = arith.constant 0 : index
    %28 = vector.load %arg2[%c192, %c0_14] : memref<488x128xf32, #tpu.memory_space<vmem>>, vector<16x48xf32>
    %c240 = arith.constant 240 : index
    %c0_15 = arith.constant 0 : index
    %29 = vector.load %arg2[%c240, %c0_15] : memref<488x128xf32, #tpu.memory_space<vmem>>, vector<16x32xf32>
    %c256 = arith.constant 256 : index
    %c0_16 = arith.constant 0 : index
    %30 = vector.load %arg2[%c256, %c0_16] : memref<488x128xf32, #tpu.memory_space<vmem>>, vector<32x16xf32>
    %c288 = arith.constant 288 : index
    %c0_17 = arith.constant 0 : index
    %31 = vector.load %arg2[%c288, %c0_17] : memref<488x128xf32, #tpu.memory_space<vmem>>, vector<1x48xf32>
    %c289 = arith.constant 289 : index
    %c0_18 = arith.constant 0 : index
    %32 = vector.load %arg2[%c289, %c0_18] : memref<488x128xf32, #tpu.memory_space<vmem>>, vector<1x32xf32>
    %c290 = arith.constant 290 : index
    %c0_19 = arith.constant 0 : index
    %33 = vector.load %arg2[%c290, %c0_19] : memref<488x128xf32, #tpu.memory_space<vmem>>, vector<1x16xf32>
    %c291 = arith.constant 291 : index
    %c0_20 = arith.constant 0 : index
    %34 = vector.load %arg2[%c291, %c0_20] : memref<488x128xf32, #tpu.memory_space<vmem>>, vector<1x16xf32>
    %c292 = arith.constant 292 : index
    %c0_21 = arith.constant 0 : index
    %35 = vector.load %arg2[%c292, %c0_21] : memref<488x128xf32, #tpu.memory_space<vmem>>, vector<1x16xf32>
    %c293 = arith.constant 293 : index
    %c0_22 = arith.constant 0 : index
    %36 = vector.load %arg2[%c293, %c0_22] : memref<488x128xf32, #tpu.memory_space<vmem>>, vector<1x16xf32>
    %c294 = arith.constant 294 : index
    %c0_23 = arith.constant 0 : index
    %37 = vector.load %arg2[%c294, %c0_23] : memref<488x128xf32, #tpu.memory_space<vmem>>, vector<1x16xf32>
    %c295 = arith.constant 295 : index
    %c0_24 = arith.constant 0 : index
    %38 = vector.load %arg2[%c295, %c0_24] : memref<488x128xf32, #tpu.memory_space<vmem>>, vector<1x16xf32>
    %cst_25 = arith.constant dense<0.000000e+00> : vector<17x48xf32>
    %39 = tpu.matmul %27, %28, %cst_25 {dimension_numbers = #tpu.dot_dimension_numbers<[1], [0], [0], [1], [0, 0, 1, 1], [], []>} : vector<17x16xf32>, vector<16x48xf32>, vector<17x48xf32> -> vector<17x48xf32>
    %40 = vector.broadcast %31 : vector<1x48xf32> to vector<17x48xf32>
    %41 = arith.addf %39, %40 : vector<17x48xf32>
    %cst_26 = arith.constant 0.000000e+00 : f32
    %42 = vector.broadcast %cst_26 : f32 to vector<17x16xf32>
    %43 = vector.extract_strided_slice %41 {offsets = [0, 0], sizes = [17, 4], strides = [1, 1]} : vector<17x48xf32> to vector<17x4xf32>
    %44 = vector.extract_strided_slice %41 {offsets = [0, 16], sizes = [17, 4], strides = [1, 1]} : vector<17x48xf32> to vector<17x4xf32>
    %45 = vector.extract_strided_slice %41 {offsets = [0, 32], sizes = [17, 4], strides = [1, 1]} : vector<17x48xf32> to vector<17x4xf32>
    %cst_27 = arith.constant dense<0.000000e+00> : vector<17x17xf32>
    %46 = tpu.matmul %43, %44, %cst_27 {dimension_numbers = #tpu.dot_dimension_numbers<[1], [1], [0], [0], [0, 0, 1, 0], [], []>} : vector<17x4xf32>, vector<17x4xf32>, vector<17x17xf32> -> vector<17x17xf32>
    %cst_28 = arith.constant 5.000000e-01 : f32
    %47 = vector.broadcast %cst_28 : f32 to vector<17x17xf32>
    %48 = arith.mulf %46, %47 : vector<17x17xf32>
    %cst_29 = arith.constant dense<0xFF800000> : vector<17xf32>
    %49 = vector.multi_reduction <maximumf>, %48, %cst_29 [1] : vector<17x17xf32> to vector<17xf32>
    %50 = vector.shape_cast %49 : vector<17xf32> to vector<17x1xf32>
    %51 = vector.broadcast %50 : vector<17x1xf32> to vector<17x17xf32>
    %52 = arith.subf %48, %51 : vector<17x17xf32>
    %53 = math.exp %52 : vector<17x17xf32>
    %cst_30 = arith.constant dense<0.000000e+00> : vector<17xf32>
    %54 = vector.multi_reduction <add>, %53, %cst_30 [1] : vector<17x17xf32> to vector<17xf32>
    %55 = vector.shape_cast %54 : vector<17xf32> to vector<17x1xf32>
    %56 = vector.broadcast %55 : vector<17x1xf32> to vector<17x17xf32>
    %57 = arith.divf %53, %56 : vector<17x17xf32>
    %cst_31 = arith.constant dense<0.000000e+00> : vector<17x4xf32>
    %58 = tpu.matmul %57, %45, %cst_31 {dimension_numbers = #tpu.dot_dimension_numbers<[1], [0], [0], [1], [0, 0, 1, 1], [], []>} : vector<17x17xf32>, vector<17x4xf32>, vector<17x4xf32> -> vector<17x4xf32>
    %c208 = arith.constant 208 : index
    %c0_32 = arith.constant 0 : index
    %59 = vector.load %arg2[%c208, %c0_32] : memref<488x128xf32, #tpu.memory_space<vmem>>, vector<4x16xf32>
    %cst_33 = arith.constant dense<0.000000e+00> : vector<17x16xf32>
    %60 = tpu.matmul %58, %59, %cst_33 {dimension_numbers = #tpu.dot_dimension_numbers<[1], [0], [0], [1], [0, 0, 1, 1], [], []>} : vector<17x4xf32>, vector<4x16xf32>, vector<17x16xf32> -> vector<17x16xf32>
    %61 = arith.addf %42, %60 : vector<17x16xf32>
    %62 = vector.extract_strided_slice %41 {offsets = [0, 4], sizes = [17, 4], strides = [1, 1]} : vector<17x48xf32> to vector<17x4xf32>
    %63 = vector.extract_strided_slice %41 {offsets = [0, 20], sizes = [17, 4], strides = [1, 1]} : vector<17x48xf32> to vector<17x4xf32>
    %64 = vector.extract_strided_slice %41 {offsets = [0, 36], sizes = [17, 4], strides = [1, 1]} : vector<17x48xf32> to vector<17x4xf32>
    %cst_34 = arith.constant dense<0.000000e+00> : vector<17x17xf32>
    %65 = tpu.matmul %62, %63, %cst_34 {dimension_numbers = #tpu.dot_dimension_numbers<[1], [1], [0], [0], [0, 0, 1, 0], [], []>} : vector<17x4xf32>, vector<17x4xf32>, vector<17x17xf32> -> vector<17x17xf32>
    %cst_35 = arith.constant 5.000000e-01 : f32
    %66 = vector.broadcast %cst_35 : f32 to vector<17x17xf32>
    %67 = arith.mulf %65, %66 : vector<17x17xf32>
    %cst_36 = arith.constant dense<0xFF800000> : vector<17xf32>
    %68 = vector.multi_reduction <maximumf>, %67, %cst_36 [1] : vector<17x17xf32> to vector<17xf32>
    %69 = vector.shape_cast %68 : vector<17xf32> to vector<17x1xf32>
    %70 = vector.broadcast %69 : vector<17x1xf32> to vector<17x17xf32>
    %71 = arith.subf %67, %70 : vector<17x17xf32>
    %72 = math.exp %71 : vector<17x17xf32>
    %cst_37 = arith.constant dense<0.000000e+00> : vector<17xf32>
    %73 = vector.multi_reduction <add>, %72, %cst_37 [1] : vector<17x17xf32> to vector<17xf32>
    %74 = vector.shape_cast %73 : vector<17xf32> to vector<17x1xf32>
    %75 = vector.broadcast %74 : vector<17x1xf32> to vector<17x17xf32>
    %76 = arith.divf %72, %75 : vector<17x17xf32>
    %cst_38 = arith.constant dense<0.000000e+00> : vector<17x4xf32>
    %77 = tpu.matmul %76, %64, %cst_38 {dimension_numbers = #tpu.dot_dimension_numbers<[1], [0], [0], [1], [0, 0, 1, 1], [], []>} : vector<17x17xf32>, vector<17x4xf32>, vector<17x4xf32> -> vector<17x4xf32>
    %c216 = arith.constant 216 : index
    %c0_39 = arith.constant 0 : index
    %78 = vector.load %arg2[%c216, %c0_39] : memref<488x128xf32, #tpu.memory_space<vmem>>, vector<4x16xf32>
    %cst_40 = arith.constant dense<0.000000e+00> : vector<17x16xf32>
    %79 = tpu.matmul %77, %78, %cst_40 {dimension_numbers = #tpu.dot_dimension_numbers<[1], [0], [0], [1], [0, 0, 1, 1], [], []>} : vector<17x4xf32>, vector<4x16xf32>, vector<17x16xf32> -> vector<17x16xf32>
    %80 = arith.addf %61, %79 : vector<17x16xf32>
    %81 = vector.extract_strided_slice %41 {offsets = [0, 8], sizes = [17, 4], strides = [1, 1]} : vector<17x48xf32> to vector<17x4xf32>
    %82 = vector.extract_strided_slice %41 {offsets = [0, 24], sizes = [17, 4], strides = [1, 1]} : vector<17x48xf32> to vector<17x4xf32>
    %83 = vector.extract_strided_slice %41 {offsets = [0, 40], sizes = [17, 4], strides = [1, 1]} : vector<17x48xf32> to vector<17x4xf32>
    %cst_41 = arith.constant dense<0.000000e+00> : vector<17x17xf32>
    %84 = tpu.matmul %81, %82, %cst_41 {dimension_numbers = #tpu.dot_dimension_numbers<[1], [1], [0], [0], [0, 0, 1, 0], [], []>} : vector<17x4xf32>, vector<17x4xf32>, vector<17x17xf32> -> vector<17x17xf32>
    %cst_42 = arith.constant 5.000000e-01 : f32
    %85 = vector.broadcast %cst_42 : f32 to vector<17x17xf32>
    %86 = arith.mulf %84, %85 : vector<17x17xf32>
    %cst_43 = arith.constant dense<0xFF800000> : vector<17xf32>
    %87 = vector.multi_reduction <maximumf>, %86, %cst_43 [1] : vector<17x17xf32> to vector<17xf32>
    %88 = vector.shape_cast %87 : vector<17xf32> to vector<17x1xf32>
    %89 = vector.broadcast %88 : vector<17x1xf32> to vector<17x17xf32>
    %90 = arith.subf %86, %89 : vector<17x17xf32>
    %91 = math.exp %90 : vector<17x17xf32>
    %cst_44 = arith.constant dense<0.000000e+00> : vector<17xf32>
    %92 = vector.multi_reduction <add>, %91, %cst_44 [1] : vector<17x17xf32> to vector<17xf32>
    %93 = vector.shape_cast %92 : vector<17xf32> to vector<17x1xf32>
    %94 = vector.broadcast %93 : vector<17x1xf32> to vector<17x17xf32>
    %95 = arith.divf %91, %94 : vector<17x17xf32>
    %cst_45 = arith.constant dense<0.000000e+00> : vector<17x4xf32>
    %96 = tpu.matmul %95, %83, %cst_45 {dimension_numbers = #tpu.dot_dimension_numbers<[1], [0], [0], [1], [0, 0, 1, 1], [], []>} : vector<17x17xf32>, vector<17x4xf32>, vector<17x4xf32> -> vector<17x4xf32>
    %c224 = arith.constant 224 : index
    %c0_46 = arith.constant 0 : index
    %97 = vector.load %arg2[%c224, %c0_46] : memref<488x128xf32, #tpu.memory_space<vmem>>, vector<4x16xf32>
    %cst_47 = arith.constant dense<0.000000e+00> : vector<17x16xf32>
    %98 = tpu.matmul %96, %97, %cst_47 {dimension_numbers = #tpu.dot_dimension_numbers<[1], [0], [0], [1], [0, 0, 1, 1], [], []>} : vector<17x4xf32>, vector<4x16xf32>, vector<17x16xf32> -> vector<17x16xf32>
    %99 = arith.addf %80, %98 : vector<17x16xf32>
    %100 = vector.extract_strided_slice %41 {offsets = [0, 12], sizes = [17, 4], strides = [1, 1]} : vector<17x48xf32> to vector<17x4xf32>
    %101 = vector.extract_strided_slice %41 {offsets = [0, 28], sizes = [17, 4], strides = [1, 1]} : vector<17x48xf32> to vector<17x4xf32>
    %102 = vector.extract_strided_slice %41 {offsets = [0, 44], sizes = [17, 4], strides = [1, 1]} : vector<17x48xf32> to vector<17x4xf32>
    %cst_48 = arith.constant dense<0.000000e+00> : vector<17x17xf32>
    %103 = tpu.matmul %100, %101, %cst_48 {dimension_numbers = #tpu.dot_dimension_numbers<[1], [1], [0], [0], [0, 0, 1, 0], [], []>} : vector<17x4xf32>, vector<17x4xf32>, vector<17x17xf32> -> vector<17x17xf32>
    %cst_49 = arith.constant 5.000000e-01 : f32
    %104 = vector.broadcast %cst_49 : f32 to vector<17x17xf32>
    %105 = arith.mulf %103, %104 : vector<17x17xf32>
    %cst_50 = arith.constant dense<0xFF800000> : vector<17xf32>
    %106 = vector.multi_reduction <maximumf>, %105, %cst_50 [1] : vector<17x17xf32> to vector<17xf32>
    %107 = vector.shape_cast %106 : vector<17xf32> to vector<17x1xf32>
    %108 = vector.broadcast %107 : vector<17x1xf32> to vector<17x17xf32>
    %109 = arith.subf %105, %108 : vector<17x17xf32>
    %110 = math.exp %109 : vector<17x17xf32>
    %cst_51 = arith.constant dense<0.000000e+00> : vector<17xf32>
    %111 = vector.multi_reduction <add>, %110, %cst_51 [1] : vector<17x17xf32> to vector<17xf32>
    %112 = vector.shape_cast %111 : vector<17xf32> to vector<17x1xf32>
    %113 = vector.broadcast %112 : vector<17x1xf32> to vector<17x17xf32>
    %114 = arith.divf %110, %113 : vector<17x17xf32>
    %cst_52 = arith.constant dense<0.000000e+00> : vector<17x4xf32>
    %115 = tpu.matmul %114, %102, %cst_52 {dimension_numbers = #tpu.dot_dimension_numbers<[1], [0], [0], [1], [0, 0, 1, 1], [], []>} : vector<17x17xf32>, vector<17x4xf32>, vector<17x4xf32> -> vector<17x4xf32>
    %c232 = arith.constant 232 : index
    %c0_53 = arith.constant 0 : index
    %116 = vector.load %arg2[%c232, %c0_53] : memref<488x128xf32, #tpu.memory_space<vmem>>, vector<4x16xf32>
    %cst_54 = arith.constant dense<0.000000e+00> : vector<17x16xf32>
    %117 = tpu.matmul %115, %116, %cst_54 {dimension_numbers = #tpu.dot_dimension_numbers<[1], [0], [0], [1], [0, 0, 1, 1], [], []>} : vector<17x4xf32>, vector<4x16xf32>, vector<17x16xf32> -> vector<17x16xf32>
    %118 = arith.addf %99, %117 : vector<17x16xf32>
    %119 = vector.broadcast %33 : vector<1x16xf32> to vector<17x16xf32>
    %120 = arith.addf %118, %119 : vector<17x16xf32>
    %121 = arith.addf %27, %120 : vector<17x16xf32>
    %cst_55 = arith.constant dense<0.000000e+00> : vector<17xf32>
    %122 = vector.multi_reduction <add>, %121, %cst_55 [1] : vector<17x16xf32> to vector<17xf32>
    %123 = vector.shape_cast %122 : vector<17xf32> to vector<17x1xf32>
    %cst_56 = arith.constant 1.600000e+01 : f32
    %124 = vector.broadcast %cst_56 : f32 to vector<17x1xf32>
    %125 = arith.divf %123, %124 : vector<17x1xf32>
    %126 = vector.broadcast %125 : vector<17x1xf32> to vector<17x16xf32>
    %127 = arith.subf %121, %126 : vector<17x16xf32>
    %128 = arith.mulf %127, %127 : vector<17x16xf32>
    %cst_57 = arith.constant dense<0.000000e+00> : vector<17xf32>
    %129 = vector.multi_reduction <add>, %128, %cst_57 [1] : vector<17x16xf32> to vector<17xf32>
    %130 = vector.shape_cast %129 : vector<17xf32> to vector<17x1xf32>
    %cst_58 = arith.constant 1.600000e+01 : f32
    %131 = vector.broadcast %cst_58 : f32 to vector<17x1xf32>
    %132 = arith.divf %130, %131 : vector<17x1xf32>
    %133 = vector.broadcast %125 : vector<17x1xf32> to vector<17x16xf32>
    %134 = arith.subf %121, %133 : vector<17x16xf32>
    %cst_59 = arith.constant 9.99999974E-6 : f32
    %135 = vector.broadcast %cst_59 : f32 to vector<17x1xf32>
    %136 = arith.addf %132, %135 : vector<17x1xf32>
    %137 = math.rsqrt %136 : vector<17x1xf32>
    %138 = vector.broadcast %137 : vector<17x1xf32> to vector<17x16xf32>
    %139 = arith.mulf %134, %138 : vector<17x16xf32>
    %140 = vector.broadcast %34 : vector<1x16xf32> to vector<17x16xf32>
    %141 = arith.mulf %139, %140 : vector<17x16xf32>
    %142 = vector.broadcast %35 : vector<1x16xf32> to vector<17x16xf32>
    %143 = arith.addf %141, %142 : vector<17x16xf32>
    %cst_60 = arith.constant dense<0.000000e+00> : vector<17x32xf32>
    %144 = tpu.matmul %143, %29, %cst_60 {dimension_numbers = #tpu.dot_dimension_numbers<[1], [0], [0], [1], [0, 0, 1, 1], [], []>} : vector<17x16xf32>, vector<16x32xf32>, vector<17x32xf32> -> vector<17x32xf32>
    %145 = vector.broadcast %32 : vector<1x32xf32> to vector<17x32xf32>
    %146 = arith.addf %144, %145 : vector<17x32xf32>
    %147 = arith.mulf %146, %146 : vector<17x32xf32>
    %148 = arith.mulf %146, %147 : vector<17x32xf32>
    %cst_61 = arith.constant 4.471500e-02 : f32
    %149 = vector.broadcast %cst_61 : f32 to vector<17x32xf32>
    %150 = arith.mulf %149, %148 : vector<17x32xf32>
    %151 = arith.addf %146, %150 : vector<17x32xf32>
    %cst_62 = arith.constant 0.797884583 : f32
    %152 = vector.broadcast %cst_62 : f32 to vector<17x32xf32>
    %153 = arith.mulf %152, %151 : vector<17x32xf32>
    %154 = math.tanh %153 : vector<17x32xf32>
    %cst_63 = arith.constant 1.000000e+00 : f32
    %155 = vector.broadcast %cst_63 : f32 to vector<17x32xf32>
    %156 = arith.addf %155, %154 : vector<17x32xf32>
    %cst_64 = arith.constant 5.000000e-01 : f32
    %157 = vector.broadcast %cst_64 : f32 to vector<17x32xf32>
    %158 = arith.mulf %157, %156 : vector<17x32xf32>
    %159 = arith.mulf %146, %158 : vector<17x32xf32>
    %cst_65 = arith.constant dense<0.000000e+00> : vector<17x16xf32>
    %160 = tpu.matmul %159, %30, %cst_65 {dimension_numbers = #tpu.dot_dimension_numbers<[1], [0], [0], [1], [0, 0, 1, 1], [], []>} : vector<17x32xf32>, vector<32x16xf32>, vector<17x16xf32> -> vector<17x16xf32>
    %161 = vector.broadcast %36 : vector<1x16xf32> to vector<17x16xf32>
    %162 = arith.addf %160, %161 : vector<17x16xf32>
    %163 = arith.addf %143, %162 : vector<17x16xf32>
    %cst_66 = arith.constant dense<0.000000e+00> : vector<17xf32>
    %164 = vector.multi_reduction <add>, %163, %cst_66 [1] : vector<17x16xf32> to vector<17xf32>
    %165 = vector.shape_cast %164 : vector<17xf32> to vector<17x1xf32>
    %cst_67 = arith.constant 1.600000e+01 : f32
    %166 = vector.broadcast %cst_67 : f32 to vector<17x1xf32>
    %167 = arith.divf %165, %166 : vector<17x1xf32>
    %168 = vector.broadcast %167 : vector<17x1xf32> to vector<17x16xf32>
    %169 = arith.subf %163, %168 : vector<17x16xf32>
    %170 = arith.mulf %169, %169 : vector<17x16xf32>
    %cst_68 = arith.constant dense<0.000000e+00> : vector<17xf32>
    %171 = vector.multi_reduction <add>, %170, %cst_68 [1] : vector<17x16xf32> to vector<17xf32>
    %172 = vector.shape_cast %171 : vector<17xf32> to vector<17x1xf32>
    %cst_69 = arith.constant 1.600000e+01 : f32
    %173 = vector.broadcast %cst_69 : f32 to vector<17x1xf32>
    %174 = arith.divf %172, %173 : vector<17x1xf32>
    %175 = vector.broadcast %167 : vector<17x1xf32> to vector<17x16xf32>
    %176 = arith.subf %163, %175 : vector<17x16xf32>
    %cst_70 = arith.constant 9.99999974E-6 : f32
    %177 = vector.broadcast %cst_70 : f32 to vector<17x1xf32>
    %178 = arith.addf %174, %177 : vector<17x1xf32>
    %179 = math.rsqrt %178 : vector<17x1xf32>
    %180 = vector.broadcast %179 : vector<17x1xf32> to vector<17x16xf32>
    %181 = arith.mulf %176, %180 : vector<17x16xf32>
    %182 = vector.broadcast %37 : vector<1x16xf32> to vector<17x16xf32>
    %183 = arith.mulf %181, %182 : vector<17x16xf32>
    %184 = vector.broadcast %38 : vector<1x16xf32> to vector<17x16xf32>
    %185 = arith.addf %183, %184 : vector<17x16xf32>
    %c296 = arith.constant 296 : index
    %c0_71 = arith.constant 0 : index
    %186 = vector.load %arg2[%c296, %c0_71] : memref<488x128xf32, #tpu.memory_space<vmem>>, vector<16x48xf32>
    %c344 = arith.constant 344 : index
    %c0_72 = arith.constant 0 : index
    %187 = vector.load %arg2[%c344, %c0_72] : memref<488x128xf32, #tpu.memory_space<vmem>>, vector<16x32xf32>
    %c360 = arith.constant 360 : index
    %c0_73 = arith.constant 0 : index
    %188 = vector.load %arg2[%c360, %c0_73] : memref<488x128xf32, #tpu.memory_space<vmem>>, vector<32x16xf32>
    %c392 = arith.constant 392 : index
    %c0_74 = arith.constant 0 : index
    %189 = vector.load %arg2[%c392, %c0_74] : memref<488x128xf32, #tpu.memory_space<vmem>>, vector<1x48xf32>
    %c393 = arith.constant 393 : index
    %c0_75 = arith.constant 0 : index
    %190 = vector.load %arg2[%c393, %c0_75] : memref<488x128xf32, #tpu.memory_space<vmem>>, vector<1x32xf32>
    %c394 = arith.constant 394 : index
    %c0_76 = arith.constant 0 : index
    %191 = vector.load %arg2[%c394, %c0_76] : memref<488x128xf32, #tpu.memory_space<vmem>>, vector<1x16xf32>
    %c395 = arith.constant 395 : index
    %c0_77 = arith.constant 0 : index
    %192 = vector.load %arg2[%c395, %c0_77] : memref<488x128xf32, #tpu.memory_space<vmem>>, vector<1x16xf32>
    %c396 = arith.constant 396 : index
    %c0_78 = arith.constant 0 : index
    %193 = vector.load %arg2[%c396, %c0_78] : memref<488x128xf32, #tpu.memory_space<vmem>>, vector<1x16xf32>
    %c397 = arith.constant 397 : index
    %c0_79 = arith.constant 0 : index
    %194 = vector.load %arg2[%c397, %c0_79] : memref<488x128xf32, #tpu.memory_space<vmem>>, vector<1x16xf32>
    %c398 = arith.constant 398 : index
    %c0_80 = arith.constant 0 : index
    %195 = vector.load %arg2[%c398, %c0_80] : memref<488x128xf32, #tpu.memory_space<vmem>>, vector<1x16xf32>
    %c399 = arith.constant 399 : index
    %c0_81 = arith.constant 0 : index
    %196 = vector.load %arg2[%c399, %c0_81] : memref<488x128xf32, #tpu.memory_space<vmem>>, vector<1x16xf32>
    %cst_82 = arith.constant dense<0.000000e+00> : vector<17x48xf32>
    %197 = tpu.matmul %185, %186, %cst_82 {dimension_numbers = #tpu.dot_dimension_numbers<[1], [0], [0], [1], [0, 0, 1, 1], [], []>} : vector<17x16xf32>, vector<16x48xf32>, vector<17x48xf32> -> vector<17x48xf32>
    %198 = vector.broadcast %189 : vector<1x48xf32> to vector<17x48xf32>
    %199 = arith.addf %197, %198 : vector<17x48xf32>
    %cst_83 = arith.constant 0.000000e+00 : f32
    %200 = vector.broadcast %cst_83 : f32 to vector<17x16xf32>
    %201 = vector.extract_strided_slice %199 {offsets = [0, 0], sizes = [17, 4], strides = [1, 1]} : vector<17x48xf32> to vector<17x4xf32>
    %202 = vector.extract_strided_slice %199 {offsets = [0, 16], sizes = [17, 4], strides = [1, 1]} : vector<17x48xf32> to vector<17x4xf32>
    %203 = vector.extract_strided_slice %199 {offsets = [0, 32], sizes = [17, 4], strides = [1, 1]} : vector<17x48xf32> to vector<17x4xf32>
    %cst_84 = arith.constant dense<0.000000e+00> : vector<17x17xf32>
    %204 = tpu.matmul %201, %202, %cst_84 {dimension_numbers = #tpu.dot_dimension_numbers<[1], [1], [0], [0], [0, 0, 1, 0], [], []>} : vector<17x4xf32>, vector<17x4xf32>, vector<17x17xf32> -> vector<17x17xf32>
    %cst_85 = arith.constant 5.000000e-01 : f32
    %205 = vector.broadcast %cst_85 : f32 to vector<17x17xf32>
    %206 = arith.mulf %204, %205 : vector<17x17xf32>
    %cst_86 = arith.constant dense<0xFF800000> : vector<17xf32>
    %207 = vector.multi_reduction <maximumf>, %206, %cst_86 [1] : vector<17x17xf32> to vector<17xf32>
    %208 = vector.shape_cast %207 : vector<17xf32> to vector<17x1xf32>
    %209 = vector.broadcast %208 : vector<17x1xf32> to vector<17x17xf32>
    %210 = arith.subf %206, %209 : vector<17x17xf32>
    %211 = math.exp %210 : vector<17x17xf32>
    %cst_87 = arith.constant dense<0.000000e+00> : vector<17xf32>
    %212 = vector.multi_reduction <add>, %211, %cst_87 [1] : vector<17x17xf32> to vector<17xf32>
    %213 = vector.shape_cast %212 : vector<17xf32> to vector<17x1xf32>
    %214 = vector.broadcast %213 : vector<17x1xf32> to vector<17x17xf32>
    %215 = arith.divf %211, %214 : vector<17x17xf32>
    %cst_88 = arith.constant dense<0.000000e+00> : vector<17x4xf32>
    %216 = tpu.matmul %215, %203, %cst_88 {dimension_numbers = #tpu.dot_dimension_numbers<[1], [0], [0], [1], [0, 0, 1, 1], [], []>} : vector<17x17xf32>, vector<17x4xf32>, vector<17x4xf32> -> vector<17x4xf32>
    %c312 = arith.constant 312 : index
    %c0_89 = arith.constant 0 : index
    %217 = vector.load %arg2[%c312, %c0_89] : memref<488x128xf32, #tpu.memory_space<vmem>>, vector<4x16xf32>
    %cst_90 = arith.constant dense<0.000000e+00> : vector<17x16xf32>
    %218 = tpu.matmul %216, %217, %cst_90 {dimension_numbers = #tpu.dot_dimension_numbers<[1], [0], [0], [1], [0, 0, 1, 1], [], []>} : vector<17x4xf32>, vector<4x16xf32>, vector<17x16xf32> -> vector<17x16xf32>
    %219 = arith.addf %200, %218 : vector<17x16xf32>
    %220 = vector.extract_strided_slice %199 {offsets = [0, 4], sizes = [17, 4], strides = [1, 1]} : vector<17x48xf32> to vector<17x4xf32>
    %221 = vector.extract_strided_slice %199 {offsets = [0, 20], sizes = [17, 4], strides = [1, 1]} : vector<17x48xf32> to vector<17x4xf32>
    %222 = vector.extract_strided_slice %199 {offsets = [0, 36], sizes = [17, 4], strides = [1, 1]} : vector<17x48xf32> to vector<17x4xf32>
    %cst_91 = arith.constant dense<0.000000e+00> : vector<17x17xf32>
    %223 = tpu.matmul %220, %221, %cst_91 {dimension_numbers = #tpu.dot_dimension_numbers<[1], [1], [0], [0], [0, 0, 1, 0], [], []>} : vector<17x4xf32>, vector<17x4xf32>, vector<17x17xf32> -> vector<17x17xf32>
    %cst_92 = arith.constant 5.000000e-01 : f32
    %224 = vector.broadcast %cst_92 : f32 to vector<17x17xf32>
    %225 = arith.mulf %223, %224 : vector<17x17xf32>
    %cst_93 = arith.constant dense<0xFF800000> : vector<17xf32>
    %226 = vector.multi_reduction <maximumf>, %225, %cst_93 [1] : vector<17x17xf32> to vector<17xf32>
    %227 = vector.shape_cast %226 : vector<17xf32> to vector<17x1xf32>
    %228 = vector.broadcast %227 : vector<17x1xf32> to vector<17x17xf32>
    %229 = arith.subf %225, %228 : vector<17x17xf32>
    %230 = math.exp %229 : vector<17x17xf32>
    %cst_94 = arith.constant dense<0.000000e+00> : vector<17xf32>
    %231 = vector.multi_reduction <add>, %230, %cst_94 [1] : vector<17x17xf32> to vector<17xf32>
    %232 = vector.shape_cast %231 : vector<17xf32> to vector<17x1xf32>
    %233 = vector.broadcast %232 : vector<17x1xf32> to vector<17x17xf32>
    %234 = arith.divf %230, %233 : vector<17x17xf32>
    %cst_95 = arith.constant dense<0.000000e+00> : vector<17x4xf32>
    %235 = tpu.matmul %234, %222, %cst_95 {dimension_numbers = #tpu.dot_dimension_numbers<[1], [0], [0], [1], [0, 0, 1, 1], [], []>} : vector<17x17xf32>, vector<17x4xf32>, vector<17x4xf32> -> vector<17x4xf32>
    %c320 = arith.constant 320 : index
    %c0_96 = arith.constant 0 : index
    %236 = vector.load %arg2[%c320, %c0_96] : memref<488x128xf32, #tpu.memory_space<vmem>>, vector<4x16xf32>
    %cst_97 = arith.constant dense<0.000000e+00> : vector<17x16xf32>
    %237 = tpu.matmul %235, %236, %cst_97 {dimension_numbers = #tpu.dot_dimension_numbers<[1], [0], [0], [1], [0, 0, 1, 1], [], []>} : vector<17x4xf32>, vector<4x16xf32>, vector<17x16xf32> -> vector<17x16xf32>
    %238 = arith.addf %219, %237 : vector<17x16xf32>
    %239 = vector.extract_strided_slice %199 {offsets = [0, 8], sizes = [17, 4], strides = [1, 1]} : vector<17x48xf32> to vector<17x4xf32>
    %240 = vector.extract_strided_slice %199 {offsets = [0, 24], sizes = [17, 4], strides = [1, 1]} : vector<17x48xf32> to vector<17x4xf32>
    %241 = vector.extract_strided_slice %199 {offsets = [0, 40], sizes = [17, 4], strides = [1, 1]} : vector<17x48xf32> to vector<17x4xf32>
    %cst_98 = arith.constant dense<0.000000e+00> : vector<17x17xf32>
    %242 = tpu.matmul %239, %240, %cst_98 {dimension_numbers = #tpu.dot_dimension_numbers<[1], [1], [0], [0], [0, 0, 1, 0], [], []>} : vector<17x4xf32>, vector<17x4xf32>, vector<17x17xf32> -> vector<17x17xf32>
    %cst_99 = arith.constant 5.000000e-01 : f32
    %243 = vector.broadcast %cst_99 : f32 to vector<17x17xf32>
    %244 = arith.mulf %242, %243 : vector<17x17xf32>
    %cst_100 = arith.constant dense<0xFF800000> : vector<17xf32>
    %245 = vector.multi_reduction <maximumf>, %244, %cst_100 [1] : vector<17x17xf32> to vector<17xf32>
    %246 = vector.shape_cast %245 : vector<17xf32> to vector<17x1xf32>
    %247 = vector.broadcast %246 : vector<17x1xf32> to vector<17x17xf32>
    %248 = arith.subf %244, %247 : vector<17x17xf32>
    %249 = math.exp %248 : vector<17x17xf32>
    %cst_101 = arith.constant dense<0.000000e+00> : vector<17xf32>
    %250 = vector.multi_reduction <add>, %249, %cst_101 [1] : vector<17x17xf32> to vector<17xf32>
    %251 = vector.shape_cast %250 : vector<17xf32> to vector<17x1xf32>
    %252 = vector.broadcast %251 : vector<17x1xf32> to vector<17x17xf32>
    %253 = arith.divf %249, %252 : vector<17x17xf32>
    %cst_102 = arith.constant dense<0.000000e+00> : vector<17x4xf32>
    %254 = tpu.matmul %253, %241, %cst_102 {dimension_numbers = #tpu.dot_dimension_numbers<[1], [0], [0], [1], [0, 0, 1, 1], [], []>} : vector<17x17xf32>, vector<17x4xf32>, vector<17x4xf32> -> vector<17x4xf32>
    %c328 = arith.constant 328 : index
    %c0_103 = arith.constant 0 : index
    %255 = vector.load %arg2[%c328, %c0_103] : memref<488x128xf32, #tpu.memory_space<vmem>>, vector<4x16xf32>
    %cst_104 = arith.constant dense<0.000000e+00> : vector<17x16xf32>
    %256 = tpu.matmul %254, %255, %cst_104 {dimension_numbers = #tpu.dot_dimension_numbers<[1], [0], [0], [1], [0, 0, 1, 1], [], []>} : vector<17x4xf32>, vector<4x16xf32>, vector<17x16xf32> -> vector<17x16xf32>
    %257 = arith.addf %238, %256 : vector<17x16xf32>
    %258 = vector.extract_strided_slice %199 {offsets = [0, 12], sizes = [17, 4], strides = [1, 1]} : vector<17x48xf32> to vector<17x4xf32>
    %259 = vector.extract_strided_slice %199 {offsets = [0, 28], sizes = [17, 4], strides = [1, 1]} : vector<17x48xf32> to vector<17x4xf32>
    %260 = vector.extract_strided_slice %199 {offsets = [0, 44], sizes = [17, 4], strides = [1, 1]} : vector<17x48xf32> to vector<17x4xf32>
    %cst_105 = arith.constant dense<0.000000e+00> : vector<17x17xf32>
    %261 = tpu.matmul %258, %259, %cst_105 {dimension_numbers = #tpu.dot_dimension_numbers<[1], [1], [0], [0], [0, 0, 1, 0], [], []>} : vector<17x4xf32>, vector<17x4xf32>, vector<17x17xf32> -> vector<17x17xf32>
    %cst_106 = arith.constant 5.000000e-01 : f32
    %262 = vector.broadcast %cst_106 : f32 to vector<17x17xf32>
    %263 = arith.mulf %261, %262 : vector<17x17xf32>
    %cst_107 = arith.constant dense<0xFF800000> : vector<17xf32>
    %264 = vector.multi_reduction <maximumf>, %263, %cst_107 [1] : vector<17x17xf32> to vector<17xf32>
    %265 = vector.shape_cast %264 : vector<17xf32> to vector<17x1xf32>
    %266 = vector.broadcast %265 : vector<17x1xf32> to vector<17x17xf32>
    %267 = arith.subf %263, %266 : vector<17x17xf32>
    %268 = math.exp %267 : vector<17x17xf32>
    %cst_108 = arith.constant dense<0.000000e+00> : vector<17xf32>
    %269 = vector.multi_reduction <add>, %268, %cst_108 [1] : vector<17x17xf32> to vector<17xf32>
    %270 = vector.shape_cast %269 : vector<17xf32> to vector<17x1xf32>
    %271 = vector.broadcast %270 : vector<17x1xf32> to vector<17x17xf32>
    %272 = arith.divf %268, %271 : vector<17x17xf32>
    %cst_109 = arith.constant dense<0.000000e+00> : vector<17x4xf32>
    %273 = tpu.matmul %272, %260, %cst_109 {dimension_numbers = #tpu.dot_dimension_numbers<[1], [0], [0], [1], [0, 0, 1, 1], [], []>} : vector<17x17xf32>, vector<17x4xf32>, vector<17x4xf32> -> vector<17x4xf32>
    %c336 = arith.constant 336 : index
    %c0_110 = arith.constant 0 : index
    %274 = vector.load %arg2[%c336, %c0_110] : memref<488x128xf32, #tpu.memory_space<vmem>>, vector<4x16xf32>
    %cst_111 = arith.constant dense<0.000000e+00> : vector<17x16xf32>
    %275 = tpu.matmul %273, %274, %cst_111 {dimension_numbers = #tpu.dot_dimension_numbers<[1], [0], [0], [1], [0, 0, 1, 1], [], []>} : vector<17x4xf32>, vector<4x16xf32>, vector<17x16xf32> -> vector<17x16xf32>
    %276 = arith.addf %257, %275 : vector<17x16xf32>
    %277 = vector.broadcast %191 : vector<1x16xf32> to vector<17x16xf32>
    %278 = arith.addf %276, %277 : vector<17x16xf32>
    %279 = arith.addf %185, %278 : vector<17x16xf32>
    %cst_112 = arith.constant dense<0.000000e+00> : vector<17xf32>
    %280 = vector.multi_reduction <add>, %279, %cst_112 [1] : vector<17x16xf32> to vector<17xf32>
    %281 = vector.shape_cast %280 : vector<17xf32> to vector<17x1xf32>
    %cst_113 = arith.constant 1.600000e+01 : f32
    %282 = vector.broadcast %cst_113 : f32 to vector<17x1xf32>
    %283 = arith.divf %281, %282 : vector<17x1xf32>
    %284 = vector.broadcast %283 : vector<17x1xf32> to vector<17x16xf32>
    %285 = arith.subf %279, %284 : vector<17x16xf32>
    %286 = arith.mulf %285, %285 : vector<17x16xf32>
    %cst_114 = arith.constant dense<0.000000e+00> : vector<17xf32>
    %287 = vector.multi_reduction <add>, %286, %cst_114 [1] : vector<17x16xf32> to vector<17xf32>
    %288 = vector.shape_cast %287 : vector<17xf32> to vector<17x1xf32>
    %cst_115 = arith.constant 1.600000e+01 : f32
    %289 = vector.broadcast %cst_115 : f32 to vector<17x1xf32>
    %290 = arith.divf %288, %289 : vector<17x1xf32>
    %291 = vector.broadcast %283 : vector<17x1xf32> to vector<17x16xf32>
    %292 = arith.subf %279, %291 : vector<17x16xf32>
    %cst_116 = arith.constant 9.99999974E-6 : f32
    %293 = vector.broadcast %cst_116 : f32 to vector<17x1xf32>
    %294 = arith.addf %290, %293 : vector<17x1xf32>
    %295 = math.rsqrt %294 : vector<17x1xf32>
    %296 = vector.broadcast %295 : vector<17x1xf32> to vector<17x16xf32>
    %297 = arith.mulf %292, %296 : vector<17x16xf32>
    %298 = vector.broadcast %192 : vector<1x16xf32> to vector<17x16xf32>
    %299 = arith.mulf %297, %298 : vector<17x16xf32>
    %300 = vector.broadcast %193 : vector<1x16xf32> to vector<17x16xf32>
    %301 = arith.addf %299, %300 : vector<17x16xf32>
    %cst_117 = arith.constant dense<0.000000e+00> : vector<17x32xf32>
    %302 = tpu.matmul %301, %187, %cst_117 {dimension_numbers = #tpu.dot_dimension_numbers<[1], [0], [0], [1], [0, 0, 1, 1], [], []>} : vector<17x16xf32>, vector<16x32xf32>, vector<17x32xf32> -> vector<17x32xf32>
    %303 = vector.broadcast %190 : vector<1x32xf32> to vector<17x32xf32>
    %304 = arith.addf %302, %303 : vector<17x32xf32>
    %305 = arith.mulf %304, %304 : vector<17x32xf32>
    %306 = arith.mulf %304, %305 : vector<17x32xf32>
    %cst_118 = arith.constant 4.471500e-02 : f32
    %307 = vector.broadcast %cst_118 : f32 to vector<17x32xf32>
    %308 = arith.mulf %307, %306 : vector<17x32xf32>
    %309 = arith.addf %304, %308 : vector<17x32xf32>
    %cst_119 = arith.constant 0.797884583 : f32
    %310 = vector.broadcast %cst_119 : f32 to vector<17x32xf32>
    %311 = arith.mulf %310, %309 : vector<17x32xf32>
    %312 = math.tanh %311 : vector<17x32xf32>
    %cst_120 = arith.constant 1.000000e+00 : f32
    %313 = vector.broadcast %cst_120 : f32 to vector<17x32xf32>
    %314 = arith.addf %313, %312 : vector<17x32xf32>
    %cst_121 = arith.constant 5.000000e-01 : f32
    %315 = vector.broadcast %cst_121 : f32 to vector<17x32xf32>
    %316 = arith.mulf %315, %314 : vector<17x32xf32>
    %317 = arith.mulf %304, %316 : vector<17x32xf32>
    %cst_122 = arith.constant dense<0.000000e+00> : vector<17x16xf32>
    %318 = tpu.matmul %317, %188, %cst_122 {dimension_numbers = #tpu.dot_dimension_numbers<[1], [0], [0], [1], [0, 0, 1, 1], [], []>} : vector<17x32xf32>, vector<32x16xf32>, vector<17x16xf32> -> vector<17x16xf32>
    %319 = vector.broadcast %194 : vector<1x16xf32> to vector<17x16xf32>
    %320 = arith.addf %318, %319 : vector<17x16xf32>
    %321 = arith.addf %301, %320 : vector<17x16xf32>
    %cst_123 = arith.constant dense<0.000000e+00> : vector<17xf32>
    %322 = vector.multi_reduction <add>, %321, %cst_123 [1] : vector<17x16xf32> to vector<17xf32>
    %323 = vector.shape_cast %322 : vector<17xf32> to vector<17x1xf32>
    %cst_124 = arith.constant 1.600000e+01 : f32
    %324 = vector.broadcast %cst_124 : f32 to vector<17x1xf32>
    %325 = arith.divf %323, %324 : vector<17x1xf32>
    %326 = vector.broadcast %325 : vector<17x1xf32> to vector<17x16xf32>
    %327 = arith.subf %321, %326 : vector<17x16xf32>
    %328 = arith.mulf %327, %327 : vector<17x16xf32>
    %cst_125 = arith.constant dense<0.000000e+00> : vector<17xf32>
    %329 = vector.multi_reduction <add>, %328, %cst_125 [1] : vector<17x16xf32> to vector<17xf32>
    %330 = vector.shape_cast %329 : vector<17xf32> to vector<17x1xf32>
    %cst_126 = arith.constant 1.600000e+01 : f32
    %331 = vector.broadcast %cst_126 : f32 to vector<17x1xf32>
    %332 = arith.divf %330, %331 : vector<17x1xf32>
    %333 = vector.broadcast %325 : vector<17x1xf32> to vector<17x16xf32>
    %334 = arith.subf %321, %333 : vector<17x16xf32>
    %cst_127 = arith.constant 9.99999974E-6 : f32
    %335 = vector.broadcast %cst_127 : f32 to vector<17x1xf32>
    %336 = arith.addf %332, %335 : vector<17x1xf32>
    %337 = math.rsqrt %336 : vector<17x1xf32>
    %338 = vector.broadcast %337 : vector<17x1xf32> to vector<17x16xf32>
    %339 = arith.mulf %334, %338 : vector<17x16xf32>
    %340 = vector.broadcast %195 : vector<1x16xf32> to vector<17x16xf32>
    %341 = arith.mulf %339, %340 : vector<17x16xf32>
    %342 = vector.broadcast %196 : vector<1x16xf32> to vector<17x16xf32>
    %343 = arith.addf %341, %342 : vector<17x16xf32>
    %cst_128 = arith.constant dense<0.000000e+00> : vector<16xf32>
    %344 = vector.multi_reduction <add>, %343, %cst_128 [0] : vector<17x16xf32> to vector<16xf32>
    %345 = vector.shape_cast %344 : vector<16xf32> to vector<1x16xf32>
    %cst_129 = arith.constant 1.700000e+01 : f32
    %346 = vector.broadcast %cst_129 : f32 to vector<1x16xf32>
    %347 = arith.divf %345, %346 : vector<1x16xf32>
    %cst_130 = arith.constant dense<0xFF800000> : vector<16xf32>
    %348 = vector.multi_reduction <maximumf>, %343, %cst_130 [0] : vector<17x16xf32> to vector<16xf32>
    %349 = vector.shape_cast %348 : vector<16xf32> to vector<1x16xf32>
    %350 = arith.addf %347, %349 : vector<1x16xf32>
    %c400 = arith.constant 400 : index
    %c0_131 = arith.constant 0 : index
    %351 = vector.load %arg2[%c400, %c0_131] : memref<488x128xf32, #tpu.memory_space<vmem>>, vector<16x32xf32>
    %c416 = arith.constant 416 : index
    %c0_132 = arith.constant 0 : index
    %352 = vector.load %arg2[%c416, %c0_132] : memref<488x128xf32, #tpu.memory_space<vmem>>, vector<32x32xf32>
    %c448 = arith.constant 448 : index
    %c0_133 = arith.constant 0 : index
    %353 = vector.load %arg2[%c448, %c0_133] : memref<488x128xf32, #tpu.memory_space<vmem>>, vector<32x6xf32>
    %c480 = arith.constant 480 : index
    %c0_134 = arith.constant 0 : index
    %354 = vector.load %arg2[%c480, %c0_134] : memref<488x128xf32, #tpu.memory_space<vmem>>, vector<1x32xf32>
    %c481 = arith.constant 481 : index
    %c0_135 = arith.constant 0 : index
    %355 = vector.load %arg2[%c481, %c0_135] : memref<488x128xf32, #tpu.memory_space<vmem>>, vector<1x32xf32>
    %c482 = arith.constant 482 : index
    %c0_136 = arith.constant 0 : index
    %356 = vector.load %arg2[%c482, %c0_136] : memref<488x128xf32, #tpu.memory_space<vmem>>, vector<1x32xf32>
    %c483 = arith.constant 483 : index
    %c0_137 = arith.constant 0 : index
    %357 = vector.load %arg2[%c483, %c0_137] : memref<488x128xf32, #tpu.memory_space<vmem>>, vector<1x32xf32>
    %c484 = arith.constant 484 : index
    %c0_138 = arith.constant 0 : index
    %358 = vector.load %arg2[%c484, %c0_138] : memref<488x128xf32, #tpu.memory_space<vmem>>, vector<1x32xf32>
    %c485 = arith.constant 485 : index
    %c0_139 = arith.constant 0 : index
    %359 = vector.load %arg2[%c485, %c0_139] : memref<488x128xf32, #tpu.memory_space<vmem>>, vector<1x32xf32>
    %cst_140 = arith.constant dense<0.000000e+00> : vector<1x32xf32>
    %360 = tpu.matmul %350, %351, %cst_140 {dimension_numbers = #tpu.dot_dimension_numbers<[1], [0], [0], [1], [0, 0, 1, 1], [], []>} : vector<1x16xf32>, vector<16x32xf32>, vector<1x32xf32> -> vector<1x32xf32>
    %361 = arith.addf %360, %354 : vector<1x32xf32>
    %362 = arith.subf %361, %357 : vector<1x32xf32>
    %cst_141 = arith.constant 9.99999974E-6 : f32
    %363 = vector.broadcast %cst_141 : f32 to vector<1x32xf32>
    %364 = arith.addf %358, %363 : vector<1x32xf32>
    %365 = math.rsqrt %364 : vector<1x32xf32>
    %366 = arith.mulf %362, %365 : vector<1x32xf32>
    %367 = arith.mulf %366, %355 : vector<1x32xf32>
    %368 = arith.addf %367, %356 : vector<1x32xf32>
    %cst_142 = arith.constant 0.000000e+00 : f32
    %369 = vector.broadcast %cst_142 : f32 to vector<1x32xf32>
    %370 = arith.cmpf oge, %368, %369 : vector<1x32xf32>
    %371 = vector.broadcast %0 : f32 to vector<1x32xf32>
    %372 = arith.mulf %368, %371 : vector<1x32xf32>
    %373 = arith.select %370, %368, %372 : vector<1x32xi1>, vector<1x32xf32>
    %cst_143 = arith.constant dense<0.000000e+00> : vector<1x32xf32>
    %374 = tpu.matmul %373, %352, %cst_143 {dimension_numbers = #tpu.dot_dimension_numbers<[1], [0], [0], [1], [0, 0, 1, 1], [], []>} : vector<1x32xf32>, vector<32x32xf32>, vector<1x32xf32> -> vector<1x32xf32>
    %375 = arith.addf %374, %359 : vector<1x32xf32>
    %376 = arith.mulf %375, %375 : vector<1x32xf32>
    %cst_144 = arith.constant dense<0.000000e+00> : vector<1xf32>
    %377 = vector.multi_reduction <add>, %376, %cst_144 [1] : vector<1x32xf32> to vector<1xf32>
    %378 = vector.shape_cast %377 : vector<1xf32> to vector<1x1xf32>
    %cst_145 = arith.constant 3.125000e-02 : f32
    %379 = vector.broadcast %cst_145 : f32 to vector<1x1xf32>
    %380 = arith.mulf %378, %379 : vector<1x1xf32>
    %381 = vector.broadcast %1 : f32 to vector<1x1xf32>
    %382 = arith.mulf %380, %381 : vector<1x1xf32>
    %383 = vector.broadcast %2 : f32 to vector<1x1xf32>
    %384 = arith.addf %382, %383 : vector<1x1xf32>
    %cst_146 = arith.constant dense<0.000000e+00> : vector<1x6xf32>
    %385 = tpu.matmul %375, %353, %cst_146 {dimension_numbers = #tpu.dot_dimension_numbers<[1], [0], [0], [1], [0, 0, 1, 1], [], []>} : vector<1x32xf32>, vector<32x6xf32>, vector<1x6xf32> -> vector<1x6xf32>
    %cst_147 = arith.constant 0.000000e+00 : f32
    %386 = vector.broadcast %cst_147 : f32 to vector<1x89xf32>
    %387 = tpu.concatenate %375, %384, %385, %386 in 1 : vector<1x32xf32>, vector<1x1xf32>, vector<1x6xf32>, vector<1x89xf32> -> vector<1x128xf32>
    %c0_148 = arith.constant 0 : index
    %c0_149 = arith.constant 0 : index
    %c0_150 = arith.constant 0 : index
    %388 = vector.load %arg4[%c0_148, %c0_149, %c0_150] : memref<1x1x128xf32, #tpu.memory_space<vmem>>, vector<1x1x128xf32>
    %389 = vector.shape_cast %388 : vector<1x1x128xf32> to vector<1x128xf32>
    %390 = vector.shape_cast %387 : vector<1x128xf32> to vector<1x1x128xf32>
    tpu.vector_store %arg4[%c0_148, %c0_149, %c0_150], %390 {strides = array<i32>} : memref<1x1x128xf32, #tpu.memory_space<vmem>>, vector<1x1x128xf32>,
    return
  }
  func.func @transform_0(%arg0: i32) -> (i32, i32, i32) {
    %c0_i32 = arith.constant 0 : i32
    %c0_i32_0 = arith.constant 0 : i32
    %c0_i32_1 = arith.constant 0 : i32
    return %arg0, %c0_i32, %c0_i32_0 : i32, i32, i32
  }
  func.func @transform_1(%arg0: i32) -> (i32, i32) {
    %c0_i32 = arith.constant 0 : i32
    %c0_i32_0 = arith.constant 0 : i32
    %c0_i32_1 = arith.constant 0 : i32
    return %c0_i32, %c0_i32_0 : i32, i32
  }
  func.func @transform_2(%arg0: i32) -> i32 {
    %c0_i32 = arith.constant 0 : i32
    %c0_i32_0 = arith.constant 0 : i32
    return %c0_i32 : i32
  }
  func.func @transform_3(%arg0: i32) -> (i32, i32, i32) {
    %c0_i32 = arith.constant 0 : i32
    %c0_i32_0 = arith.constant 0 : i32
    %c0_i32_1 = arith.constant 0 : i32
    return %arg0, %c0_i32, %c0_i32_0 : i32, i32, i32
  }
}

</mosaic_0001>

<bundles_post_ra>
// kernel: tpu_custom_call.1
= control target key start
LH: loop header
LB: loop body
LE: loop exit
PB: predicated region body
PF: predicated region fallthrough
CT: control target
= control target key end

     0   :  { %8 = vsyncpa [#allocation3], 0  ;;  %s7050_s0 = inlined_call_operand.vmem [shape: f32[2,20,16], index: 0, kind: input, shape index: {}]   ;;  %s7051_s1 = inlined_call_operand.hbm [shape: f32[488,128], index: 1, kind: input, shape index: {}]   ;;  %s7052_s2 = inlined_call_operand.vmem [shape: f32[3], index: 2, kind: input, shape index: {}]   ;;  %s7053_s3 = inlined_call_operand.hbm [shape: f32[2,1,128], index: 3, kind: output, shape index: {}]  }
   0x1   :  { %9 = vsyncpa [#allocation5], 0 }
   0x2   :  { %10 = vsyncpa [#allocation4], 0 }
   0x3   :  { %12 = vsyncpa [#allocation4 + $0x1], 0  ;;  %s6175_s12 = smov 0   ;;  %s6177_s13 = smov 0  }
   0x4   :  { %s6179_s14 = smov 0   ;;  %s6181_s15 = smov 0  }
   0x5 LB: > { %s6196_s16 = sadd.s32 4294967295, %s6132_s15   ;;  %s4646_s17 = sadd.s32 4294967294, %s6132_s15   ;;  %s6132_s15 = sphi %s6181_s15, %s7073_s15   ;;  %s6128_s14 = sphi %s6179_s14, %s7072_s14   ;;  %s6124_s13 = sphi %s6177_s13, %s7071_s13   ;;  %s6120_s12 = sphi %s6175_s12, %s7070_s12  }
   0x6   : > { %s6200_s18 = sadd.s32 1, %s6132_s15   ;;  %s93_s19 = sadd.s32 1, %s6128_s14 }
   0x7   : > { %s90_s20 = ssub.s32 %s6132_s15, %s6200_s18  ;;  %p103_p0 = scmp.ne.s32.totalorder %s6128_s14, %s6124_s13 }
   0x8   : > { %p91_p1 = scmp.eq.s32.totalorder %s90_s20, 0  ;;  %p104_p2 = scmp.eq.s32.totalorder %s6196_s16, 1 }
   0x9   : > { %p109_p3 = scmp.ne.s32.totalorder %s6124_s13, %s6120_s12  ;;  %p110_p4 = scmp.eq.s32.totalorder %s4646_s17, 1 }
   0xa   : > { %s6211_s21 = scalar_select %p91_p1, %s6128_s14, %s93_s19  }
   0xb   : > { %p6213_p5 = por %p104_p2, %p103_p0  ;;  %p6217_p6 = por %p110_p4, %p109_p3 }
   0xc   : > { %p4647_p7 = scmp.ge.s32.totalorder %s6132_s15, 1  ;;  %p117_p8 = scmp.lt.s32.totalorder %s6132_s15, 3 }
   0xd   : > { %s7057_s22 = scalar_select %p6213_p5, 1, 0 }
   0xe   : > { %s7058_s23 = scalar_select %p6217_p6, 1, 0 }
   0xf   : > { %p7054_p9 = scmp.eq.s32.totalorder %s6196_s16, 0  ;;  %p6224_p10 = pnand %p4647_p7, %p117_p8 }
  0x10   : > { %s6134_s25 = smov [#allocation2]   ;;  %s143_s29 = sshll.u32 %s7052_s2, 4  ;;  %s6239_s29 = int_to_ptr.vmem [resolvable:$true] %s143_s29 }
  0x11   : > { %s7059_s24 = scalar_select %p6224_p10, 1, 0 }
  0x12   : > { %s129_s26 = sshll.u32 %s6134_s25, 4  ;;  %p5731_p11 = pneg %p6224_p10  ;;  %s130_s26 = int_to_ptr.vmem [resolvable:$true] %s129_s26 }
  0x13   : > { %s6019_s6 = scalar_lea.hbm %s7051_s1, 7808 }
  0x14   : > { %p6235_p12 = pnand %p7054_p9, %p5731_p11  ;;  %p6020_p13 = scmp.ne.s32.totalorder %s7051_s1, %s6019_s6 }
  0x15   : > { %p6026_p3 = scmp.lt.u32.totalorder %s6019_s6, %s7051_s1 }
  0x16   : > { %p6021_p0 = pneg %p6235_p12 }
  0x18   : > { %p6022_p1 = pnand %p6021_p0, %p6020_p13 }
  0x1a   : > { %p6023_p2 = pneg %p6022_p1 }
  0x1c   : > { %p6028_p4 = pnand %p6026_p3, %p6023_p2 }
  0x1e   : > { %6031 = shalt.err (!%p6028_p4)
}
  0x1f   : > { %s6032_s11 = scalar_lea.vmem %s130_s26, 7808  ;;  %p6040_p9 = scmp.lt.s32.totalorder %s130_s26, %s130_s26 }
  0x20   : > { %p6033_p7 = scmp.ne.s32.totalorder %s130_s26, %s6032_s11  ;;  %p6041_p6 = scmp.lt.s32.totalorder %s6032_s11, %s6032_s11 }
  0x22   : > { %p6035_p8 = pnand %p6033_p7, %p6021_p0  ;;  %p6042_p5 = por %p6041_p6, %p6040_p9 }
  0x24   : > { %p6036_p11 = pneg %p6035_p8 }
  0x26   : > { %p6043_p10 = pnand %p6042_p5, %p6036_p11 }
  0x28   : > { %6046 = shalt.err (!%p6043_p10)
}
  0x29   : > { %s6135_s17 = smov 128   ;;  %s6136_s19 = smov 8  }
  0x2a   : > { %5734 = dma.hbm_to_vmem [thread:$0]  (!%p6235_p12), %s7051_s1, 7808, %s130_s26, [#allocation3], %s6135_s17, %s6135_s17, %s6136_s19  }
  0x2b   : > { %s6047_s27 = scalar_lea.vmem %s6239_s29, 16  ;;  %p6055_p5 = scmp.lt.s32.totalorder %s6239_s29, %s6239_s29 }
  0x2c   : > { %p6048_p13 = scmp.ne.s32.totalorder %s6239_s29, %s6047_s27  ;;  %p6056_p9 = scmp.lt.s32.totalorder %s6047_s27, %s6047_s27 }
  0x2e   : > { %p6050_p1 = pnand %p6048_p13, %p6021_p0  ;;  %p6057_p10 = por %p6056_p9, %p6055_p5 }
  0x30   : > { %p6051_p6 = pneg %p6050_p1 }
  0x32   : > { %p6058_p2 = pnand %p6057_p10, %p6051_p6 }
  0x34   : > { %6061 = shalt.err (!%p6058_p2)
}
  0x35   : > { %s6137_s28 = smov [#allocation6]   ;;  %p7061_p3 = scmp.ne.s32.totalorder %s7059_s24, 0 }
  0x36   : > { %5737 = dma.vmem_to_smem (!%p6235_p12), %s6239_s29, 16, %s6137_s28, [#allocation5]  }
  0x37   : > { %164 = sbr.rel (%p7061_p3) target bundleno = 8987 (0x231b), region = 32  ;;  %p7062_p4 = scmp.eq.s32.totalorder (!%p7061_p3), %s6196_s16, 0 }
  0x3e   : > { %6107 = dma.done.wait (%p7062_p4), [#allocation3], 7808   ;;  %p7063_p0 = pmov %p7062_p4 }
  0x40   : > { %6109 = vsyncadd (%p7063_p0), [#allocation3], 4294959488  ;;  %p7064_p7 = pmov %p7063_p0 }
  0x41   : > { %p7065_p8 = pmov %p7063_p0 }
  0x42   : > { %6111 = dma.done.wait (%p7064_p7), [#allocation5], 16  }
  0x43   : > { %6113 = vsyncadd (%p7065_p8), [#allocation5], 4294967280 }
  0x44   : > { %174 = sfence }
  0x45   : > { %v205_v0 = vld [vmem:[#allocation2 + $0x10] sm:$0xff]  ;;  %v206_v1 = vld [vmem:[#allocation2 + $0x18] sm:$0xff]  ;;  %p192_p12 = scmp.lt.s32.totalorder %s6196_s16, 1  ;;  %v6138_v2 = vmov 0.0|0.0   ;;  %vm6139_vm0 = vmmov 0   ;;  %v6140_v4 = vmov 0.0  }
  0x46   : > { %5571 = vmatprep.subr.bf16.mxu0 %v6138_v2  ;;  %v5572_v3 = vpack.c.bf16 %v206_v1, %v205_v0  ;;  %5039 = vmatprep.mubr.msk.f32.mxu0 %vm6139_vm0, %v6140_v4  ;;  %v203_v5 = vld [vmem:[#allocation2] sm:$0xff]  ;;  %v204_v6 = vld [vmem:[#allocation2 + $0x8] sm:$0xff]  ;;  %vm210_vm1 = vcmask 1046528   ;;  %vm216_vm2 = vcmask 130048   ;;  %vm391_vm3 = vcmask 1045504   ;;  %v486_v21 = vld [vmem:[#allocation2 + $0x30] sm:$0xff] }
  0x47   : > { %s193_s24 = scalar_select %p192_p12, %s6196_s16, 1  ;;  %5583 = vmatprep.subr.bf16.mxu1 %v6138_v2  ;;  %5119 = vmatprep.mubr.msk.f32.mxu1 %vm6139_vm0, %v6140_v4  ;;  %v5575_v13 = vpack.c.bf16 %v204_v6, %v203_v5  ;;  %v389_v16 = vld [vmem:[#allocation2 + $0x20] sm:$0xff]  ;;  %v390_v17 = vld [vmem:[#allocation2 + $0x28] sm:$0xff]  ;;  %v487_v22 = vld [vmem:[#allocation2 + $0x38] sm:$0xff]  ;;  %vm488_vm4 = vcmask 1044480   ;;  %vm830_vm11 = vcmask 31744  }
  0x48   : > { %5573 = vmatpush3.bf16.msra.mxu0 %v5572_v3  ;;  %v5578_v18 = vpack.c.bf16 %v390_v17, %v389_v16  ;;  %v5581_v25 = vpack.c.bf16 %v487_v22, %v486_v21  ;;  %v616_v32 = vld [vmem:[#allocation2 + $0x40] sm:$0xff]  ;;  %v617_v33 = vld [vmem:[#allocation2 + $0x48] sm:$0xff]  ;;  %v618_v34 = vld [vmem:[#allocation2 + $0x50] sm:$0xff]  ;;  %s6141_s5 = smov 64   ;;  %s6142_s6 = smov 112   ;;  %vm926_vm13 = vcmask 138240  }
  0x49   : > { %s5720_s26 = smul.u32 24, %s193_s24  ;;  %5574 = vmatprep.subr.bf16.mxu0 %v6138_v2  ;;  %v5584_v35 = vpack.c.bf16 %v617_v33, %v616_v32  ;;  %v619_v36 = vld [vmem:[#allocation2 + $0x58] sm:$0xff]  ;;  %v620_v38 = vld [vmem:[#allocation2 + $0x60] sm:$0xff]  ;;  %v621_v39 = vld [vmem:[#allocation2 + $0x68] sm:$0xff]  ;;  %s6143_s7 = smov 108   ;;  %vm933_vm14 = vcmask 131072  }
  0x4a   : > { %v5587_v37 = vpack.c.bf16 %v619_v36, %v618_v34  ;;  %v5590_v40 = vpack.c.bf16 %v621_v39, %v620_v38  ;;  %v622_v41 = vld [vmem:[#allocation2 + $0x70] sm:$0xff]  ;;  %v623_v42 = vld [vmem:[#allocation2 + $0x78] sm:$0xff]  ;;  %v624_v44 = vld [vmem:[#allocation2 + $0x80] sm:$0xff]  ;;  %s6144_s8 = smov 124   ;;  %s6145_s9 = smov 96   ;;  %vm978_vm15 = vcmask 1040384  }
  0x4b   : > { %s196_s4 = scalar_lea.vmem %s7050_s0, %s5720_s26  ;;  %5585 = vmatpush3.bf16.msra.mxu1 %v5584_v35  ;;  %v5593_v43 = vpack.c.bf16 %v623_v42, %v622_v41  ;;  %v625_v45 = vld [vmem:[#allocation2 + $0x88] sm:$0xff]  ;;  %v626_v47 = vld [vmem:[#allocation2 + $0x90] sm:$0xff]  ;;  %v627_v48 = vld [vmem:[#allocation2 + $0x98] sm:$0xff]  ;;  %s6146_s10 = smov 92  }
  0x4c   : > { %v200_v7 = vld [vmem:[%s196_s4] sm:$0xff]  ;;  %v201_v8 = vld [vmem:[%s196_s4 + $0x8] sm:$0xff]  ;;  %v202_v9 = vld [vmem:[%s196_s4 + $0x10] sm:$0xf]  ;;  %5586 = vmatprep.subr.bf16.mxu1 %v6138_v2  ;;  %v5596_v46 = vpack.c.bf16 %v625_v45, %v624_v44  ;;  %v5599_v49 = vpack.c.bf16 %v627_v48, %v626_v47  ;;  %s6147_s11 = smov 104   ;;  %s6148_s17 = smov 120  }
  0x4d   : > { %v211_v10 = vrot.slane %v200_v7, 1  ;;  %v212_v11 = vrot.slane %v201_v8, 1  ;;  %v214_v12 = vrot.slane %v202_v9, 1  ;;  %v392_v19 = vrot.slane %v200_v7, 2  ;;  %v628_v50 = vld [vmem:[#allocation2 + $0xa0] sm:$0xff]  ;;  %v629_v51 = vld [vmem:[#allocation2 + $0xa8] sm:$0xff]  ;;  %vm6393_vm12 = vmpackc.low %vm830_vm11, %vm830_vm11 }
  0x4e   : > { %v393_v20 = vrot.slane %v201_v8, 2  ;;  %v395_v24 = vrot.slane %v202_v9, 2  ;;  %v489_v27 = vrot.slane %v200_v7, 3  ;;  %v490_v28 = vrot.slane %v201_v8, 3  ;;  %v630_v53 = vld [vmem:[#allocation2 + $0xb0] sm:$0xff]  ;;  %v631_v54 = vld [vmem:[#allocation2 + $0xb8] sm:$0xff] }
  0x4f   : > { %v213_v14 = vsel %vm210_vm1, %v211_v10, %v212_v11  ;;  %v215_v15 = vsel %vm210_vm1, %v212_v11, %v214_v12  ;;  %v492_v30 = vrot.slane %v202_v9, 3  ;;  %5588 = vmatpush3.bf16.msra.mxu1 %v5587_v37  ;;  %v5602_v52 = vpack.c.bf16 %v629_v51, %v628_v50  ;;  %v713_v10 = vld [vmem:[#allocation2 + $0xc8] sm:$0xff]  ;;  %v4669_v35 = vld [vmem:[#allocation2 + $0x120] ss:$0 sm:$0xff]  ;;  %s6149_s19 = smov 88   ;;  %s6150_s20 = smov 100  }
  0x50   : > { %5040 = vmatmul.mubr.msk.f32.vlgmr.msra.gmra.mrb[0].mxu0 %vm216_vm2, %v213_v14  ;;  %v394_v23 = vsel %vm391_vm3, %v392_v19, %v393_v20  ;;  %v396_v26 = vsel %vm391_vm3, %v393_v20, %v395_v24  ;;  %v491_v29 = vsel %vm488_vm4, %v489_v27, %v490_v28  ;;  %5589 = vmatprep.subr.bf16.mxu1 %v6138_v2  ;;  %vm1311_vm1 = vcmask 1043456   ;;  %s6151_s25 = smov 116   ;;  %s6152_s27 = smov 84  }
  0x51   : > { %5042 = vmatprep.mubr.msk.f32.mxu0 %vm6139_vm0, %v6140_v4  ;;  %5576 = vmatpush3.bf16.msra.mxu0 %v5575_v13  ;;  %v493_v31 = vsel %vm488_vm4, %v490_v28, %v492_v30  ;;  %v5605_v56 = vpack.c.bf16 %v631_v54, %v630_v53  ;;  %vm2173_vm3 = vcmask 122880   ;;  %vm2346_vm4 = vcmask 261120   ;;  %s197_s28 = sld [smem:[#allocation6]]  ;;  %s6153_s24 = smov 33  }
  0x52   : > { %5577 = vmatprep.subr.bf16.mxu0 %v6138_v2  ;;  %s4655_s26 = sld [smem:[#allocation6 + $0x1]]  ;;  %s4656_s29 = sld [smem:[#allocation6 + $0x2]] }
  0x53   : > { %5591 = vmatpush3.bf16.msra.mxu1 %v5590_v40  ;;  %s190_s30 = sand.u32 1, %s6124_s13   ;;  %s4818_s4 = sshll.u32 %s6196_s16, 4 }
  0x54   : > { %5043 = vmatmul.mubr.msk.f32.gmra.mrb[2].mxu0 %vm216_vm2, %v215_v15  ;;  %5592 = vmatprep.subr.bf16.mxu1 %v6138_v2  ;;  %s4555_s16 = scalar_lea.sflag [#allocation4], %s190_s30  ;;  %p7068_p13 = scmp.ne.s32.totalorder %s7057_s22, 0 }
  0x55   : > { %5045 = vmatprep.mubr.msk.f32.mxu0 %vm6139_vm0, %v6140_v4 }
  0x57   : > { %5594 = vmatpush3.bf16.msra.mxu1 %v5593_v43 }
  0x58   : > { %5046 = vmatmul.mubr.msk.f32.gmra.mrb[4].mxu0 %vm216_vm2, %v214_v12  ;;  %5595 = vmatprep.subr.bf16.mxu1 %v6138_v2 }
  0x59   : > { %5052 = vmatprep.mubr.msk.f32.mxu0 %vm6139_vm0, %v6140_v4 }
  0x5b   : > { %5597 = vmatpush3.bf16.msra.mxu1 %v5596_v46 }
  0x5c   : > { %5053 = vmatmul.mubr.msk.f32.vlgmr.msra.gmra.mrb[0].mxu0 %vm216_vm2, %v200_v7  ;;  %5598 = vmatprep.subr.bf16.mxu1 %v6138_v2 }
  0x5d   : > { %5055 = vmatprep.mubr.msk.f32.mxu0 %vm6139_vm0, %v6140_v4  ;;  %5579 = vmatpush3.bf16.msra.mxu0 %v5578_v18 }
  0x5e   : > { %5580 = vmatprep.subr.bf16.mxu0 %v6138_v2 }
  0x5f   : > { %5600 = vmatpush3.bf16.msra.mxu1 %v5599_v49 }
  0x60   : > { %5056 = vmatmul.mubr.msk.f32.gmra.mrb[2].mxu0 %vm216_vm2, %v201_v8  ;;  %5601 = vmatprep.subr.bf16.mxu1 %v6138_v2 }
  0x61   : > { %5058 = vmatprep.mubr.msk.f32.mxu0 %vm6139_vm0, %v6140_v4 }
  0x63   : > { %5603 = vmatpush3.bf16.msra.mxu1 %v5602_v52 }
  0x64   : > { %5059 = vmatmul.mubr.msk.f32.gmra.mrb[4].mxu0 %vm216_vm2, %v202_v9  ;;  %5604 = vmatprep.subr.bf16.mxu1 %v6138_v2  ;;  %v712_v9 = vld [vmem:[#allocation2 + $0xc0] sm:$0xff] }
  0x65   : > { %5065 = vmatprep.mubr.msk.f32.mxu0 %vm6139_vm0, %v6140_v4  ;;  %v5608_v14 = vpack.c.bf16 %v713_v10, %v712_v9 }
  0x67   : > { %5606 = vmatpush3.bf16.msra.mxu1 %v5605_v56 }
  0x68   : > { %5066 = vmatmul.mubr.msk.f32.vlgmr.msra.gmra.mrb[0].mxu0 %vm216_vm2, %v394_v23  ;;  %5607 = vmatprep.subr.bf16.mxu1 %v6138_v2 }
  0x69   : > { %5068 = vmatprep.mubr.msk.f32.mxu0 %vm6139_vm0, %v6140_v4  ;;  %5582 = vmatpush3.bf16.msra.mxu0 %v5581_v25 }
  0x6a   : > { %5610 = vmatprep.subr.bf16.mxu0 %v6138_v2 }
  0x6c   : > { %5069 = vmatmul.mubr.msk.f32.gmra.mrb[2].mxu0 %vm216_vm2, %v396_v26 }
  0x6d   : > { %5071 = vmatprep.mubr.msk.f32.mxu0 %vm6139_vm0, %v6140_v4 }
  0x70   : > { %5072 = vmatmul.mubr.msk.f32.gmra.mrb[4].mxu0 %vm216_vm2, %v395_v24 }
  0x71   : > { %5078 = vmatprep.mubr.msk.f32.mxu0 %vm6139_vm0, %v6140_v4 }
  0x74   : > { %5079 = vmatmul.mubr.msk.f32.vlgmr.msra.gmra.mrb[0].mxu0 %vm216_vm2, %v491_v29 }
  0x75   : > { %5081 = vmatprep.mubr.msk.f32.mxu0 %vm6139_vm0, %v6140_v4 }
  0x78   : > { %5082 = vmatmul.mubr.msk.f32.gmra.mrb[2].mxu0 %vm216_vm2, %v493_v31 }
  0x79   : > { %5084 = vmatprep.mubr.msk.f32.mxu0 %vm6139_vm0, %v6140_v4 }
  0x7c   : > { %5085 = vmatmul.mubr.msk.f32.gmra.mrb[4].mxu0 %vm216_vm2, %v492_v30 }
  0x7d   : > { %5147 = vmatprep.mubr.msk.f32.mxu0 %vm6139_vm0, %v6140_v4 }
 0x147   : > { %v566_v55 = vpop.f32.mrb[0].mxu0 }
 0x148   : > { %v583_v57 = vmul.f32 %v566_v55, %v566_v55  ;;  %v5080_v58 = vpop.f32.mrb[1].mxu0 }
 0x14a   : > { %586 = vrot.lane.b32.xlu0 %v583_v57, %s6141_s5 }
 0x14b   : > { %v571_v59 = vpop.f32.mrb[2].mxu0 }
 0x14c   : > { %v584_v60 = vmul.f32 %v571_v59, %v571_v59  ;;  %v5083_v61 = vpop.f32.mrb[3].mxu0 }
 0x14e   : > { %588 = vrot.lane.b32.xlu0 %v584_v60, %s6141_s5 }
 0x14f   : > { %v576_v62 = vpop.f32.mrb[4].mxu0 }
 0x150   : > { %v585_v63 = vmul.f32 %v576_v62, %v576_v62  ;;  %v5086_v0 = vpop.f32.mrb[5].mxu0 }
 0x152   : > { %590 = vrot.lane.b32.xlu1 %v585_v63, %s6141_s5  ;;  %s191_s5 = scalar_lea.vmem [#allocation7], %s190_s30 }
 0x1bc   : > { %v587_v1 = vpop.permute.xlu0 %586 }
 0x1bd   : > { %v592_v3 = vadd.f32 %v587_v1, %v583_v57 }
 0x1bf   : > { %5879 = vrsqrt.f32 %v592_v3  ;;  %vm597_vm5 = vcmp.eq.f32.partialorder %v592_v3, inf  ;;  %v600_v13 = vand.u32 2147483648, %v592_v3  ;;  %vm599_vm6 = vcmp.eq.f32.partialorder %v592_v3, 0.0 }
 0x1c0   : > { %v589_v5 = vpop.permute.xlu0 %588 }
 0x1c1   : > { %v593_v6 = vadd.f32 %v589_v5, %v584_v60 }
 0x1c3   : > { %5881 = vrsqrt.f32 %v593_v6  ;;  %vm604_vm7 = vcmp.eq.f32.partialorder %v593_v6, inf  ;;  %v607_v19 = vand.u32 2147483648, %v593_v6  ;;  %vm606_vm8 = vcmp.eq.f32.partialorder %v593_v6, 0.0 }
 0x1c4   : > { %v591_v7 = vpop.permute.xlu1 %590 }
 0x1c5   : > { %v594_v8 = vadd.f32 %v591_v7, %v585_v63 }
 0x1c7   : > { %5883 = vrsqrt.f32 %v594_v8  ;;  %vm611_vm9 = vcmp.eq.f32.partialorder %v594_v8, inf  ;;  %v614_v24 = vand.u32 2147483648, %v594_v8  ;;  %vm613_vm10 = vcmp.eq.f32.partialorder %v594_v8, 0.0 }
 0x1c9   : > { %v5880_v11 = vpop.eup %5879 }
 0x1ca   : > { %v596_v12 = vmul.f32 %v5880_v11, %v592_v3 }
 0x1cc   : > { %v598_v15 = vsel %vm597_vm5, %v592_v3, %v596_v12  ;;  %vm4549_vm5 = vcmask 269312  }
 0x1cd   : > { %v5882_v16 = vpop.eup %5881  ;;  %v601_v17 = vsel %vm599_vm6, %v600_v13, %v598_v15  ;;  %vm4551_vm6 = vcmask 318464  }
 0x1ce   : > { %5120 = vmatmul.mubr.f32.vlgmr.msra.gmra.mrb[0].mxu1 %v601_v17  ;;  %v603_v18 = vmul.f32 %v5882_v16, %v593_v6 }
 0x1cf   : > { %5122 = vmatprep.mubr.msk.f32.mxu1 %vm6139_vm0, %v6140_v4  ;;  %5609 = vmatpush3.bf16.msra.mxu1 %v5608_v14 }
 0x1d0   : > { %v605_v20 = vsel %vm604_vm7, %v593_v6, %v603_v18  ;;  %5614 = vmatprep.subr.bf16.mxu1 %v6138_v2 }
 0x1d1   : > { %v5884_v21 = vpop.eup %5883  ;;  %v608_v22 = vsel %vm606_vm8, %v607_v19, %v605_v20 }
 0x1d2   : > { %5123 = vmatmul.mubr.f32.gmra.mrb[2].mxu1 %v608_v22  ;;  %v610_v23 = vmul.f32 %v5884_v21, %v594_v8 }
 0x1d3   : > { %5125 = vmatprep.mubr.msk.f32.mxu1 %vm6139_vm0, %v6140_v4 }
 0x1d4   : > { %v612_v25 = vsel %vm611_vm9, %v594_v8, %v610_v23 }
 0x1d5   : > { %v615_v26 = vsel %vm613_vm10, %v614_v24, %v612_v25 }
 0x1d6   : > { %5126 = vmatmul.mubr.f32.gmra.mrb[4].mxu1 %v615_v26 }
 0x1d7   : > { %5132 = vmatprep.mubr.msk.f32.mxu1 %vm6139_vm0, %v6140_v4 }
 0x2a1   : > { %v6349_v27 = vpop.f32.mrb[0].mxu1 }
 0x2a2   : > { %v5121_v28 = vpop.f32.mrb[1].mxu1  ;;  %5133 = vmatmul.mubr.msk.f32.vlgmr.msra.gmra.mrb[6].mxu1 %vm216_vm2, %v6349_v27 }
 0x2a3   : > { %5135 = vmatprep.mubr.msk.f32.mxu1 %vm6139_vm0, %v6140_v4 }
 0x2a5   : > { %v6355_v29 = vpop.f32.mrb[2].mxu1 }
 0x2a6   : > { %v5124_v30 = vpop.f32.mrb[3].mxu1  ;;  %5136 = vmatmul.mubr.msk.f32.gmra.mrb[8].mxu1 %vm216_vm2, %v6355_v29 }
 0x2a7   : > { %5138 = vmatprep.mubr.msk.f32.mxu1 %vm6139_vm0, %v6140_v4 }
 0x2a9   : > { %v6361_v31 = vpop.f32.mrb[4].mxu1 }
 0x2aa   : > { %v5127_v32 = vpop.f32.mrb[5].mxu1  ;;  %5139 = vmatmul.mubr.msk.f32.gmra.mrb[10].mxu1 %vm216_vm2, %v6361_v31 }
 0x2ab   : > { %5162 = vmatprep.mubr.msk.f32.mxu1 %vm6139_vm0, %v6140_v4 }
 0x375   : > { %v807_v33 = vpop.f32.mrb[6].mxu1 }
 0x376   : > { %v5134_v34 = vpop.f32.mrb[7].mxu1  ;;  %v6367_v37 = vadd.f32 %v4669_v35, %v807_v33 }
 0x379   : > { %v812_v36 = vpop.f32.mrb[8].mxu1 }
 0x37a   : > { %v6369_v38 = vadd.f32 %v4669_v35, %v812_v36  ;;  %v5137_v39 = vpop.f32.mrb[9].mxu1 }
 0x37c   : > { %v6373_v40 = vpack.i.bf16 %v6369_v38, %v6367_v37 }
 0x37d   : > { %v817_v41 = vpop.f32.mrb[10].mxu1 }
 0x37e   : > { %v6375_v42 = vadd.f32 %v4669_v35, %v817_v41  ;;  %5800 = vrot.lane.b32.xlu1 %v6373_v40, %s6142_s6  ;;  %v5140_v43 = vpop.f32.mrb[11].mxu1 }
 0x380   : > { %828 = vrot.lane.b32.xlu0 %v6375_v42, %s6142_s6 }
 0x382   : > { %5805 = vrot.lane.b32.xlu1 %v6373_v40, %s6143_s7 }
 0x384   : > { %1072 = vrot.lane.b32.xlu0 %v6375_v42, %s6143_s7 }
 0x386   : > { %1062 = vrot.lane.b32.xlu1 %v6367_v37, %s6144_s8 }
 0x388   : > { %1064 = vrot.lane.b32.xlu0 %v6369_v38, %s6144_s8 }
 0x38a   : > { %1066 = vrot.lane.b32.xlu1 %v6375_v42, %s6144_s8 }
 0x3f0   : > { %v5801_v44 = vpop.permute.xlu1 %5800 }
 0x3f1   : > { %v5803_v45 = vunpack.i.h.bf16 %v5801_v44  ;;  %v5802_v46 = vunpack.i.l.bf16 %v5801_v44 }
 0x3f2   : > { %v829_v52 = vpop.permute.xlu0 %828 }
 0x3f3   : > { %v5611_v48 = vpack.c.bf16 %v5803_v45, %v5802_v46 }
 0x3f4   : > { %v5806_v49 = vpop.permute.xlu1 %5805 }
 0x3f5   : > { %5613 = vmatpush3.bf16.xpose.msk.msra.mxu0 %vm6393_vm12, %v5611_v48  ;;  %v5808_v50 = vunpack.i.h.bf16 %v5806_v49  ;;  %v5807_v51 = vunpack.i.l.bf16 %v5806_v49 }
 0x3f6   : > { %5145 = vmatprep.subr.mxu0 %v6140_v4  ;;  %v1073_v54 = vpop.permute.xlu0 %1072 }
 0x3f7   : > { %v5618_v53 = vpack.c.bf16 %v5808_v50, %v5807_v51 }
 0x3f8   : > { %v1063_v55 = vpop.permute.xlu1 %1062 }
 0x3fa   : > { %v1065_v56 = vpop.permute.xlu0 %1064 }
 0x3fc   : > { %v1067_v57 = vpop.permute.xlu1 %1066 }
 0x3fd   : > { %5146 = vmatpush3.xpose.msk.msra.mxu0 %vm830_vm11, %v829_v52 }
 0x3fe   : > { %5617 = vmatprep.subr.bf16.mxu0 %v6138_v2 }
 0x400   : > { %5148 = vmatmul.mubr.msk.f32.vlgmr.msra.gmra.mrb[6].mxu0 %vm830_vm11, %v6367_v37 }
 0x401   : > { %5620 = vmatpush3.bf16.xpose.msk.msra.mxu0 %vm6393_vm12, %v5618_v53  ;;  %5150 = vmatprep.mubr.msk.f32.mxu0 %vm6139_vm0, %v6140_v4 }
 0x402   : > { %5175 = vmatprep.subr.mxu0 %v6140_v4 }
 0x404   : > { %5151 = vmatmul.mubr.msk.f32.gmra.mrb[8].mxu0 %vm830_vm11, %v6369_v38 }
 0x405   : > { %5153 = vmatprep.mubr.msk.f32.mxu0 %vm6139_vm0, %v6140_v4 }
 0x408   : > { %5154 = vmatmul.mubr.msk.f32.gmra.mrb[10].mxu0 %vm830_vm11, %v6375_v42 }
 0x409   : > { %5176 = vmatpush3.xpose.msk.msra.mxu0 %vm830_vm11, %v1073_v54  ;;  %5177 = vmatprep.mubr.msk.f32.mxu0 %vm6139_vm0, %v6140_v4 }
 0x40a   : > { %5201 = vmatprep.subr.mxu0 %v6140_v4 }
 0x40c   : > { %5178 = vmatmul.mubr.msk.f32.vlgmr.msra.gmra.mrb[12].mxu0 %vm830_vm11, %v1063_v55 }
 0x40d   : > { %5180 = vmatprep.mubr.msk.f32.mxu0 %vm6139_vm0, %v6140_v4 }
 0x410   : > { %5181 = vmatmul.mubr.msk.f32.gmra.mrb[14].mxu0 %vm830_vm11, %v1065_v56 }
 0x411   : > { %5183 = vmatprep.mubr.msk.f32.mxu0 %vm6139_vm0, %v6140_v4 }
 0x414   : > { %5184 = vmatmul.mubr.msk.f32.gmra.mrb[16].mxu0 %vm830_vm11, %v1067_v57 }
 0x415   : > { %5203 = vmatprep.mubr.msk.f32.mxu0 %vm6139_vm0, %v6140_v4 }
 0x4d3   : > { %v909_v58 = vpop.f32.mrb[6].mxu0 }
 0x4d4   : > { %v923_v59 = vmul.f32 0.5, %v909_v58  ;;  %v5149_v60 = vpop.f32.mrb[7].mxu0 }
 0x4d6   : > { %v927_v61 = vsel %vm926_vm13, %v923_v59, -inf }
 0x4d7   : > { %928 = vmax.xlane.f32.xlu0 %v927_v61  ;;  %v914_v62 = vpop.f32.mrb[8].mxu0 }
 0x4d8   : > { %v924_v63 = vmul.f32 0.5, %v914_v62  ;;  %v5152_v0 = vpop.f32.mrb[9].mxu0 }
 0x4da   : > { %v930_v1 = vsel %vm926_vm13, %v924_v63, -inf }
 0x4db   : > { %931 = vmax.xlane.f32.xlu1 %v930_v1  ;;  %v919_v3 = vpop.f32.mrb[10].mxu0 }
 0x4dc   : > { %v925_v5 = vmul.f32 0.5, %v919_v3  ;;  %v5155_v6 = vpop.f32.mrb[11].mxu0 }
 0x4de   : > { %v934_v7 = vsel %vm933_vm14, %v925_v5, -inf }
 0x4df   : > { %935 = vmax.xlane.f32.xlu0 %v934_v7  ;;  %v1152_v8 = vpop.f32.mrb[12].mxu0 }
 0x4e0   : > { %v1166_v9 = vmul.f32 0.5, %v1152_v8  ;;  %v5179_v10 = vpop.f32.mrb[13].mxu0 }
 0x4e2   : > { %v1169_v11 = vsel %vm926_vm13, %v1166_v9, -inf }
 0x4e3   : > { %1170 = vmax.xlane.f32.xlu0 %v1169_v11  ;;  %v1157_v12 = vpop.f32.mrb[14].mxu0 }
 0x4e4   : > { %v1167_v13 = vmul.f32 0.5, %v1157_v12  ;;  %v5182_v14 = vpop.f32.mrb[15].mxu0 }
 0x4e6   : > { %v1172_v15 = vsel %vm926_vm13, %v1167_v13, -inf }
 0x4e7   : > { %1173 = vmax.xlane.f32.xlu1 %v1172_v15  ;;  %v1162_v16 = vpop.f32.mrb[16].mxu0 }
 0x4e8   : > { %v1168_v17 = vmul.f32 0.5, %v1162_v16  ;;  %v5185_v18 = vpop.f32.mrb[17].mxu0 }
 0x4ea   : > { %v1175_v19 = vsel %vm933_vm14, %v1168_v17, -inf }
 0x4eb   : > { %1176 = vmax.xlane.f32.xlu0 %v1175_v19 }
 0x4f8   : > { %965 = vrot.lane.b32.xlu1 %v6375_v42, %s6145_s9 }
 0x501   : > { %5810 = vrot.lane.b32.xlu0 %v6373_v40, %s6145_s9 }
 0x564   : > { %v929_v20 = vpop.xlane.xlu0 %928 }
 0x565   : > { %v937_v21 = vsub.f32 %v923_v59, %v929_v20 }
 0x567   : > { %v940_v22 = vmul.f32 1.442695, %v937_v21 }
 0x568   : > { %v932_v23 = vpop.xlane.xlu1 %931 }
 0x569   : > { %5885 = vpow2.f32 %v940_v22  ;;  %v938_v24 = vsub.f32 %v924_v63, %v932_v23 }
 0x56b   : > { %v942_v25 = vmul.f32 1.442695, %v938_v24  ;;  %v1061_v24 = vld [vmem:[#allocation2 + $0xd0] sm:$0xf] }
 0x56c   : > { %v936_v26 = vpop.xlane.xlu0 %935 }
 0x56d   : > { %5887 = vpow2.f32 %v942_v25  ;;  %v939_v28 = vsub.f32 %v925_v5, %v936_v26  ;;  %v1301_v25 = vld [vmem:[#allocation2 + $0xd8] sm:$0xf] }
 0x56e   : > { %5202 = vmatpush3.msk.msra.mxu0 %vm1311_vm1, %v1301_v25 }
 0x56f   : > { %v944_v30 = vmul.f32 1.442695, %v939_v28  ;;  %5624 = vmatprep.subr.bf16.mxu0 %v6138_v2 }
 0x570   : > { %v1171_v32 = vpop.xlane.xlu0 %1170 }
 0x571   : > { %5889 = vpow2.f32 %v944_v30  ;;  %v1178_v33 = vsub.f32 %v1166_v9, %v1171_v32 }
 0x573   : > { %v5886_v34 = vpop.eup %5885  ;;  %v1181_v35 = vmul.f32 1.442695, %v1178_v33 }
 0x574   : > { %v1174_v36 = vpop.xlane.xlu1 %1173  ;;  %v946_v39 = vsel %vm926_vm13, %v5886_v34, 0.0 }
 0x575   : > { %5891 = vpow2.f32 %v1181_v35  ;;  %v1179_v41 = vsub.f32 %v1167_v13, %v1174_v36  ;;  %947 = vadd.xlane.f32.xlu1 %v946_v39 }
 0x577   : > { %v5888_v43 = vpop.eup %5887  ;;  %v1183_v44 = vmul.f32 1.442695, %v1179_v41 }
 0x578   : > { %v1177_v45 = vpop.xlane.xlu0 %1176  ;;  %v949_v46 = vsel %vm926_vm13, %v5888_v43, 0.0  ;;  %v966_v59 = vpop.permute.xlu1 %965 }
 0x579   : > { %5893 = vpow2.f32 %v1183_v44  ;;  %v1180_v48 = vsub.f32 %v1168_v17, %v1177_v45  ;;  %950 = vadd.xlane.f32.xlu0 %v949_v46 }
 0x57b   : > { %v5890_v49 = vpop.eup %5889  ;;  %v1185_v50 = vmul.f32 1.442695, %v1180_v48 }
 0x57c   : > { %v5811_v51 = vpop.permute.xlu0 %5810  ;;  %v952_v52 = vsel %vm933_vm14, %v5890_v49, 0.0 }
 0x57d   : > { %5895 = vpow2.f32 %v1185_v50  ;;  %v5813_v53 = vunpack.i.h.bf16 %v5811_v51  ;;  %v5812_v54 = vunpack.i.l.bf16 %v5811_v51  ;;  %953 = vadd.xlane.f32.xlu1 %v952_v52 }
 0x57f   : > { %v5892_v55 = vpop.eup %5891  ;;  %v5615_v56 = vpack.c.bf16 %v5813_v53, %v5812_v54 }
 0x580   : > { %v1187_v57 = vsel %vm926_vm13, %v5892_v55, 0.0 }
 0x581   : > { %1188 = vadd.xlane.f32.xlu0 %v1187_v57  ;;  %5616 = vmatpush3.bf16.msra.mxu1 %v5615_v56 }
 0x582   : > { %5160 = vmatprep.subr.mxu1 %v6140_v4 }
 0x583   : > { %v5894_v58 = vpop.eup %5893 }
 0x584   : > { %v1190_v60 = vsel %vm926_vm13, %v5894_v58, 0.0 }
 0x585   : > { %1191 = vadd.xlane.f32.xlu1 %v1190_v60  ;;  %5161 = vmatpush3.msk.msra.mxu1 %vm978_vm15, %v966_v59 }
 0x586   : > { %5621 = vmatprep.subr.bf16.mxu1 %v6138_v2 }
 0x587   : > { %v5896_v61 = vpop.eup %5895 }
 0x588   : > { %v1193_v62 = vsel %vm933_vm14, %v5896_v61, 0.0 }
 0x589   : > { %1194 = vadd.xlane.f32.xlu1 %v1193_v62 }
 0x597   : > { %5815 = vrot.lane.b32.xlu0 %v6373_v40, %s6146_s10 }
 0x59a   : > { %1206 = vrot.lane.b32.xlu1 %v6375_v42, %s6146_s10 }
 0x59b   : > { %5820 = vrot.lane.b32.xlu0 %v6373_v40, %s6147_s11 }
 0x59e   : > { %1497 = vrot.lane.b32.xlu1 %v6375_v42, %s6147_s11 }
 0x59f   : > { %1487 = vrot.lane.b32.xlu0 %v6367_v37, %s6148_s17 }
 0x5a2   : > { %1489 = vrot.lane.b32.xlu1 %v6369_v38, %s6148_s17 }
 0x5a3   : > { %1491 = vrot.lane.b32.xlu0 %v6375_v42, %s6148_s17 }
 0x602   : > { %v948_v63 = vpop.xlane.xlu1 %947 }
 0x603   : > { %5897 = vrcp.f32 %v948_v63 }
 0x606   : > { %v951_v0 = vpop.xlane.xlu0 %950 }
 0x607   : > { %5899 = vrcp.f32 %v951_v0 }
 0x60a   : > { %v954_v1 = vpop.xlane.xlu1 %953 }
 0x60b   : > { %5901 = vrcp.f32 %v954_v1 }
 0x60d   : > { %v5898_v3 = vpop.eup %5897 }
 0x60e   : > { %v956_v5 = vmul.f32 %v5898_v3, %v5886_v34  ;;  %v1189_v6 = vpop.xlane.xlu0 %1188 }
 0x60f   : > { %5903 = vrcp.f32 %v1189_v6 }
 0x610   : > { %5163 = vmatmul.mubr.msk.f32.vlgmr.msra.gmra.mrb[12].mxu1 %vm926_vm13, %v956_v5 }
 0x611   : > { %v5900_v7 = vpop.eup %5899  ;;  %5165 = vmatprep.mubr.msk.f32.mxu1 %vm6139_vm0, %v6140_v4 }
 0x612   : > { %v1192_v8 = vpop.xlane.xlu1 %1191  ;;  %v5816_v9 = vpop.permute.xlu0 %5815  ;;  %v958_v10 = vmul.f32 %v5900_v7, %v5888_v43 }
 0x613   : > { %5905 = vrcp.f32 %v1192_v8  ;;  %v5818_v11 = vunpack.i.h.bf16 %v5816_v9  ;;  %v5817_v12 = vunpack.i.l.bf16 %v5816_v9 }
 0x614   : > { %5166 = vmatmul.mubr.msk.f32.gmra.mrb[14].mxu1 %vm926_vm13, %v958_v10 }
 0x615   : > { %v5902_v13 = vpop.eup %5901  ;;  %v5622_v14 = vpack.c.bf16 %v5818_v11, %v5817_v12  ;;  %5168 = vmatprep.mubr.msk.f32.mxu1 %vm6139_vm0, %v6140_v4 }
 0x616   : > { %v1195_v15 = vpop.xlane.xlu1 %1194  ;;  %v960_v16 = vmul.f32 %v5902_v13, %v5890_v49  ;;  %v5821_v32 = vpop.permute.xlu0 %5820 }
 0x617   : > { %5907 = vrcp.f32 %v1195_v15  ;;  %5623 = vmatpush3.bf16.msra.mxu1 %v5622_v14  ;;  %v5823_v34 = vunpack.i.h.bf16 %v5821_v32  ;;  %v5822_v35 = vunpack.i.l.bf16 %v5821_v32 }
 0x618   : > { %5169 = vmatmul.mubr.msk.f32.gmra.mrb[16].mxu1 %vm926_vm13, %v960_v16  ;;  %5190 = vmatprep.subr.mxu1 %v6140_v4 }
 0x619   : > { %v5904_v17 = vpop.eup %5903  ;;  %5192 = vmatprep.mubr.msk.f32.mxu1 %vm6139_vm0, %v6140_v4  ;;  %v5625_v41 = vpack.c.bf16 %v5823_v34, %v5822_v35 }
 0x61a   : > { %v1197_v18 = vmul.f32 %v5904_v17, %v5892_v55  ;;  %v1207_v19 = vpop.permute.xlu1 %1206  ;;  %v1488_v51 = vpop.permute.xlu0 %1487 }
 0x61b   : > { %5191 = vmatpush3.msk.msra.mxu1 %vm978_vm15, %v1207_v19 }
 0x61c   : > { %5193 = vmatmul.mubr.msk.f32.vlgmr.msra.gmra.mrb[18].mxu1 %vm926_vm13, %v1197_v18  ;;  %5212 = vmatprep.subr.mxu1 %v6140_v4 }
 0x61d   : > { %v5906_v20 = vpop.eup %5905  ;;  %5195 = vmatprep.mubr.msk.f32.mxu1 %vm6139_vm0, %v6140_v4  ;;  %5213 = vmatpush3.msk.msra.mxu1 %vm1311_vm1, %v1061_v24 }
 0x61e   : > { %v1199_v21 = vmul.f32 %v5906_v20, %v5894_v58  ;;  %5628 = vmatprep.subr.bf16.mxu1 %v6138_v2  ;;  %v1498_v49 = vpop.permute.xlu1 %1497  ;;  %v1492_v53 = vpop.permute.xlu0 %1491 }
 0x620   : > { %5196 = vmatmul.mubr.msk.f32.gmra.mrb[20].mxu1 %vm926_vm13, %v1199_v21 }
 0x621   : > { %v5908_v22 = vpop.eup %5907  ;;  %5198 = vmatprep.mubr.msk.f32.mxu1 %vm6139_vm0, %v6140_v4 }
 0x622   : > { %v1201_v23 = vmul.f32 %v5908_v22, %v5896_v61  ;;  %v1490_v52 = vpop.permute.xlu1 %1489 }
 0x624   : > { %5199 = vmatmul.mubr.msk.f32.gmra.mrb[22].mxu1 %vm926_vm13, %v1201_v23 }
 0x625   : > { %5214 = vmatprep.mubr.msk.f32.mxu1 %vm6139_vm0, %v6140_v4 }
 0x6e3   : > { %v1047_v26 = vpop.f32.mrb[12].mxu1 }
 0x6e4   : > { %v5164_v28 = vpop.f32.mrb[13].mxu1  ;;  %5215 = vmatmul.mubr.msk.f32.vlgmr.msra.gmra.mrb[24].mxu1 %vm830_vm11, %v1047_v26 }
 0x6e5   : > { %5217 = vmatprep.mubr.msk.f32.mxu1 %vm6139_vm0, %v6140_v4 }
 0x6e7   : > { %v1052_v30 = vpop.f32.mrb[14].mxu1 }
 0x6e8   : > { %v5167_v33 = vpop.f32.mrb[15].mxu1  ;;  %5218 = vmatmul.mubr.msk.f32.gmra.mrb[26].mxu1 %vm830_vm11, %v1052_v30 }
 0x6e9   : > { %5220 = vmatprep.mubr.msk.f32.mxu1 %vm6139_vm0, %v6140_v4 }
 0x6eb   : > { %v1057_v36 = vpop.f32.mrb[16].mxu1 }
 0x6ec   : > { %v5170_v39 = vpop.f32.mrb[17].mxu1  ;;  %5221 = vmatmul.mubr.msk.f32.gmra.mrb[28].mxu1 %vm830_vm11, %v1057_v36 }
 0x6ed   : > { %5244 = vmatprep.mubr.msk.f32.mxu1 %vm6139_vm0, %v6140_v4 }
 0x6ef   : > { %v1287_v43 = vpop.f32.mrb[18].mxu1 }
 0x6f0   : > { %v5194_v44 = vpop.f32.mrb[19].mxu1  ;;  %5204 = vmatmul.mubr.msk.f32.vlgmr.msra.gmra.mrb[18].mxu0 %vm830_vm11, %v1287_v43 }
 0x6f1   : > { %5627 = vmatpush3.bf16.xpose.msk.msra.mxu0 %vm6393_vm12, %v5625_v41  ;;  %5206 = vmatprep.mubr.msk.f32.mxu0 %vm6139_vm0, %v6140_v4 }
 0x6f2   : > { %5227 = vmatprep.subr.mxu0 %v6140_v4 }
 0x6f3   : > { %v1292_v45 = vpop.f32.mrb[20].mxu1 }
 0x6f4   : > { %v5197_v46 = vpop.f32.mrb[21].mxu1  ;;  %5207 = vmatmul.mubr.msk.f32.gmra.mrb[20].mxu0 %vm830_vm11, %v1292_v45 }
 0x6f5   : > { %5209 = vmatprep.mubr.msk.f32.mxu0 %vm6139_vm0, %v6140_v4 }
 0x6f7   : > { %v1297_v48 = vpop.f32.mrb[22].mxu1 }
 0x6f8   : > { %v5200_v50 = vpop.f32.mrb[23].mxu1  ;;  %5210 = vmatmul.mubr.msk.f32.gmra.mrb[22].mxu0 %vm830_vm11, %v1297_v48 }
 0x6f9   : > { %5228 = vmatpush3.xpose.msk.msra.mxu0 %vm830_vm11, %v1498_v49  ;;  %5229 = vmatprep.mubr.msk.f32.mxu0 %vm6139_vm0, %v6140_v4 }
 0x6fa   : > { %5253 = vmatprep.subr.mxu0 %v6140_v4 }
 0x6fc   : > { %5230 = vmatmul.mubr.msk.f32.vlgmr.msra.gmra.mrb[24].mxu0 %vm830_vm11, %v1488_v51 }
 0x6fd   : > { %5232 = vmatprep.mubr.msk.f32.mxu0 %vm6139_vm0, %v6140_v4 }
 0x700   : > { %5233 = vmatmul.mubr.msk.f32.gmra.mrb[26].mxu0 %vm830_vm11, %v1490_v52 }
 0x701   : > { %5235 = vmatprep.mubr.msk.f32.mxu0 %vm6139_vm0, %v6140_v4 }
 0x704   : > { %5236 = vmatmul.mubr.msk.f32.gmra.mrb[28].mxu0 %vm830_vm11, %v1492_v53 }
 0x705   : > { %5255 = vmatprep.mubr.msk.f32.mxu0 %vm6139_vm0, %v6140_v4 }
 0x7b7   : > { %v1473_v54 = vpop.f32.mrb[24].mxu1 }
 0x7b8   : > { %v5216_v55 = vpop.f32.mrb[25].mxu1 }
 0x7bb   : > { %v1478_v56 = vpop.f32.mrb[26].mxu1 }
 0x7bc   : > { %v5219_v57 = vpop.f32.mrb[27].mxu1 }
 0x7bf   : > { %v1483_v58 = vpop.f32.mrb[28].mxu1 }
 0x7c0   : > { %v5222_v59 = vpop.f32.mrb[29].mxu1 }
 0x7c3   : > { %v1381_v60 = vpop.f32.mrb[18].mxu0 }
 0x7c4   : > { %v6518_v61 = vadd.f32 %v1473_v54, %v1381_v60  ;;  %v5205_v62 = vpop.f32.mrb[19].mxu0 }
 0x7c7   : > { %v1386_v63 = vpop.f32.mrb[20].mxu0 }
 0x7c8   : > { %v6520_v0 = vadd.f32 %v1478_v56, %v1386_v63  ;;  %v5208_v1 = vpop.f32.mrb[21].mxu0  ;;  %v1726_v63 = vld [vmem:[#allocation2 + $0xe0] sm:$0xf] }
 0x7c9   : > { %5254 = vmatpush3.msk.msra.mxu0 %vm1311_vm1, %v1726_v63 }
 0x7ca   : > { %5635 = vmatprep.subr.bf16.mxu0 %v6138_v2 }
 0x7cb   : > { %v1391_v3 = vpop.f32.mrb[22].mxu0 }
 0x7cc   : > { %v6522_v5 = vadd.f32 %v1483_v58, %v1391_v3  ;;  %v5211_v6 = vpop.f32.mrb[23].mxu0 }
 0x7cf   : > { %v1577_v7 = vpop.f32.mrb[24].mxu0 }
 0x7d0   : > { %v1591_v8 = vmul.f32 0.5, %v1577_v7  ;;  %v5231_v9 = vpop.f32.mrb[25].mxu0 }
 0x7d2   : > { %v1594_v10 = vsel %vm926_vm13, %v1591_v8, -inf }
 0x7d3   : > { %1595 = vmax.xlane.f32.xlu1 %v1594_v10  ;;  %v1582_v11 = vpop.f32.mrb[26].mxu0 }
 0x7d4   : > { %v1592_v12 = vmul.f32 0.5, %v1582_v11  ;;  %v5234_v13 = vpop.f32.mrb[27].mxu0 }
 0x7d6   : > { %v1597_v14 = vsel %vm926_vm13, %v1592_v12, -inf }
 0x7d7   : > { %1598 = vmax.xlane.f32.xlu0 %v1597_v14  ;;  %v1587_v15 = vpop.f32.mrb[28].mxu0 }
 0x7d8   : > { %v1593_v16 = vmul.f32 0.5, %v1587_v15  ;;  %v5237_v17 = vpop.f32.mrb[29].mxu0 }
 0x7da   : > { %v1600_v18 = vsel %vm933_vm14, %v1593_v16, -inf }
 0x7db   : > { %1601 = vmax.xlane.f32.xlu0 %v1600_v18 }
 0x860   : > { %v1596_v19 = vpop.xlane.xlu1 %1595 }
 0x861   : > { %v1603_v20 = vsub.f32 %v1591_v8, %v1596_v19 }
 0x863   : > { %v1606_v21 = vmul.f32 1.442695, %v1603_v20 }
 0x864   : > { %v1599_v22 = vpop.xlane.xlu0 %1598 }
 0x865   : > { %5909 = vpow2.f32 %v1606_v21  ;;  %v1604_v23 = vsub.f32 %v1592_v12, %v1599_v22 }
 0x867   : > { %v1608_v24 = vmul.f32 1.442695, %v1604_v23 }
 0x868   : > { %v1602_v32 = vpop.xlane.xlu0 %1601 }
 0x869   : > { %5911 = vpow2.f32 %v1608_v24  ;;  %v1605_v33 = vsub.f32 %v1593_v16, %v1602_v32 }
 0x86b   : > { %v1610_v34 = vmul.f32 1.442695, %v1605_v33 }
 0x86d   : > { %5913 = vpow2.f32 %v1610_v34 }
 0x86f   : > { %v5910_v25 = vpop.eup %5909 }
 0x870   : > { %v1612_v26 = vsel %vm926_vm13, %v5910_v25, 0.0 }
 0x871   : > { %1613 = vadd.xlane.f32.xlu1 %v1612_v26 }
 0x873   : > { %v5912_v28 = vpop.eup %5911 }
 0x874   : > { %v1615_v30 = vsel %vm926_vm13, %v5912_v28, 0.0 }
 0x875   : > { %1616 = vadd.xlane.f32.xlu0 %v1615_v30 }
 0x877   : > { %v5914_v35 = vpop.eup %5913 }
 0x878   : > { %v1618_v36 = vsel %vm933_vm14, %v5914_v35, 0.0 }
 0x882   : > { %1631 = vrot.lane.b32.xlu1 %v6375_v42, %s6149_s19 }
 0x886   : > { %5830 = vrot.lane.b32.xlu1 %v6373_v40, %s6150_s20 }
 0x88b   : > { %5825 = vrot.lane.b32.xlu0 %v6373_v40, %s6149_s19 }
 0x88f   : > { %1832 = vrot.lane.b32.xlu0 %v6375_v42, %s6150_s20 }
 0x893   : > { %1824 = vrot.lane.b32.xlu0 %v6369_v38, %s6151_s25 }
 0x8aa   : > { %1619 = vadd.xlane.f32.xlu1 %v1618_v36 }
 0x8bb   : > { %1822 = vrot.lane.b32.xlu1 %v6367_v37, %s6151_s25 }
 0x8bf   : > { %1826 = vrot.lane.b32.xlu1 %v6375_v42, %s6151_s25 }
 0x8fe   : > { %v1614_v39 = vpop.xlane.xlu1 %1613 }
 0x8ff   : > { %5915 = vrcp.f32 %v1614_v39 }
 0x902   : > { %v1617_v41 = vpop.xlane.xlu0 %1616  ;;  %v1632_v44 = vpop.permute.xlu1 %1631 }
 0x903   : > { %5917 = vrcp.f32 %v1617_v41 }
 0x906   : > { %v5826_v43 = vpop.permute.xlu0 %5825  ;;  %v5831_v49 = vpop.permute.xlu1 %5830 }
 0x907   : > { %v5828_v38 = vunpack.i.h.bf16 %v5826_v43  ;;  %v5827_v45 = vunpack.i.l.bf16 %v5826_v43  ;;  %v5833_v37 = vunpack.i.h.bf16 %v5831_v49  ;;  %v5832_v52 = vunpack.i.l.bf16 %v5831_v49 }
 0x909   : > { %v5629_v46 = vpack.c.bf16 %v5828_v38, %v5827_v45  ;;  %v5916_v48 = vpop.eup %5915  ;;  %v5632_v54 = vpack.c.bf16 %v5833_v37, %v5832_v52 }
 0x90a   : > { %v1622_v50 = vmul.f32 %v5916_v48, %v5910_v25  ;;  %v1833_v55 = vpop.permute.xlu0 %1832 }
 0x90b   : > { %5630 = vmatpush3.bf16.msra.mxu1 %v5629_v46 }
 0x90c   : > { %5242 = vmatprep.subr.mxu1 %v6140_v4 }
 0x90d   : > { %v5918_v51 = vpop.eup %5917 }
 0x90e   : > { %v1624_v53 = vmul.f32 %v5918_v51, %v5912_v28  ;;  %v1825_v60 = vpop.permute.xlu0 %1824 }
 0x90f   : > { %5243 = vmatpush3.msk.msra.mxu1 %vm978_vm15, %v1632_v44 }
 0x910   : > { %5245 = vmatmul.mubr.msk.f32.vlgmr.msra.gmra.mrb[30].mxu1 %vm926_vm13, %v1622_v50  ;;  %5631 = vmatprep.subr.bf16.mxu1 %v6138_v2 }
 0x911   : > { %5247 = vmatprep.mubr.msk.f32.mxu1 %vm6139_vm0, %v6140_v4 }
 0x914   : > { %5248 = vmatmul.mubr.msk.f32.gmra.mrb[32].mxu1 %vm926_vm13, %v1624_v53 }
 0x915   : > { %5250 = vmatprep.mubr.msk.f32.mxu1 %vm6139_vm0, %v6140_v4 }
 0x916   : > { %5634 = vmatpush3.bf16.xpose.msk.msra.mxu1 %vm6393_vm12, %v5632_v54 }
 0x917   : > { %5268 = vmatprep.subr.mxu1 %v6140_v4 }
 0x91e   : > { %5269 = vmatpush3.xpose.msk.msra.mxu1 %vm830_vm11, %v1833_v55 }
 0x91f   : > { %5294 = vmatprep.subr.mxu1 %v6140_v4 }
 0x937   : > { %v1620_v56 = vpop.xlane.xlu1 %1619 }
 0x938   : > { %5919 = vrcp.f32 %v1620_v56 }
 0x93b   : > { %v1823_v59 = vpop.permute.xlu1 %1822 }
 0x93f   : > { %v1827_v62 = vpop.permute.xlu1 %1826 }
 0x942   : > { %v5920_v57 = vpop.eup %5919 }
 0x943   : > { %v1626_v58 = vmul.f32 %v5920_v57, %v5914_v35 }
 0x945   : > { %5251 = vmatmul.mubr.msk.f32.gmra.mrb[34].mxu1 %vm926_vm13, %v1626_v58 }
 0x946   : > { %5270 = vmatprep.mubr.msk.f32.mxu1 %vm6139_vm0, %v6140_v4 }
 0x949   : > { %5271 = vmatmul.mubr.msk.f32.vlgmr.msra.gmra.mrb[36].mxu1 %vm830_vm11, %v1823_v59 }
 0x94a   : > { %5273 = vmatprep.mubr.msk.f32.mxu1 %vm6139_vm0, %v6140_v4 }
 0x94d   : > { %5274 = vmatmul.mubr.msk.f32.gmra.mrb[38].mxu1 %vm830_vm11, %v1825_v60 }
 0x94e   : > { %5276 = vmatprep.mubr.msk.f32.mxu1 %vm6139_vm0, %v6140_v4 }
 0x951   : > { %5277 = vmatmul.mubr.msk.f32.gmra.mrb[40].mxu1 %vm830_vm11, %v1827_v62 }
 0x952   : > { %5296 = vmatprep.mubr.msk.f32.mxu1 %vm6139_vm0, %v6140_v4 }
 0x9e3   : > { %v1712_v1 = vpop.f32.mrb[30].mxu1 }
 0x9e4   : > { %v5246_v3 = vpop.f32.mrb[31].mxu1  ;;  %5256 = vmatmul.mubr.msk.f32.vlgmr.msra.gmra.mrb[30].mxu0 %vm830_vm11, %v1712_v1 }
 0x9e5   : > { %5258 = vmatprep.mubr.msk.f32.mxu0 %vm6139_vm0, %v6140_v4 }
 0x9e7   : > { %v1717_v6 = vpop.f32.mrb[32].mxu1 }
 0x9e8   : > { %v5249_v7 = vpop.f32.mrb[33].mxu1  ;;  %5259 = vmatmul.mubr.msk.f32.gmra.mrb[32].mxu0 %vm830_vm11, %v1717_v6 }
 0x9e9   : > { %5261 = vmatprep.mubr.msk.f32.mxu0 %vm6139_vm0, %v6140_v4 }
 0xa18   : > { %v1722_v8 = vpop.f32.mrb[34].mxu1 }
 0xa19   : > { %v5252_v9 = vpop.f32.mrb[35].mxu1  ;;  %5262 = vmatmul.mubr.msk.f32.gmra.mrb[34].mxu0 %vm830_vm11, %v1722_v8 }
 0xa1a   : > { %5285 = vmatprep.mubr.msk.f32.mxu0 %vm6139_vm0, %v6140_v4  ;;  %v4729_v9 = vld [vmem:[#allocation2 + $0x122] ss:$0 sm:$0xff] }
 0xa1c   : > { %v1912_v10 = vpop.f32.mrb[36].mxu1 }
 0xa1d   : > { %v1926_v11 = vmul.f32 0.5, %v1912_v10  ;;  %v5272_v12 = vpop.f32.mrb[37].mxu1 }
 0xa1f   : > { %v1929_v13 = vsel %vm926_vm13, %v1926_v11, -inf }
 0xa20   : > { %1930 = vmax.xlane.f32.xlu0 %v1929_v13  ;;  %v1917_v14 = vpop.f32.mrb[38].mxu1 }
 0xa21   : > { %v1927_v15 = vmul.f32 0.5, %v1917_v14  ;;  %v5275_v16 = vpop.f32.mrb[39].mxu1 }
 0xa23   : > { %v1932_v17 = vsel %vm926_vm13, %v1927_v15, -inf }
 0xa24   : > { %1933 = vmax.xlane.f32.xlu1 %v1932_v17  ;;  %v1922_v18 = vpop.f32.mrb[40].mxu1 }
 0xa25   : > { %v1928_v19 = vmul.f32 0.5, %v1922_v18  ;;  %v5278_v20 = vpop.f32.mrb[41].mxu1 }
 0xa27   : > { %v1935_v21 = vsel %vm933_vm14, %v1928_v19, -inf }
 0xa28   : > { %1936 = vmax.xlane.f32.xlu0 %v1935_v21 }
 0xaad   : > { %v1931_v22 = vpop.xlane.xlu0 %1930 }
 0xaae   : > { %v1938_v23 = vsub.f32 %v1926_v11, %v1931_v22 }
 0xab0   : > { %v1941_v24 = vmul.f32 1.442695, %v1938_v23 }
 0xab1   : > { %v1934_v25 = vpop.xlane.xlu1 %1933 }
 0xab2   : > { %5921 = vpow2.f32 %v1941_v24  ;;  %v1939_v26 = vsub.f32 %v1927_v15, %v1934_v25 }
 0xab4   : > { %v1943_v28 = vmul.f32 1.442695, %v1939_v26 }
 0xab5   : > { %v1937_v30 = vpop.xlane.xlu0 %1936 }
 0xab6   : > { %5923 = vpow2.f32 %v1943_v28  ;;  %v1940_v32 = vsub.f32 %v1928_v19, %v1937_v30 }
 0xab7   : > { %v1805_v33 = vpop.f32.mrb[30].mxu0 }
 0xab8   : > { %v1945_v34 = vmul.f32 1.442695, %v1940_v32  ;;  %v6585_v35 = vadd.f32 %v1805_v33, %v6518_v61  ;;  %v5257_v36 = vpop.f32.mrb[31].mxu0  ;;  %v2061_v61 = vld [vmem:[#allocation2 + $0xe8] sm:$0xf] }
 0xab9   : > { %5295 = vmatpush3.msk.msra.mxu1 %vm1311_vm1, %v2061_v61 }
 0xaba   : > { %5925 = vpow2.f32 %v1945_v34  ;;  %5641 = vmatprep.subr.bf16.mxu1 %v6138_v2 }
 0xabb   : > { %v1810_v39 = vpop.f32.mrb[32].mxu0 }
 0xabc   : > { %v5922_v41 = vpop.eup %5921  ;;  %v6588_v43 = vadd.f32 %v1810_v39, %v6520_v0  ;;  %v5260_v44 = vpop.f32.mrb[33].mxu0 }
 0xabd   : > { %v1947_v38 = vsel %vm926_vm13, %v5922_v41, 0.0 }
 0xabe   : > { %1948 = vadd.xlane.f32.xlu0 %v1947_v38 }
 0xac0   : > { %v5924_v45 = vpop.eup %5923 }
 0xac1   : > { %v1950_v46 = vsel %vm926_vm13, %v5924_v45, 0.0 }
 0xac2   : > { %1951 = vadd.xlane.f32.xlu1 %v1950_v46  ;;  %v714_v46 = vld [vmem:[#allocation2 + $0xf0] sm:$0xff] }
 0xac4   : > { %v5926_v48 = vpop.eup %5925 }
 0xac5   : > { %v1953_v49 = vsel %vm933_vm14, %v5926_v48, 0.0 }
 0xac6   : > { %1954 = vadd.xlane.f32.xlu0 %v1953_v49 }
 0xad3   : > { %5835 = vrot.lane.b32.xlu1 %v6373_v40, %s6152_s27 }
 0xadc   : > { %1966 = vrot.lane.b32.xlu0 %v6375_v42, %s6152_s27 }
 0xaec   : > { %v1815_v0 = vpop.f32.mrb[34].mxu0 }
 0xaed   : > { %v1821_v50 = vadd.f32 %v1815_v0, %v6522_v5  ;;  %v5263_v51 = vpop.f32.mrb[35].mxu0 }
 0xb4b   : > { %v1949_v37 = vpop.xlane.xlu0 %1948 }
 0xb4c   : > { %5927 = vrcp.f32 %v1949_v37 }
 0xb4f   : > { %v1952_v52 = vpop.xlane.xlu1 %1951 }
 0xb50   : > { %5929 = vrcp.f32 %v1952_v52 }
 0xb53   : > { %v5836_v53 = vpop.permute.xlu1 %5835  ;;  %v1955_v54 = vpop.xlane.xlu0 %1954 }
 0xb54   : > { %v5838_v55 = vunpack.i.h.bf16 %v5836_v53  ;;  %v5837_v40 = vunpack.i.l.bf16 %v5836_v53  ;;  %5931 = vrcp.f32 %v1955_v54 }
 0xb56   : > { %v5636_v56 = vpack.c.bf16 %v5838_v55, %v5837_v40  ;;  %v5928_v42 = vpop.eup %5927 }
 0xb57   : > { %v1957_v57 = vmul.f32 %v5928_v42, %v5922_v41  ;;  %v1967_v58 = vpop.permute.xlu0 %1966 }
 0xb58   : > { %5637 = vmatpush3.bf16.msra.mxu0 %v5636_v56  ;;  %v4730_v56 = vld [vmem:[#allocation2 + $0x123] ss:$0 sm:$0xff] }
 0xb59   : > { %5283 = vmatprep.subr.mxu0 %v6140_v4 }
 0xb5a   : > { %v5930_v59 = vpop.eup %5929 }
 0xb5b   : > { %v1959_v5 = vmul.f32 %v5930_v59, %v5924_v45 }
 0xb5c   : > { %5284 = vmatpush3.msk.msra.mxu0 %vm978_vm15, %v1967_v58 }
 0xb5d   : > { %5286 = vmatmul.mubr.msk.f32.vlgmr.msra.gmra.mrb[36].mxu0 %vm926_vm13, %v1957_v57  ;;  %5638 = vmatprep.subr.bf16.mxu0 %v6138_v2  ;;  %v4731_v57 = vld [vmem:[#allocation2 + $0x124] ss:$0 sm:$0xff] }
 0xb5e   : > { %5288 = vmatprep.mubr.msk.f32.mxu0 %vm6139_vm0, %v6140_v4  ;;  %v5932_v60 = vpop.eup %5931 }
 0xb5f   : > { %v1961_v62 = vmul.f32 %v5932_v60, %v5926_v48  ;;  %v715_v48 = vld [vmem:[#allocation2 + $0xf8] sm:$0xff] }
 0xb60   : > { %v5639_v49 = vpack.c.bf16 %v715_v48, %v714_v46 }
 0xb61   : > { %5289 = vmatmul.mubr.msk.f32.gmra.mrb[38].mxu0 %vm926_vm13, %v1959_v5 }
 0xb62   : > { %5291 = vmatprep.mubr.msk.f32.mxu0 %vm6139_vm0, %v6140_v4  ;;  %5640 = vmatpush3.bf16.msra.mxu0 %v5639_v49 }
 0xb63   : > { %5647 = vmatprep.subr.bf16.mxu0 %v6138_v2 }
 0xb65   : > { %5292 = vmatmul.mubr.msk.f32.gmra.mrb[40].mxu0 %vm926_vm13, %v1961_v62 }
 0xb66   : > { %5309 = vmatprep.mubr.msk.f32.mxu0 %vm6139_vm0, %v6140_v4 }
 0xc30   : > { %v2047_v63 = vpop.f32.mrb[36].mxu0 }
 0xc31   : > { %v5287_v1 = vpop.f32.mrb[37].mxu0  ;;  %5297 = vmatmul.mubr.msk.f32.vlgmr.msra.gmra.mrb[42].mxu1 %vm830_vm11, %v2047_v63 }
 0xc32   : > { %5299 = vmatprep.mubr.msk.f32.mxu1 %vm6139_vm0, %v6140_v4 }
 0xc34   : > { %v2052_v3 = vpop.f32.mrb[38].mxu0 }
 0xc35   : > { %v5290_v6 = vpop.f32.mrb[39].mxu0  ;;  %5300 = vmatmul.mubr.msk.f32.gmra.mrb[44].mxu1 %vm830_vm11, %v2052_v3 }
 0xc36   : > { %5302 = vmatprep.mubr.msk.f32.mxu1 %vm6139_vm0, %v6140_v4 }
 0xc38   : > { %v2057_v7 = vpop.f32.mrb[40].mxu0 }
 0xc39   : > { %v5293_v8 = vpop.f32.mrb[41].mxu0  ;;  %5303 = vmatmul.mubr.msk.f32.gmra.mrb[46].mxu1 %vm830_vm11, %v2057_v7 }
 0xc3a   : > { %5326 = vmatprep.mubr.msk.f32.mxu1 %vm6139_vm0, %v6140_v4  ;;  %v716_v8 = vld [vmem:[#allocation2 + $0x100] sm:$0xff] }
 0xd04   : > { %v2140_v10 = vpop.f32.mrb[42].mxu1 }
 0xd05   : > { %v2154_v11 = vadd.f32 %v2140_v10, %v6585_v35  ;;  %v5298_v12 = vpop.f32.mrb[43].mxu1 }
 0xd06   : > { %v719_v12 = vld [vmem:[#allocation2 + $0x118] sm:$0xff] }
 0xd07   : > { %v2161_v13 = vadd.f32 %v4729_v9, %v2154_v11  ;;  %v718_v11 = vld [vmem:[#allocation2 + $0x110] sm:$0xff] }
 0xd08   : > { %v2145_v14 = vpop.f32.mrb[44].mxu1 }
 0xd09   : > { %v2155_v15 = vadd.f32 %v2145_v14, %v6588_v43  ;;  %v5301_v16 = vpop.f32.mrb[45].mxu1  ;;  %v2164_v17 = vadd.f32 %v2161_v13, %v6349_v27  ;;  %v5645_v13 = vpack.c.bf16 %v719_v12, %v718_v11  ;;  %v4732_v14 = vld [vmem:[#allocation2 + $0x121] ss:$0 sm:$0xff] }
 0xd0b   : > { %v2162_v18 = vadd.f32 %v4729_v9, %v2155_v15  ;;  %v2167_v19 = vsel %vm216_vm2, %v2164_v17, 0.0 }
 0xd0c   : > { %2168 = vadd.xlane.f32.xlu1 %v2167_v19  ;;  %v2150_v20 = vpop.f32.mrb[46].mxu1 }
 0xd0d   : > { %v2156_v21 = vadd.f32 %v2150_v20, %v1821_v50  ;;  %v5304_v22 = vpop.f32.mrb[47].mxu1  ;;  %v2165_v23 = vadd.f32 %v2162_v18, %v6355_v29 }
 0xd0f   : > { %v2163_v24 = vadd.f32 %v4729_v9, %v2156_v21  ;;  %v2170_v25 = vsel %vm216_vm2, %v2165_v23, 0.0  ;;  %v717_v9 = vld [vmem:[#allocation2 + $0x108] sm:$0xff] }
 0xd10   : > { %2171 = vadd.xlane.f32.xlu0 %v2170_v25  ;;  %v5642_v10 = vpack.c.bf16 %v717_v9, %v716_v8 }
 0xd11   : > { %v2166_v26 = vadd.f32 %v2163_v24, %v6361_v31 }
 0xd12   : > { %5643 = vmatpush3.bf16.msra.mxu1 %v5642_v10 }
 0xd13   : > { %v2174_v28 = vsel %vm2173_vm3, %v2166_v26, 0.0  ;;  %5644 = vmatprep.subr.bf16.mxu1 %v6138_v2 }
 0xd14   : > { %2175 = vadd.xlane.f32.xlu1 %v2174_v28 }
 0xd16   : > { %5646 = vmatpush3.bf16.msra.mxu1 %v5645_v13 }
 0xd17   : > { %5650 = vmatprep.subr.bf16.mxu1 %v6138_v2 }
 0xd99   : > { %v2169_v27 = vpop.xlane.xlu1 %2168 }
 0xd9a   : > { %v2178_v30 = vmul.f32 0.0625, %v2169_v27 }
 0xd9c   : > { %v2181_v32 = vsub.f32 %v2164_v17, %v2178_v30 }
 0xd9d   : > { %v2172_v33 = vpop.xlane.xlu0 %2171 }
 0xd9e   : > { %v2179_v34 = vmul.f32 0.0625, %v2172_v33  ;;  %v2184_v35 = vmul.f32 %v2181_v32, %v2181_v32 }
 0xda0   : > { %v2182_v36 = vsub.f32 %v2165_v23, %v2179_v34  ;;  %v2187_v39 = vsel %vm216_vm2, %v2184_v35, 0.0 }
 0xda1   : > { %2188 = vadd.xlane.f32.xlu0 %v2187_v39  ;;  %v2176_v29 = vpop.xlane.xlu1 %2175 }
 0xda2   : > { %v2180_v41 = vmul.f32 0.0625, %v2176_v29  ;;  %v2185_v43 = vmul.f32 %v2182_v36, %v2182_v36 }
 0xda4   : > { %v2183_v44 = vsub.f32 %v2166_v26, %v2180_v41  ;;  %v2190_v38 = vsel %vm216_vm2, %v2185_v43, 0.0 }
 0xda5   : > { %2191 = vadd.xlane.f32.xlu1 %v2190_v38 }
 0xda6   : > { %v2186_v31 = vmul.f32 %v2183_v44, %v2183_v44 }
 0xda8   : > { %v2193_v45 = vsel %vm2173_vm3, %v2186_v31, 0.0 }
 0xda9   : > { %2194 = vadd.xlane.f32.xlu0 %v2193_v45 }
 0xe2e   : > { %v2189_v61 = vpop.xlane.xlu0 %2188 }
 0xe2f   : > { %v2196_v0 = vmul.f32 0.0625, %v2189_v61 }
 0xe31   : > { %v2199_v50 = vadd.f32 1e-05, %v2196_v0 }
 0xe32   : > { %v2192_v51 = vpop.xlane.xlu1 %2191 }
 0xe33   : > { %5933 = vrsqrt.f32 %v2199_v50  ;;  %v2197_v37 = vmul.f32 0.0625, %v2192_v51 }
 0xe35   : > { %v2200_v52 = vadd.f32 1e-05, %v2197_v37 }
 0xe36   : > { %v2195_v53 = vpop.xlane.xlu0 %2194 }
 0xe37   : > { %5935 = vrsqrt.f32 %v2200_v52  ;;  %v2198_v54 = vmul.f32 0.0625, %v2195_v53  ;;  %v4736_v52 = vld [vmem:[#allocation2 + $0x125] ss:$0 sm:$0xff] }
 0xe39   : > { %v2201_v55 = vadd.f32 1e-05, %v2198_v54 }
 0xe3b   : > { %5937 = vrsqrt.f32 %v2201_v55 }
 0xe3d   : > { %v5934_v40 = vpop.eup %5933 }
 0xe3e   : > { %v2205_v42 = vmul.f32 %v5934_v40, %v2181_v32 }
 0xe40   : > { %v2212_v58 = vmul.f32 %v4730_v56, %v2205_v42 }
 0xe41   : > { %v5936_v59 = vpop.eup %5935 }
 0xe42   : > { %v6633_v5 = vadd.f32 %v4731_v57, %v2212_v58  ;;  %v2206_v60 = vmul.f32 %v5936_v59, %v2182_v36 }
 0xe44   : > { %5310 = vmatmul.mubr.msk.f32.vlgmr.msra.gmra.mrb[42].mxu0 %vm216_vm2, %v6633_v5  ;;  %v2213_v62 = vmul.f32 %v4730_v56, %v2206_v60 }
 0xe45   : > { %v5938_v63 = vpop.eup %5937  ;;  %5312 = vmatprep.mubr.msk.f32.mxu0 %vm6139_vm0, %v6140_v4 }
 0xe46   : > { %v6639_v1 = vadd.f32 %v4731_v57, %v2213_v62  ;;  %v2207_v3 = vmul.f32 %v5938_v63, %v2183_v44 }
 0xe48   : > { %5313 = vmatmul.mubr.msk.f32.gmra.mrb[44].mxu0 %vm216_vm2, %v6639_v1  ;;  %v2214_v6 = vmul.f32 %v4730_v56, %v2207_v3 }
 0xe49   : > { %5315 = vmatprep.mubr.msk.f32.mxu0 %vm6139_vm0, %v6140_v4 }
 0xe4a   : > { %v6645_v7 = vadd.f32 %v4731_v57, %v2214_v6 }
 0xe4c   : > { %5316 = vmatmul.mubr.msk.f32.gmra.mrb[46].mxu0 %vm216_vm2, %v6645_v7 }
 0xe4d   : > { %5339 = vmatprep.mubr.msk.f32.mxu0 %vm6139_vm0, %v6140_v4 }
 0xf17   : > { %v2301_v15 = vpop.f32.mrb[42].mxu0 }
 0xf18   : > { %v2302_v16 = vadd.f32 %v4732_v14, %v2301_v15  ;;  %v5311_v17 = vpop.f32.mrb[43].mxu0 }
 0xf1a   : > { %v2315_v18 = vmul.f32 %v2302_v16, %v2302_v16 }
 0xf1b   : > { %v2306_v19 = vpop.f32.mrb[44].mxu0 }
 0xf1c   : > { %v2318_v20 = vmul.f32 %v2315_v18, %v2302_v16  ;;  %v2307_v21 = vadd.f32 %v4732_v14, %v2306_v19  ;;  %v5314_v22 = vpop.f32.mrb[45].mxu0 }
 0xf1d   : > { %v2493_v22 = vld [vmem:[#allocation2 + $0x130] sm:$0xff] }
 0xf1e   : > { %v2321_v23 = vmul.f32 0.044715, %v2318_v20  ;;  %v2316_v24 = vmul.f32 %v2307_v21, %v2307_v21 }
 0xf1f   : > { %v2311_v25 = vpop.f32.mrb[46].mxu0 }
 0xf20   : > { %v2324_v26 = vadd.f32 %v2321_v23, %v2302_v16  ;;  %v2319_v28 = vmul.f32 %v2316_v24, %v2307_v21  ;;  %v2312_v27 = vadd.f32 %v4732_v14, %v2311_v25  ;;  %v5317_v30 = vpop.f32.mrb[47].mxu0 }
 0xf22   : > { %v2327_v32 = vmul.f32 0.7978846, %v2324_v26  ;;  %v2322_v33 = vmul.f32 0.044715, %v2319_v28  ;;  %v2317_v34 = vmul.f32 %v2312_v27, %v2312_v27 }
 0xf24   : > { %5939 = vtanh.f32 %v2327_v32  ;;  %v2325_v35 = vadd.f32 %v2322_v33, %v2307_v21  ;;  %v2320_v36 = vmul.f32 %v2317_v34, %v2312_v27 }
 0xf26   : > { %v2328_v39 = vmul.f32 0.7978846, %v2325_v35  ;;  %v2323_v29 = vmul.f32 0.044715, %v2320_v36  ;;  %v4740_v36 = vld [vmem:[#allocation2 + $0x126] ss:$0 sm:$0xff] }
 0xf28   : > { %5941 = vtanh.f32 %v2328_v39  ;;  %v2326_v41 = vadd.f32 %v2323_v29, %v2312_v27  ;;  %v4741_v29 = vld [vmem:[#allocation2 + $0x127] ss:$0 sm:$0xff] }
 0xf2a   : > { %v2329_v43 = vmul.f32 0.7978846, %v2326_v41 }
 0xf2c   : > { %5943 = vtanh.f32 %v2329_v43 }
 0xf2e   : > { %v5940_v44 = vpop.eup %5939 }
 0xf2f   : > { %v2333_v38 = vadd.f32 1.0, %v5940_v44 }
 0xf31   : > { %v2336_v31 = vmul.f32 0.5, %v2333_v38 }
 0xf32   : > { %v5942_v45 = vpop.eup %5941 }
 0xf33   : > { %v2339_v46 = vmul.f32 %v2336_v31, %v2302_v16  ;;  %v2334_v48 = vadd.f32 1.0, %v5942_v45 }
 0xf35   : > { %5327 = vmatmul.mubr.msk.f32.vlgmr.msra.gmra.mrb[48].mxu1 %vm2346_vm4, %v2339_v46  ;;  %v2337_v49 = vmul.f32 0.5, %v2334_v48 }
 0xf36   : > { %v5944_v61 = vpop.eup %5943  ;;  %5329 = vmatprep.mubr.msk.f32.mxu1 %vm6139_vm0, %v6140_v4 }
 0xf37   : > { %v2340_v0 = vmul.f32 %v2337_v49, %v2307_v21  ;;  %v2335_v50 = vadd.f32 1.0, %v5944_v61  ;;  %v2492_v21 = vld [vmem:[#allocation2 + $0x128] sm:$0xff] }
 0xf38   : > { %v5648_v23 = vpack.c.bf16 %v2493_v22, %v2492_v21 }
 0xf39   : > { %5330 = vmatmul.mubr.msk.f32.gmra.mrb[50].mxu1 %vm2346_vm4, %v2340_v0  ;;  %v2338_v51 = vmul.f32 0.5, %v2335_v50 }
 0xf3a   : > { %5332 = vmatprep.mubr.msk.f32.mxu1 %vm6139_vm0, %v6140_v4  ;;  %5649 = vmatpush3.bf16.msra.mxu0 %v5648_v23 }
 0xf3b   : > { %v2341_v37 = vmul.f32 %v2338_v51, %v2312_v27  ;;  %5654 = vmatprep.subr.bf16.mxu0 %v6138_v2  ;;  %v4742_v51 = vld [vmem:[#allocation2 + $0x188] ss:$0 sm:$0xff] }
 0xf3d   : > { %5333 = vmatmul.mubr.msk.f32.gmra.mrb[52].mxu1 %vm2346_vm4, %v2341_v37 }
 0xf3e   : > { %5354 = vmatprep.mubr.msk.f32.mxu1 %vm6139_vm0, %v6140_v4 }
0x1008   : > { %v2422_v53 = vpop.f32.mrb[48].mxu1 }
0x1009   : > { %v2423_v54 = vadd.f32 %v4736_v52, %v2422_v53  ;;  %v5328_v55 = vpop.f32.mrb[49].mxu1 }
0x100b   : > { %v2436_v40 = vadd.f32 %v2423_v54, %v6633_v5 }
0x100c   : > { %v2427_v56 = vpop.f32.mrb[50].mxu1 }
0x100d   : > { %v2428_v42 = vadd.f32 %v4736_v52, %v2427_v56  ;;  %v5331_v57 = vpop.f32.mrb[51].mxu1  ;;  %v2439_v58 = vsel %vm216_vm2, %v2436_v40, 0.0 }
0x100e   : > { %2440 = vadd.xlane.f32.xlu1 %v2439_v58 }
0x100f   : > { %v2437_v59 = vadd.f32 %v2428_v42, %v6639_v1 }
0x1010   : > { %v2432_v60 = vpop.f32.mrb[52].mxu1 }
0x1011   : > { %v2433_v62 = vadd.f32 %v4736_v52, %v2432_v60  ;;  %v5334_v63 = vpop.f32.mrb[53].mxu1  ;;  %v2442_v3 = vsel %vm216_vm2, %v2437_v59, 0.0 }
0x1012   : > { %2443 = vadd.xlane.f32.xlu0 %v2442_v3 }
0x1013   : > { %v2438_v6 = vadd.f32 %v2433_v62, %v6645_v7 }
0x1015   : > { %v2445_v8 = vsel %vm2173_vm3, %v2438_v6, 0.0 }
0x1016   : > { %2446 = vadd.xlane.f32.xlu1 %v2445_v8 }
0x109b   : > { %v2441_v5 = vpop.xlane.xlu1 %2440 }
0x109c   : > { %v2448_v9 = vmul.f32 0.0625, %v2441_v5 }
0x109e   : > { %v2451_v10 = vsub.f32 %v2436_v40, %v2448_v9 }
0x109f   : > { %v2444_v11 = vpop.xlane.xlu0 %2443 }
0x10a0   : > { %v2449_v12 = vmul.f32 0.0625, %v2444_v11  ;;  %v2454_v13 = vmul.f32 %v2451_v10, %v2451_v10 }
0x10a2   : > { %v2452_v14 = vsub.f32 %v2437_v59, %v2449_v12  ;;  %v2457_v1 = vsel %vm216_vm2, %v2454_v13, 0.0 }
0x10a3   : > { %2458 = vadd.xlane.f32.xlu0 %v2457_v1  ;;  %v2447_v15 = vpop.xlane.xlu1 %2446 }
0x10a4   : > { %v2450_v16 = vmul.f32 0.0625, %v2447_v15  ;;  %v2455_v17 = vmul.f32 %v2452_v14, %v2452_v14 }
0x10a6   : > { %v2453_v18 = vsub.f32 %v2438_v6, %v2450_v16  ;;  %v2460_v19 = vsel %vm216_vm2, %v2455_v17, 0.0 }
0x10a7   : > { %2461 = vadd.xlane.f32.xlu1 %v2460_v19 }
0x10a8   : > { %v2456_v7 = vmul.f32 %v2453_v18, %v2453_v18 }
0x10aa   : > { %v2463_v20 = vsel %vm2173_vm3, %v2456_v7, 0.0 }
0x10ab   : > { %2464 = vadd.xlane.f32.xlu0 %v2463_v20 }
0x1130   : > { %v2459_v24 = vpop.xlane.xlu0 %2458 }
0x1131   : > { %v2466_v25 = vmul.f32 0.0625, %v2459_v24 }
0x1133   : > { %v2469_v26 = vadd.f32 1e-05, %v2466_v25 }
0x1134   : > { %v2462_v28 = vpop.xlane.xlu1 %2461 }
0x1135   : > { %5945 = vrsqrt.f32 %v2469_v26  ;;  %v2467_v27 = vmul.f32 0.0625, %v2462_v28 }
0x1137   : > { %v2470_v30 = vadd.f32 1e-05, %v2467_v27 }
0x1138   : > { %v2465_v32 = vpop.xlane.xlu0 %2464 }
0x1139   : > { %5947 = vrsqrt.f32 %v2470_v30  ;;  %v2468_v33 = vmul.f32 0.0625, %v2465_v32 }
0x113b   : > { %v2471_v34 = vadd.f32 1e-05, %v2468_v33 }
0x113d   : > { %5949 = vrsqrt.f32 %v2471_v34 }
0x113f   : > { %v5946_v35 = vpop.eup %5945 }
0x1140   : > { %v2475_v39 = vmul.f32 %v5946_v35, %v2451_v10 }
0x1142   : > { %v2482_v41 = vmul.f32 %v4740_v36, %v2475_v39 }
0x1143   : > { %v5948_v43 = vpop.eup %5947 }
0x1144   : > { %v6672_v44 = vadd.f32 %v4741_v29, %v2482_v41  ;;  %v2476_v38 = vmul.f32 %v5948_v43, %v2452_v14 }
0x1146   : > { %5340 = vmatmul.mubr.msk.f32.vlgmr.msra.gmra.mrb[48].mxu0 %vm216_vm2, %v6672_v44  ;;  %v2483_v31 = vmul.f32 %v4740_v36, %v2476_v38 }
0x1147   : > { %v5950_v45 = vpop.eup %5949  ;;  %5342 = vmatprep.mubr.msk.f32.mxu0 %vm6139_vm0, %v6140_v4 }
0x1148   : > { %v6678_v46 = vadd.f32 %v4741_v29, %v2483_v31  ;;  %v2477_v48 = vmul.f32 %v5950_v45, %v2453_v18 }
0x114a   : > { %5343 = vmatmul.mubr.msk.f32.gmra.mrb[50].mxu0 %vm216_vm2, %v6678_v46  ;;  %v2484_v49 = vmul.f32 %v4740_v36, %v2477_v48 }
0x114b   : > { %5345 = vmatprep.mubr.msk.f32.mxu0 %vm6139_vm0, %v6140_v4 }
0x114c   : > { %v6684_v61 = vadd.f32 %v4741_v29, %v2484_v49 }
0x114e   : > { %5346 = vmatmul.mubr.msk.f32.gmra.mrb[52].mxu0 %vm216_vm2, %v6684_v61 }
0x114f   : > { %5369 = vmatprep.mubr.msk.f32.mxu0 %vm6139_vm0, %v6140_v4 }
0x1219   : > { %v2587_v0 = vpop.f32.mrb[48].mxu0 }
0x121a   : > { %v5341_v50 = vpop.f32.mrb[49].mxu0  ;;  %v6690_v52 = vadd.f32 %v4742_v51, %v2587_v0 }
0x121d   : > { %v2592_v37 = vpop.f32.mrb[50].mxu0 }
0x121e   : > { %v6692_v53 = vadd.f32 %v4742_v51, %v2592_v37  ;;  %v5344_v54 = vpop.f32.mrb[51].mxu0 }
0x1220   : > { %v6696_v55 = vpack.i.bf16 %v6692_v53, %v6690_v52 }
0x1221   : > { %v2597_v40 = vpop.f32.mrb[52].mxu0 }
0x1222   : > { %v6698_v56 = vadd.f32 %v4742_v51, %v2597_v40  ;;  %5840 = vrot.lane.b32.xlu1 %v6696_v55, %s6142_s6  ;;  %v5347_v42 = vpop.f32.mrb[53].mxu0 }
0x1224   : > { %2608 = vrot.lane.b32.xlu0 %v6698_v56, %s6142_s6  ;;  %s4567_s6 = sshll.u32 %s191_s5, 4  ;;  %s7010_s6 = int_to_ptr.vmem [resolvable:$true] %s4567_s6 }
0x1226   : > { %5845 = vrot.lane.b32.xlu1 %v6696_v55, %s6143_s7 }
0x1228   : > { %2838 = vrot.lane.b32.xlu0 %v6690_v52, %s6144_s8 }
0x122a   : > { %2848 = vrot.lane.b32.xlu1 %v6698_v56, %s6143_s7 }
0x122c   : > { %2842 = vrot.lane.b32.xlu0 %v6698_v56, %s6144_s8 }
0x122e   : > { %2840 = vrot.lane.b32.xlu1 %v6692_v53, %s6144_s8 }
0x1294   : > { %v5841_v57 = vpop.permute.xlu1 %5840 }
0x1295   : > { %v5843_v58 = vunpack.i.h.bf16 %v5841_v57  ;;  %v5842_v59 = vunpack.i.l.bf16 %v5841_v57 }
0x1296   : > { %v2609_v6 = vpop.permute.xlu0 %2608 }
0x1297   : > { %v5651_v60 = vpack.c.bf16 %v5843_v58, %v5842_v59 }
0x1298   : > { %v5846_v62 = vpop.permute.xlu1 %5845 }
0x1299   : > { %5653 = vmatpush3.bf16.xpose.msk.msra.mxu1 %vm6393_vm12, %v5651_v60  ;;  %v5848_v63 = vunpack.i.h.bf16 %v5846_v62  ;;  %v5847_v3 = vunpack.i.l.bf16 %v5846_v62 }
0x129a   : > { %5352 = vmatprep.subr.mxu1 %v6140_v4  ;;  %v2839_v9 = vpop.permute.xlu0 %2838 }
0x129b   : > { %v5658_v8 = vpack.c.bf16 %v5848_v63, %v5847_v3 }
0x129c   : > { %v2849_v5 = vpop.permute.xlu1 %2848 }
0x129e   : > { %v2843_v11 = vpop.permute.xlu0 %2842 }
0x12a0   : > { %v2841_v10 = vpop.permute.xlu1 %2840 }
0x12a1   : > { %5353 = vmatpush3.xpose.msk.msra.mxu1 %vm830_vm11, %v2609_v6 }
0x12a2   : > { %5657 = vmatprep.subr.bf16.mxu1 %v6138_v2 }
0x12a4   : > { %5355 = vmatmul.mubr.msk.f32.vlgmr.msra.gmra.mrb[54].mxu1 %vm830_vm11, %v6690_v52 }
0x12a5   : > { %5660 = vmatpush3.bf16.xpose.msk.msra.mxu1 %vm6393_vm12, %v5658_v8  ;;  %5357 = vmatprep.mubr.msk.f32.mxu1 %vm6139_vm0, %v6140_v4 }
0x12a6   : > { %5382 = vmatprep.subr.mxu1 %v6140_v4 }
0x12a8   : > { %5358 = vmatmul.mubr.msk.f32.gmra.mrb[56].mxu1 %vm830_vm11, %v6692_v53 }
0x12a9   : > { %5360 = vmatprep.mubr.msk.f32.mxu1 %vm6139_vm0, %v6140_v4 }
0x12ac   : > { %5361 = vmatmul.mubr.msk.f32.gmra.mrb[58].mxu1 %vm830_vm11, %v6698_v56 }
0x12ad   : > { %5383 = vmatpush3.xpose.msk.msra.mxu1 %vm830_vm11, %v2849_v5  ;;  %5384 = vmatprep.mubr.msk.f32.mxu1 %vm6139_vm0, %v6140_v4 }
0x12ae   : > { %5408 = vmatprep.subr.mxu1 %v6140_v4 }
0x12b0   : > { %5385 = vmatmul.mubr.msk.f32.vlgmr.msra.gmra.mrb[60].mxu1 %vm830_vm11, %v2839_v9 }
0x12b1   : > { %5387 = vmatprep.mubr.msk.f32.mxu1 %vm6139_vm0, %v6140_v4 }
0x12b4   : > { %5388 = vmatmul.mubr.msk.f32.gmra.mrb[62].mxu1 %vm830_vm11, %v2841_v10 }
0x12b5   : > { %5390 = vmatprep.mubr.msk.f32.mxu1 %vm6139_vm0, %v6140_v4 }
0x12b8   : > { %5391 = vmatmul.mubr.msk.f32.gmra.mrb[64].mxu1 %vm830_vm11, %v2843_v11 }
0x12b9   : > { %5410 = vmatprep.mubr.msk.f32.mxu1 %vm6139_vm0, %v6140_v4 }
0x1377   : > { %v2688_v12 = vpop.f32.mrb[54].mxu1 }
0x1378   : > { %v2702_v13 = vmul.f32 0.5, %v2688_v12  ;;  %v5356_v14 = vpop.f32.mrb[55].mxu1 }
0x137a   : > { %v2705_v1 = vsel %vm926_vm13, %v2702_v13, -inf }
0x137b   : > { %2706 = vmax.xlane.f32.xlu1 %v2705_v1  ;;  %v2693_v15 = vpop.f32.mrb[56].mxu1 }
0x137c   : > { %v2703_v16 = vmul.f32 0.5, %v2693_v15  ;;  %v5359_v17 = vpop.f32.mrb[57].mxu1 }
0x137e   : > { %v2708_v18 = vsel %vm926_vm13, %v2703_v16, -inf }
0x137f   : > { %2709 = vmax.xlane.f32.xlu0 %v2708_v18  ;;  %v2698_v19 = vpop.f32.mrb[58].mxu1 }
0x1380   : > { %v2704_v7 = vmul.f32 0.5, %v2698_v19  ;;  %v5362_v20 = vpop.f32.mrb[59].mxu1 }
0x1382   : > { %v2711_v21 = vsel %vm933_vm14, %v2704_v7, -inf }
0x1383   : > { %2712 = vmax.xlane.f32.xlu0 %v2711_v21  ;;  %v2928_v22 = vpop.f32.mrb[60].mxu1 }
0x1384   : > { %v2942_v23 = vmul.f32 0.5, %v2928_v22  ;;  %v5386_v24 = vpop.f32.mrb[61].mxu1 }
0x1386   : > { %v2945_v25 = vsel %vm926_vm13, %v2942_v23, -inf }
0x1387   : > { %2946 = vmax.xlane.f32.xlu1 %v2945_v25  ;;  %v2933_v26 = vpop.f32.mrb[62].mxu1 }
0x1388   : > { %v2943_v28 = vmul.f32 0.5, %v2933_v26  ;;  %v5389_v27 = vpop.f32.mrb[63].mxu1 }
0x138a   : > { %v2948_v30 = vsel %vm926_vm13, %v2943_v28, -inf }
0x138b   : > { %2949 = vmax.xlane.f32.xlu0 %v2948_v30  ;;  %v2938_v32 = vpop.f32.mrb[64].mxu1 }
0x138c   : > { %v2944_v33 = vmul.f32 0.5, %v2938_v32  ;;  %v5392_v34 = vpop.f32.mrb[65].mxu1 }
0x138e   : > { %v2951_v35 = vsel %vm933_vm14, %v2944_v33, -inf }
0x138f   : > { %2952 = vmax.xlane.f32.xlu1 %v2951_v35 }
0x13a0   : > { %5850 = vrot.lane.b32.xlu1 %v6696_v55, %s6145_s9 }
0x1408   : > { %v2707_v36 = vpop.xlane.xlu1 %2706 }
0x1409   : > { %v2714_v39 = vsub.f32 %v2702_v13, %v2707_v36 }
0x140b   : > { %v2717_v29 = vmul.f32 1.442695, %v2714_v39 }
0x140c   : > { %v2710_v41 = vpop.xlane.xlu0 %2709 }
0x140d   : > { %5951 = vpow2.f32 %v2717_v29  ;;  %v2715_v43 = vsub.f32 %v2703_v16, %v2710_v41 }
0x140f   : > { %v2719_v38 = vmul.f32 1.442695, %v2715_v43  ;;  %v2837_v43 = vld [vmem:[#allocation2 + $0x138] sm:$0xf] }
0x1410   : > { %v2713_v31 = vpop.xlane.xlu0 %2712 }
0x1411   : > { %5953 = vpow2.f32 %v2719_v38  ;;  %v2716_v45 = vsub.f32 %v2704_v7, %v2713_v31  ;;  %v3077_v38 = vld [vmem:[#allocation2 + $0x140] sm:$0xf] }
0x1412   : > { %5409 = vmatpush3.msk.msra.mxu1 %vm1311_vm1, %v3077_v38 }
0x1413   : > { %v2721_v48 = vmul.f32 1.442695, %v2716_v45  ;;  %5664 = vmatprep.subr.bf16.mxu1 %v6138_v2 }
0x1414   : > { %v2947_v49 = vpop.xlane.xlu1 %2946 }
0x1415   : > { %5955 = vpow2.f32 %v2721_v48  ;;  %v2954_v0 = vsub.f32 %v2942_v23, %v2947_v49 }
0x1417   : > { %v5952_v50 = vpop.eup %5951  ;;  %v2957_v51 = vmul.f32 1.442695, %v2954_v0 }
0x1418   : > { %v2950_v37 = vpop.xlane.xlu0 %2949  ;;  %v2723_v54 = vsel %vm926_vm13, %v5952_v50, 0.0 }
0x1419   : > { %5957 = vpow2.f32 %v2957_v51  ;;  %v2955_v40 = vsub.f32 %v2943_v28, %v2950_v37  ;;  %2724 = vadd.xlane.f32.xlu0 %v2723_v54 }
0x141b   : > { %v5954_v42 = vpop.eup %5953  ;;  %v2959_v57 = vmul.f32 1.442695, %v2955_v40 }
0x141c   : > { %v2953_v58 = vpop.xlane.xlu1 %2952  ;;  %v2726_v59 = vsel %vm926_vm13, %v5954_v42, 0.0 }
0x141d   : > { %5959 = vpow2.f32 %v2959_v57  ;;  %v2956_v60 = vsub.f32 %v2944_v33, %v2953_v58  ;;  %2727 = vadd.xlane.f32.xlu1 %v2726_v59 }
0x141f   : > { %v5956_v62 = vpop.eup %5955  ;;  %v2961_v63 = vmul.f32 1.442695, %v2956_v60 }
0x1420   : > { %v5851_v3 = vpop.permute.xlu1 %5850  ;;  %v2729_v6 = vsel %vm933_vm14, %v5956_v62, 0.0 }
0x1421   : > { %5961 = vpow2.f32 %v2961_v63  ;;  %v5853_v8 = vunpack.i.h.bf16 %v5851_v3  ;;  %v5852_v5 = vunpack.i.l.bf16 %v5851_v3  ;;  %2730 = vadd.xlane.f32.xlu0 %v2729_v6 }
0x1423   : > { %v5958_v9 = vpop.eup %5957  ;;  %v5655_v10 = vpack.c.bf16 %v5853_v8, %v5852_v5 }
0x1424   : > { %v2963_v11 = vsel %vm926_vm13, %v5958_v9, 0.0 }
0x1425   : > { %5656 = vmatpush3.bf16.msra.mxu0 %v5655_v10  ;;  %2964 = vadd.xlane.f32.xlu1 %v2963_v11 }
0x1426   : > { %5367 = vmatprep.subr.mxu0 %v6140_v4 }
0x1427   : > { %v5960_v12 = vpop.eup %5959 }
0x1428   : > { %v2966_v13 = vsel %vm926_vm13, %v5960_v12, 0.0 }
0x1429   : > { %2967 = vadd.xlane.f32.xlu0 %v2966_v13 }
0x142b   : > { %v5962_v14 = vpop.eup %5961 }
0x142c   : > { %v2969_v1 = vsel %vm933_vm14, %v5962_v14, 0.0 }
0x142d   : > { %2970 = vadd.xlane.f32.xlu0 %v2969_v1 }
0x1436   : > { %5855 = vrot.lane.b32.xlu1 %v6696_v55, %s6146_s10 }
0x143a   : > { %2982 = vrot.lane.b32.xlu1 %v6698_v56, %s6146_s10  ;;  %s6062_s10 = scalar_lea.vmem %s7010_s6, 16 }
0x143b   : > { %p6063_p11 = scmp.ne.s32.totalorder %s7010_s6, %s6062_s10 }
0x143d   : > { %p6064_p1 = pnand %p6063_p11, %p7068_p13 }
0x143e   : > { %5860 = vrot.lane.b32.xlu1 %v6696_v55, %s6147_s11 }
0x143f   : > { %p6065_p6 = pneg %p6064_p1 }
0x1442   : > { %3262 = vrot.lane.b32.xlu1 %v6690_v52, %s6148_s17 }
0x1443   : > { %2742 = vrot.lane.b32.xlu0 %v6698_v56, %s6145_s9  ;;  %s7008_s9 = scalar_lea.hbm %s7053_s3, %s4818_s4 }
0x1446   : > { %3266 = vrot.lane.b32.xlu1 %v6698_v56, %s6148_s17 }
0x1447   : > { %3272 = vrot.lane.b32.xlu0 %v6698_v56, %s6147_s11  ;;  %s6154_s11 = smov [#allocation7]  }
0x144b   : > { %3264 = vrot.lane.b32.xlu0 %v6692_v53, %s6148_s17  ;;  %s6066_s17 = sshll.u32 %s6154_s11, 4  ;;  %s6067_s17 = int_to_ptr.vmem [resolvable:$false] %s6066_s17 }
0x144c   : > { %p6069_p5 = scmp.lt.s32.totalorder %s7010_s6, %s6067_s17 }
0x14a6   : > { %v2725_v15 = vpop.xlane.xlu0 %2724 }
0x14a7   : > { %5963 = vrcp.f32 %v2725_v15 }
0x14aa   : > { %v2728_v16 = vpop.xlane.xlu1 %2727 }
0x14ab   : > { %5965 = vrcp.f32 %v2728_v16 }
0x14ae   : > { %v2731_v17 = vpop.xlane.xlu0 %2730 }
0x14af   : > { %5967 = vrcp.f32 %v2731_v17 }
0x14b1   : > { %v5964_v21 = vpop.eup %5963 }
0x14b2   : > { %v2965_v18 = vpop.xlane.xlu1 %2964  ;;  %v2733_v24 = vmul.f32 %v5964_v21, %v5952_v50 }
0x14b3   : > { %5969 = vrcp.f32 %v2965_v18 }
0x14b5   : > { %v5966_v26 = vpop.eup %5965 }
0x14b6   : > { %v2968_v19 = vpop.xlane.xlu0 %2967  ;;  %v5856_v7 = vpop.permute.xlu1 %5855  ;;  %v2735_v27 = vmul.f32 %v5966_v26, %v5954_v42 }
0x14b7   : > { %v5858_v22 = vunpack.i.h.bf16 %v5856_v7  ;;  %v5857_v23 = vunpack.i.l.bf16 %v5856_v7  ;;  %5971 = vrcp.f32 %v2968_v19 }
0x14b9   : > { %v5662_v28 = vpack.c.bf16 %v5858_v22, %v5857_v23  ;;  %v5968_v30 = vpop.eup %5967 }
0x14ba   : > { %v2971_v20 = vpop.xlane.xlu0 %2970  ;;  %v2983_v32 = vpop.permute.xlu1 %2982  ;;  %v2737_v33 = vmul.f32 %v5968_v30, %v5956_v62 }
0x14bb   : > { %5973 = vrcp.f32 %v2971_v20 }
0x14bd   : > { %v5970_v34 = vpop.eup %5969 }
0x14be   : > { %v2743_v25 = vpop.permute.xlu0 %2742  ;;  %v2973_v35 = vmul.f32 %v5970_v34, %v5958_v9  ;;  %v5861_v49 = vpop.permute.xlu1 %5860 }
0x14bf   : > { %5368 = vmatpush3.msk.msra.mxu0 %vm978_vm15, %v2743_v25  ;;  %v5863_v50 = vunpack.i.h.bf16 %v5861_v49  ;;  %v5862_v51 = vunpack.i.l.bf16 %v5861_v49 }
0x14c0   : > { %5370 = vmatmul.mubr.msk.f32.vlgmr.msra.gmra.mrb[54].mxu0 %vm926_vm13, %v2733_v24  ;;  %5661 = vmatprep.subr.bf16.mxu0 %v6138_v2 }
0x14c1   : > { %5663 = vmatpush3.bf16.msra.mxu0 %v5662_v28  ;;  %5372 = vmatprep.mubr.msk.f32.mxu0 %vm6139_vm0, %v6140_v4  ;;  %v5972_v36 = vpop.eup %5971  ;;  %v5665_v40 = vpack.c.bf16 %v5863_v50, %v5862_v51 }
0x14c2   : > { %5397 = vmatprep.subr.mxu0 %v6140_v4  ;;  %v2975_v39 = vmul.f32 %v5972_v36, %v5960_v12  ;;  %v3273_v62 = vpop.permute.xlu0 %3272  ;;  %v3263_v3 = vpop.permute.xlu1 %3262 }
0x14c4   : > { %5373 = vmatmul.mubr.msk.f32.gmra.mrb[56].mxu0 %vm926_vm13, %v2735_v27 }
0x14c5   : > { %5398 = vmatpush3.msk.msra.mxu0 %vm978_vm15, %v2983_v32  ;;  %5375 = vmatprep.mubr.msk.f32.mxu0 %vm6139_vm0, %v6140_v4  ;;  %v5974_v29 = vpop.eup %5973 }
0x14c6   : > { %5419 = vmatprep.subr.mxu0 %v6140_v4  ;;  %v2977_v41 = vmul.f32 %v5974_v29, %v5962_v14  ;;  %v3265_v6 = vpop.permute.xlu0 %3264  ;;  %v3267_v8 = vpop.permute.xlu1 %3266 }
0x14c8   : > { %5376 = vmatmul.mubr.msk.f32.gmra.mrb[58].mxu0 %vm926_vm13, %v2737_v33 }
0x14c9   : > { %5399 = vmatprep.mubr.msk.f32.mxu0 %vm6139_vm0, %v6140_v4 }
0x14cc   : > { %5400 = vmatmul.mubr.msk.f32.vlgmr.msra.gmra.mrb[60].mxu0 %vm926_vm13, %v2973_v35 }
0x14cd   : > { %5402 = vmatprep.mubr.msk.f32.mxu0 %vm6139_vm0, %v6140_v4  ;;  %5420 = vmatpush3.msk.msra.mxu0 %vm1311_vm1, %v2837_v43 }
0x14ce   : > { %5668 = vmatprep.subr.bf16.mxu0 %v6138_v2 }
0x14d0   : > { %5403 = vmatmul.mubr.msk.f32.gmra.mrb[62].mxu0 %vm926_vm13, %v2975_v39 }
0x14d1   : > { %5405 = vmatprep.mubr.msk.f32.mxu0 %vm6139_vm0, %v6140_v4 }
0x14d4   : > { %5406 = vmatmul.mubr.msk.f32.gmra.mrb[64].mxu0 %vm926_vm13, %v2977_v41 }
0x14d5   : > { %5421 = vmatprep.mubr.msk.f32.mxu0 %vm6139_vm0, %v6140_v4 }
0x1593   : > { %v2823_v31 = vpop.f32.mrb[54].mxu0 }
0x1594   : > { %v5371_v45 = vpop.f32.mrb[55].mxu0  ;;  %5422 = vmatmul.mubr.msk.f32.vlgmr.msra.gmra.mrb[66].mxu0 %vm830_vm11, %v2823_v31 }
0x1595   : > { %5424 = vmatprep.mubr.msk.f32.mxu0 %vm6139_vm0, %v6140_v4 }
0x1597   : > { %v2828_v48 = vpop.f32.mrb[56].mxu0 }
0x1598   : > { %v5374_v0 = vpop.f32.mrb[57].mxu0  ;;  %5425 = vmatmul.mubr.msk.f32.gmra.mrb[68].mxu0 %vm830_vm11, %v2828_v48 }
0x1599   : > { %5427 = vmatprep.mubr.msk.f32.mxu0 %vm6139_vm0, %v6140_v4 }
0x159b   : > { %v2833_v37 = vpop.f32.mrb[58].mxu0 }
0x159c   : > { %v5377_v54 = vpop.f32.mrb[59].mxu0  ;;  %5428 = vmatmul.mubr.msk.f32.gmra.mrb[70].mxu0 %vm830_vm11, %v2833_v37 }
0x159d   : > { %5451 = vmatprep.mubr.msk.f32.mxu0 %vm6139_vm0, %v6140_v4 }
0x159f   : > { %v3063_v42 = vpop.f32.mrb[60].mxu0 }
0x15a0   : > { %v5401_v57 = vpop.f32.mrb[61].mxu0  ;;  %5411 = vmatmul.mubr.msk.f32.vlgmr.msra.gmra.mrb[66].mxu1 %vm830_vm11, %v3063_v42 }
0x15a1   : > { %5667 = vmatpush3.bf16.xpose.msk.msra.mxu1 %vm6393_vm12, %v5665_v40  ;;  %5413 = vmatprep.mubr.msk.f32.mxu1 %vm6139_vm0, %v6140_v4 }
0x15a2   : > { %5434 = vmatprep.subr.mxu1 %v6140_v4 }
0x15a3   : > { %v3068_v58 = vpop.f32.mrb[62].mxu0 }
0x15a4   : > { %v5404_v59 = vpop.f32.mrb[63].mxu0  ;;  %5414 = vmatmul.mubr.msk.f32.gmra.mrb[68].mxu1 %vm830_vm11, %v3068_v58 }
0x15a5   : > { %5416 = vmatprep.mubr.msk.f32.mxu1 %vm6139_vm0, %v6140_v4 }
0x15a7   : > { %v3073_v60 = vpop.f32.mrb[64].mxu0 }
0x15a8   : > { %v5407_v63 = vpop.f32.mrb[65].mxu0  ;;  %5417 = vmatmul.mubr.msk.f32.gmra.mrb[70].mxu1 %vm830_vm11, %v3073_v60 }
0x15a9   : > { %5435 = vmatpush3.xpose.msk.msra.mxu1 %vm830_vm11, %v3273_v62  ;;  %5436 = vmatprep.mubr.msk.f32.mxu1 %vm6139_vm0, %v6140_v4 }
0x15aa   : > { %5460 = vmatprep.subr.mxu1 %v6140_v4 }
0x15ac   : > { %5437 = vmatmul.mubr.msk.f32.vlgmr.msra.gmra.mrb[72].mxu1 %vm830_vm11, %v3263_v3 }
0x15ad   : > { %5439 = vmatprep.mubr.msk.f32.mxu1 %vm6139_vm0, %v6140_v4 }
0x15b0   : > { %5440 = vmatmul.mubr.msk.f32.gmra.mrb[74].mxu1 %vm830_vm11, %v3265_v6 }
0x15b1   : > { %5442 = vmatprep.mubr.msk.f32.mxu1 %vm6139_vm0, %v6140_v4 }
0x15b4   : > { %5443 = vmatmul.mubr.msk.f32.gmra.mrb[76].mxu1 %vm830_vm11, %v3267_v8 }
0x15b5   : > { %5462 = vmatprep.mubr.msk.f32.mxu1 %vm6139_vm0, %v6140_v4 }
0x1667   : > { %v3248_v5 = vpop.f32.mrb[66].mxu0 }
0x1668   : > { %v5423_v9 = vpop.f32.mrb[67].mxu0 }
0x166b   : > { %v3253_v10 = vpop.f32.mrb[68].mxu0 }
0x166c   : > { %v5426_v11 = vpop.f32.mrb[69].mxu0 }
0x166f   : > { %v3258_v12 = vpop.f32.mrb[70].mxu0 }
0x1670   : > { %v5429_v13 = vpop.f32.mrb[71].mxu0 }
0x1673   : > { %v3156_v14 = vpop.f32.mrb[66].mxu1 }
0x1674   : > { %v6835_v1 = vadd.f32 %v3248_v5, %v3156_v14  ;;  %v5412_v15 = vpop.f32.mrb[67].mxu1 }
0x1675   : > { %v3501_v15 = vld [vmem:[#allocation2 + $0x148] sm:$0xf] }
0x1676   : > { %5461 = vmatpush3.msk.msra.mxu1 %vm1311_vm1, %v3501_v15 }
0x1677   : > { %v3161_v16 = vpop.f32.mrb[68].mxu1  ;;  %5675 = vmatprep.subr.bf16.mxu1 %v6138_v2 }
0x1678   : > { %v6837_v17 = vadd.f32 %v3253_v10, %v3161_v16  ;;  %v5415_v18 = vpop.f32.mrb[69].mxu1 }
0x167b   : > { %v3166_v19 = vpop.f32.mrb[70].mxu1 }
0x167c   : > { %v6839_v7 = vadd.f32 %v3258_v12, %v3166_v19  ;;  %v5418_v20 = vpop.f32.mrb[71].mxu1 }
0x167f   : > { %v3352_v21 = vpop.f32.mrb[72].mxu1 }
0x1680   : > { %v3366_v22 = vmul.f32 0.5, %v3352_v21  ;;  %v5438_v23 = vpop.f32.mrb[73].mxu1 }
0x1682   : > { %v3369_v24 = vsel %vm926_vm13, %v3366_v22, -inf }
0x1683   : > { %3370 = vmax.xlane.f32.xlu0 %v3369_v24  ;;  %v3357_v25 = vpop.f32.mrb[74].mxu1 }
0x1684   : > { %v3367_v26 = vmul.f32 0.5, %v3357_v25  ;;  %v5441_v28 = vpop.f32.mrb[75].mxu1 }
0x1686   : > { %v3372_v27 = vsel %vm926_vm13, %v3367_v26, -inf }
0x1687   : > { %3373 = vmax.xlane.f32.xlu1 %v3372_v27  ;;  %v3362_v30 = vpop.f32.mrb[76].mxu1 }
0x1688   : > { %v3368_v32 = vmul.f32 0.5, %v3362_v30  ;;  %v5444_v33 = vpop.f32.mrb[77].mxu1 }
0x168a   : > { %v3375_v34 = vsel %vm933_vm14, %v3368_v32, -inf }
0x168b   : > { %3376 = vmax.xlane.f32.xlu0 %v3375_v34 }
0x1698   : > { %5865 = vrot.lane.b32.xlu1 %v6696_v55, %s6149_s19 }
0x169c   : > { %5870 = vrot.lane.b32.xlu1 %v6696_v55, %s6150_s20 }
0x1710   : > { %v3371_v35 = vpop.xlane.xlu0 %3370 }
0x1711   : > { %v3378_v36 = vsub.f32 %v3366_v22, %v3371_v35 }
0x1713   : > { %v3381_v39 = vmul.f32 1.442695, %v3378_v36 }
0x1714   : > { %v3374_v29 = vpop.xlane.xlu1 %3373 }
0x1715   : > { %5975 = vpow2.f32 %v3381_v39  ;;  %v3379_v41 = vsub.f32 %v3367_v26, %v3374_v29 }
0x1717   : > { %v3383_v43 = vmul.f32 1.442695, %v3379_v41 }
0x1718   : > { %v5866_v38 = vpop.permute.xlu1 %5865  ;;  %v3377_v37 = vpop.xlane.xlu0 %3376 }
0x1719   : > { %5977 = vpow2.f32 %v3383_v43  ;;  %v5868_v31 = vunpack.i.h.bf16 %v5866_v38  ;;  %v5867_v45 = vunpack.i.l.bf16 %v5866_v38  ;;  %v3380_v54 = vsub.f32 %v3368_v32, %v3377_v37 }
0x171b   : > { %v5669_v48 = vpack.c.bf16 %v5868_v31, %v5867_v45  ;;  %v3385_v40 = vmul.f32 1.442695, %v3380_v54 }
0x171c   : > { %v5871_v58 = vpop.permute.xlu1 %5870 }
0x171d   : > { %5670 = vmatpush3.bf16.msra.mxu0 %v5669_v48  ;;  %5979 = vpow2.f32 %v3385_v40  ;;  %v5872_v63 = vunpack.i.l.bf16 %v5871_v58 }
0x171e   : > { %5449 = vmatprep.subr.mxu0 %v6140_v4 }
0x171f   : > { %v5976_v49 = vpop.eup %5975 }
0x1720   : > { %v3387_v0 = vsel %vm926_vm13, %v5976_v49, 0.0 }
0x1721   : > { %3388 = vadd.xlane.f32.xlu0 %v3387_v0 }
0x1723   : > { %v5978_v50 = vpop.eup %5977 }
0x1724   : > { %v3390_v51 = vsel %vm926_vm13, %v5978_v50, 0.0 }
0x1725   : > { %3391 = vadd.xlane.f32.xlu1 %v3390_v51 }
0x1727   : > { %v5980_v42 = vpop.eup %5979 }
0x1728   : > { %v3393_v57 = vsel %vm933_vm14, %v5980_v42, 0.0 }
0x1736   : > { %3607 = vrot.lane.b32.xlu1 %v6698_v56, %s6150_s20 }
0x1737   : > { %3406 = vrot.lane.b32.xlu0 %v6698_v56, %s6149_s19  ;;  %s6068_s19 = scalar_lea.vmem %s6067_s17, 32 }
0x1738   : > { %p6070_p9 = scmp.lt.s32.totalorder %s6068_s19, %s6062_s10 }
0x173a   : > { %3599 = vrot.lane.b32.xlu1 %v6692_v53, %s6151_s25  ;;  %v5873_v53 = vunpack.i.h.bf16 %v5871_v58  ;;  %p6071_p10 = por %p6070_p9, %p6069_p5 }
0x173c   : > { %v5672_v8 = vpack.c.bf16 %v5873_v53, %v5872_v63  ;;  %p6072_p2 = pnand %p6071_p10, %p6065_p6 }
0x1756   : > { %3394 = vadd.xlane.f32.xlu0 %v3393_v57 }
0x176c   : > { %3597 = vrot.lane.b32.xlu0 %v6690_v52, %s6151_s25 }
0x1770   : > { %3601 = vrot.lane.b32.xlu0 %v6698_v56, %s6151_s25 }
0x17ae   : > { %v3389_v59 = vpop.xlane.xlu0 %3388 }
0x17af   : > { %5981 = vrcp.f32 %v3389_v59 }
0x17b2   : > { %v3392_v60 = vpop.xlane.xlu1 %3391  ;;  %v3407_v62 = vpop.permute.xlu0 %3406 }
0x17b3   : > { %5983 = vrcp.f32 %v3392_v60  ;;  %5450 = vmatpush3.msk.msra.mxu0 %vm978_vm15, %v3407_v62 }
0x17b4   : > { %5671 = vmatprep.subr.bf16.mxu0 %v6138_v2 }
0x17b6   : > { %v3608_v9 = vpop.permute.xlu1 %3607 }
0x17b9   : > { %v5982_v3 = vpop.eup %5981 }
0x17ba   : > { %v3397_v6 = vmul.f32 %v5982_v3, %v5976_v49  ;;  %v3600_v13 = vpop.permute.xlu1 %3599 }
0x17bc   : > { %5452 = vmatmul.mubr.msk.f32.vlgmr.msra.gmra.mrb[72].mxu0 %vm926_vm13, %v3397_v6 }
0x17bd   : > { %v5984_v52 = vpop.eup %5983  ;;  %5674 = vmatpush3.bf16.xpose.msk.msra.mxu0 %vm6393_vm12, %v5672_v8  ;;  %5454 = vmatprep.mubr.msk.f32.mxu0 %vm6139_vm0, %v6140_v4 }
0x17be   : > { %v3399_v5 = vmul.f32 %v5984_v52, %v5978_v50  ;;  %5475 = vmatprep.subr.mxu0 %v6140_v4 }
0x17c0   : > { %5455 = vmatmul.mubr.msk.f32.gmra.mrb[74].mxu0 %vm926_vm13, %v3399_v5 }
0x17c1   : > { %5457 = vmatprep.mubr.msk.f32.mxu0 %vm6139_vm0, %v6140_v4 }
0x17c5   : > { %5476 = vmatpush3.xpose.msk.msra.mxu0 %vm830_vm11, %v3608_v9 }
0x17c6   : > { %5501 = vmatprep.subr.mxu0 %v6140_v4 }
0x17e3   : > { %v3395_v10 = vpop.xlane.xlu0 %3394 }
0x17e4   : > { %5985 = vrcp.f32 %v3395_v10 }
0x17e7   : > { %v3598_v12 = vpop.permute.xlu0 %3597 }
0x17eb   : > { %v3602_v14 = vpop.permute.xlu0 %3601 }
0x17ee   : > { %v5986_v47 = vpop.eup %5985 }
0x17ef   : > { %v3401_v11 = vmul.f32 %v5986_v47, %v5980_v42 }
0x17f1   : > { %5458 = vmatmul.mubr.msk.f32.gmra.mrb[76].mxu0 %vm926_vm13, %v3401_v11 }
0x17f2   : > { %5477 = vmatprep.mubr.msk.f32.mxu0 %vm6139_vm0, %v6140_v4 }
0x17f5   : > { %5478 = vmatmul.mubr.msk.f32.vlgmr.msra.gmra.mrb[78].mxu0 %vm830_vm11, %v3598_v12 }
0x17f6   : > { %5480 = vmatprep.mubr.msk.f32.mxu0 %vm6139_vm0, %v6140_v4 }
0x17f9   : > { %5481 = vmatmul.mubr.msk.f32.gmra.mrb[80].mxu0 %vm830_vm11, %v3600_v13 }
0x17fa   : > { %5483 = vmatprep.mubr.msk.f32.mxu0 %vm6139_vm0, %v6140_v4 }
0x17fd   : > { %5484 = vmatmul.mubr.msk.f32.gmra.mrb[82].mxu0 %vm830_vm11, %v3602_v14 }
0x17fe   : > { %5503 = vmatprep.mubr.msk.f32.mxu0 %vm6139_vm0, %v6140_v4 }
0x188f   : > { %v3487_v16 = vpop.f32.mrb[72].mxu0 }
0x1890   : > { %v5453_v18 = vpop.f32.mrb[73].mxu0  ;;  %5463 = vmatmul.mubr.msk.f32.vlgmr.msra.gmra.mrb[78].mxu1 %vm830_vm11, %v3487_v16 }
0x1891   : > { %5465 = vmatprep.mubr.msk.f32.mxu1 %vm6139_vm0, %v6140_v4 }
0x1893   : > { %v3492_v19 = vpop.f32.mrb[74].mxu0 }
0x1894   : > { %v5456_v20 = vpop.f32.mrb[75].mxu0  ;;  %5466 = vmatmul.mubr.msk.f32.gmra.mrb[80].mxu1 %vm830_vm11, %v3492_v19 }
0x1895   : > { %5468 = vmatprep.mubr.msk.f32.mxu1 %vm6139_vm0, %v6140_v4 }
0x18c4   : > { %v3497_v21 = vpop.f32.mrb[76].mxu0 }
0x18c5   : > { %v5459_v22 = vpop.f32.mrb[77].mxu0  ;;  %5469 = vmatmul.mubr.msk.f32.gmra.mrb[82].mxu1 %vm830_vm11, %v3497_v21  ;;  %v4802_v21 = vld [vmem:[#allocation2 + $0x18a] ss:$0 sm:$0xff] }
0x18c6   : > { %5492 = vmatprep.mubr.msk.f32.mxu1 %vm6139_vm0, %v6140_v4 }
0x18c8   : > { %v3687_v23 = vpop.f32.mrb[78].mxu0 }
0x18c9   : > { %v3701_v24 = vmul.f32 0.5, %v3687_v23  ;;  %v5479_v25 = vpop.f32.mrb[79].mxu0 }
0x18cb   : > { %v3704_v26 = vsel %vm926_vm13, %v3701_v24, -inf }
0x18cc   : > { %3705 = vmax.xlane.f32.xlu1 %v3704_v26  ;;  %v3692_v28 = vpop.f32.mrb[80].mxu0 }
0x18cd   : > { %v3702_v27 = vmul.f32 0.5, %v3692_v28  ;;  %v5482_v30 = vpop.f32.mrb[81].mxu0 }
0x18cf   : > { %v3707_v32 = vsel %vm926_vm13, %v3702_v27, -inf }
0x18d0   : > { %3708 = vmax.xlane.f32.xlu0 %v3707_v32  ;;  %v3697_v33 = vpop.f32.mrb[82].mxu0 }
0x18d1   : > { %v3703_v34 = vmul.f32 0.5, %v3697_v33  ;;  %v5485_v35 = vpop.f32.mrb[83].mxu0 }
0x18d3   : > { %v3710_v36 = vsel %vm933_vm14, %v3703_v34, -inf }
0x18d4   : > { %3711 = vmax.xlane.f32.xlu0 %v3710_v36 }
0x1959   : > { %v3706_v39 = vpop.xlane.xlu1 %3705 }
0x195a   : > { %v3713_v29 = vsub.f32 %v3701_v24, %v3706_v39 }
0x195c   : > { %v3716_v41 = vmul.f32 1.442695, %v3713_v29 }
0x195d   : > { %v3709_v43 = vpop.xlane.xlu0 %3708 }
0x195e   : > { %5987 = vpow2.f32 %v3716_v41  ;;  %v3714_v38 = vsub.f32 %v3702_v27, %v3709_v43 }
0x1960   : > { %v3718_v31 = vmul.f32 1.442695, %v3714_v38 }
0x1961   : > { %v3712_v45 = vpop.xlane.xlu0 %3711 }
0x1962   : > { %5989 = vpow2.f32 %v3718_v31  ;;  %v3715_v48 = vsub.f32 %v3703_v34, %v3712_v45 }
0x1963   : > { %v3580_v49 = vpop.f32.mrb[78].mxu1 }
0x1964   : > { %v3720_v0 = vmul.f32 1.442695, %v3715_v48  ;;  %v6902_v50 = vadd.f32 %v3580_v49, %v6835_v1  ;;  %v5464_v51 = vpop.f32.mrb[79].mxu1  ;;  %v3836_v1 = vld [vmem:[#allocation2 + $0x150] sm:$0xf] }
0x1965   : > { %5502 = vmatpush3.msk.msra.mxu0 %vm1311_vm1, %v3836_v1 }
0x1966   : > { %5991 = vpow2.f32 %v3720_v0  ;;  %5681 = vmatprep.subr.bf16.mxu0 %v6138_v2 }
0x1967   : > { %v3585_v37 = vpop.f32.mrb[80].mxu1 }
0x1968   : > { %v5988_v54 = vpop.eup %5987  ;;  %v6905_v40 = vadd.f32 %v3585_v37, %v6837_v17  ;;  %v5467_v42 = vpop.f32.mrb[81].mxu1 }
0x1969   : > { %v3722_v57 = vsel %vm926_vm13, %v5988_v54, 0.0 }
0x196a   : > { %3723 = vadd.xlane.f32.xlu1 %v3722_v57 }
0x196c   : > { %v5990_v58 = vpop.eup %5989 }
0x196d   : > { %v3725_v59 = vsel %vm926_vm13, %v5990_v58, 0.0 }
0x196e   : > { %3726 = vadd.xlane.f32.xlu0 %v3725_v59  ;;  %v2495_v59 = vld [vmem:[#allocation2 + $0x160] sm:$0xff] }
0x1970   : > { %v5992_v60 = vpop.eup %5991 }
0x1971   : > { %v3728_v62 = vsel %vm933_vm14, %v5992_v60, 0.0 }
0x1972   : > { %3729 = vadd.xlane.f32.xlu1 %v3728_v62 }
0x1983   : > { %3741 = vrot.lane.b32.xlu1 %v6698_v56, %s6152_s27 }
0x1984   : > { %5875 = vrot.lane.b32.xlu0 %v6696_v55, %s6152_s27 }
0x1998   : > { %v3590_v17 = vpop.f32.mrb[82].mxu1 }
0x1999   : > { %v3596_v53 = vadd.f32 %v3590_v17, %v6839_v7  ;;  %v5470_v63 = vpop.f32.mrb[83].mxu1 }
0x19f7   : > { %v3724_v3 = vpop.xlane.xlu1 %3723 }
0x19f8   : > { %5993 = vrcp.f32 %v3724_v3 }
0x19fb   : > { %v3727_v6 = vpop.xlane.xlu0 %3726 }
0x19fc   : > { %5995 = vrcp.f32 %v3727_v6 }
0x19ff   : > { %v3730_v8 = vpop.xlane.xlu1 %3729  ;;  %v5876_v52 = vpop.permute.xlu0 %5875 }
0x1a00   : > { %v5878_v5 = vunpack.i.h.bf16 %v5876_v52  ;;  %v5877_v56 = vunpack.i.l.bf16 %v5876_v52  ;;  %5997 = vrcp.f32 %v3730_v8 }
0x1a02   : > { %v5676_v9 = vpack.c.bf16 %v5878_v5, %v5877_v56  ;;  %v5994_v55 = vpop.eup %5993  ;;  %v4803_v56 = vld [vmem:[#allocation2 + $0x18b] ss:$0 sm:$0xff] }
0x1a03   : > { %v3732_v10 = vmul.f32 %v5994_v55, %v5988_v54  ;;  %v3742_v47 = vpop.permute.xlu1 %3741  ;;  %v4804_v55 = vld [vmem:[#allocation2 + $0x18c] ss:$0 sm:$0xff] }
0x1a04   : > { %5677 = vmatpush3.bf16.msra.mxu1 %v5676_v9 }
0x1a05   : > { %5490 = vmatprep.subr.mxu1 %v6140_v4 }
0x1a06   : > { %v5996_v11 = vpop.eup %5995 }
0x1a07   : > { %v3734_v7 = vmul.f32 %v5996_v11, %v5990_v58  ;;  %v2494_v58 = vld [vmem:[#allocation2 + $0x158] sm:$0xff] }
0x1a08   : > { %5491 = vmatpush3.msk.msra.mxu1 %vm978_vm15, %v3742_v47 }
0x1a09   : > { %5493 = vmatmul.mubr.msk.f32.vlgmr.msra.gmra.mrb[84].mxu1 %vm926_vm13, %v3732_v10  ;;  %5678 = vmatprep.subr.bf16.mxu1 %v6138_v2 }
0x1a0a   : > { %5495 = vmatprep.mubr.msk.f32.mxu1 %vm6139_vm0, %v6140_v4  ;;  %v5998_v12 = vpop.eup %5997 }
0x1a0b   : > { %v3736_v13 = vmul.f32 %v5998_v12, %v5992_v60  ;;  %v5679_v60 = vpack.c.bf16 %v2495_v59, %v2494_v58 }
0x1a0d   : > { %5496 = vmatmul.mubr.msk.f32.gmra.mrb[86].mxu1 %vm926_vm13, %v3734_v7 }
0x1a0e   : > { %5498 = vmatprep.mubr.msk.f32.mxu1 %vm6139_vm0, %v6140_v4  ;;  %5680 = vmatpush3.bf16.msra.mxu1 %v5679_v60 }
0x1a0f   : > { %5687 = vmatprep.subr.bf16.mxu1 %v6138_v2 }
0x1a11   : > { %5499 = vmatmul.mubr.msk.f32.gmra.mrb[88].mxu1 %vm926_vm13, %v3736_v13 }
0x1a12   : > { %5516 = vmatprep.mubr.msk.f32.mxu1 %vm6139_vm0, %v6140_v4 }
0x1adc   : > { %v3822_v14 = vpop.f32.mrb[84].mxu1 }
0x1add   : > { %v5494_v15 = vpop.f32.mrb[85].mxu1  ;;  %5504 = vmatmul.mubr.msk.f32.vlgmr.msra.gmra.mrb[84].mxu0 %vm830_vm11, %v3822_v14 }
0x1ade   : > { %5506 = vmatprep.mubr.msk.f32.mxu0 %vm6139_vm0, %v6140_v4 }
0x1ae0   : > { %v3827_v16 = vpop.f32.mrb[86].mxu1 }
0x1ae1   : > { %v5497_v18 = vpop.f32.mrb[87].mxu1  ;;  %5507 = vmatmul.mubr.msk.f32.gmra.mrb[86].mxu0 %vm830_vm11, %v3827_v16 }
0x1ae2   : > { %5509 = vmatprep.mubr.msk.f32.mxu0 %vm6139_vm0, %v6140_v4 }
0x1ae4   : > { %v3832_v19 = vpop.f32.mrb[88].mxu1 }
0x1ae5   : > { %v5500_v20 = vpop.f32.mrb[89].mxu1  ;;  %5510 = vmatmul.mubr.msk.f32.gmra.mrb[88].mxu0 %vm830_vm11, %v3832_v19  ;;  %v2496_v19 = vld [vmem:[#allocation2 + $0x168] sm:$0xff] }
0x1ae6   : > { %5533 = vmatprep.mubr.msk.f32.mxu0 %vm6139_vm0, %v6140_v4  ;;  %v2497_v20 = vld [vmem:[#allocation2 + $0x170] sm:$0xff] }
0x1bb0   : > { %v3915_v22 = vpop.f32.mrb[84].mxu0 }
0x1bb1   : > { %v3929_v23 = vadd.f32 %v3915_v22, %v6902_v50  ;;  %v5505_v24 = vpop.f32.mrb[85].mxu0  ;;  %v2498_v22 = vld [vmem:[#allocation2 + $0x178] sm:$0xff] }
0x1bb3   : > { %v3936_v25 = vadd.f32 %v4802_v21, %v3929_v23  ;;  %v2499_v23 = vld [vmem:[#allocation2 + $0x180] sm:$0xff] }
0x1bb4   : > { %v3920_v26 = vpop.f32.mrb[86].mxu0  ;;  %v5685_v24 = vpack.c.bf16 %v2499_v23, %v2498_v22 }
0x1bb5   : > { %v3930_v28 = vadd.f32 %v3920_v26, %v6905_v40  ;;  %v5508_v27 = vpop.f32.mrb[87].mxu0  ;;  %v3939_v30 = vadd.f32 %v3936_v25, %v6672_v44  ;;  %v4805_v25 = vld [vmem:[#allocation2 + $0x189] ss:$0 sm:$0xff] }
0x1bb7   : > { %v3937_v32 = vadd.f32 %v4802_v21, %v3930_v28  ;;  %v3942_v33 = vsel %vm216_vm2, %v3939_v30, 0.0 }
0x1bb8   : > { %3943 = vadd.xlane.f32.xlu1 %v3942_v33  ;;  %v3925_v34 = vpop.f32.mrb[88].mxu0 }
0x1bb9   : > { %v3931_v35 = vadd.f32 %v3925_v34, %v3596_v53  ;;  %v5511_v36 = vpop.f32.mrb[89].mxu0  ;;  %v3940_v39 = vadd.f32 %v3937_v32, %v6678_v46 }
0x1bbb   : > { %v3938_v29 = vadd.f32 %v4802_v21, %v3931_v35  ;;  %v3945_v41 = vsel %vm216_vm2, %v3940_v39, 0.0  ;;  %v5682_v21 = vpack.c.bf16 %v2497_v20, %v2496_v19 }
0x1bbc   : > { %3946 = vadd.xlane.f32.xlu0 %v3945_v41 }
0x1bbd   : > { %v3941_v43 = vadd.f32 %v3938_v29, %v6684_v61  ;;  %5683 = vmatpush3.bf16.msra.mxu0 %v5682_v21 }
0x1bbe   : > { %5684 = vmatprep.subr.bf16.mxu0 %v6138_v2 }
0x1bbf   : > { %v3948_v38 = vsel %vm2173_vm3, %v3941_v43, 0.0 }
0x1bc0   : > { %3949 = vadd.xlane.f32.xlu0 %v3948_v38 }
0x1bc1   : > { %5686 = vmatpush3.bf16.msra.mxu0 %v5685_v24 }
0x1bc2   : > { %5690 = vmatprep.subr.bf16.mxu0 %v6138_v2 }
0x1c45   : > { %v3944_v31 = vpop.xlane.xlu1 %3943 }
0x1c46   : > { %v3951_v44 = vmul.f32 0.0625, %v3944_v31 }
0x1c48   : > { %v3954_v45 = vsub.f32 %v3939_v30, %v3951_v44 }
0x1c49   : > { %v3947_v48 = vpop.xlane.xlu0 %3946 }
0x1c4a   : > { %v3952_v49 = vmul.f32 0.0625, %v3947_v48  ;;  %v3957_v0 = vmul.f32 %v3954_v45, %v3954_v45 }
0x1c4c   : > { %v3955_v50 = vsub.f32 %v3940_v39, %v3952_v49  ;;  %v3960_v51 = vsel %vm216_vm2, %v3957_v0, 0.0 }
0x1c4d   : > { %3961 = vadd.xlane.f32.xlu1 %v3960_v51  ;;  %v3950_v46 = vpop.xlane.xlu0 %3949 }
0x1c4e   : > { %v3953_v37 = vmul.f32 0.0625, %v3950_v46  ;;  %v3958_v54 = vmul.f32 %v3955_v50, %v3955_v50 }
0x1c50   : > { %v3956_v40 = vsub.f32 %v3941_v43, %v3953_v37  ;;  %v3963_v42 = vsel %vm216_vm2, %v3958_v54, 0.0 }
0x1c51   : > { %3964 = vadd.xlane.f32.xlu0 %v3963_v42 }
0x1c52   : > { %v3959_v61 = vmul.f32 %v3956_v40, %v3956_v40 }
0x1c54   : > { %v3966_v57 = vsel %vm2173_vm3, %v3959_v61, 0.0 }
0x1c55   : > { %3967 = vadd.xlane.f32.xlu1 %v3966_v57 }
0x1cda   : > { %v3962_v62 = vpop.xlane.xlu1 %3961 }
0x1cdb   : > { %v3969_v1 = vmul.f32 0.0625, %v3962_v62 }
0x1cdd   : > { %v3972_v17 = vadd.f32 1e-05, %v3969_v1 }
0x1cde   : > { %v3965_v53 = vpop.xlane.xlu0 %3964 }
0x1cdf   : > { %5999 = vrsqrt.f32 %v3972_v17  ;;  %v3970_v63 = vmul.f32 0.0625, %v3965_v53 }
0x1ce1   : > { %v3973_v3 = vadd.f32 1e-05, %v3970_v63  ;;  %v4809_v63 = vld [vmem:[#allocation2 + $0x18d] ss:$0 sm:$0xff] }
0x1ce2   : > { %v3968_v6 = vpop.xlane.xlu1 %3967 }
0x1ce3   : > { %6001 = vrsqrt.f32 %v3973_v3  ;;  %v3971_v8 = vmul.f32 0.0625, %v3968_v6 }
0x1ce5   : > { %v3974_v52 = vadd.f32 1e-05, %v3971_v8 }
0x1ce7   : > { %6003 = vrsqrt.f32 %v3974_v52 }
0x1ce9   : > { %v6000_v5 = vpop.eup %5999 }
0x1cea   : > { %v3978_v9 = vmul.f32 %v6000_v5, %v3954_v45 }
0x1cec   : > { %v3985_v10 = vmul.f32 %v4803_v56, %v3978_v9 }
0x1ced   : > { %v6002_v47 = vpop.eup %6001 }
0x1cee   : > { %v6950_v11 = vadd.f32 %v4804_v55, %v3985_v10  ;;  %v3979_v7 = vmul.f32 %v6002_v47, %v3955_v50 }
0x1cf0   : > { %5517 = vmatmul.mubr.msk.f32.vlgmr.msra.gmra.mrb[90].mxu1 %vm216_vm2, %v6950_v11  ;;  %v3986_v12 = vmul.f32 %v4803_v56, %v3979_v7 }
0x1cf1   : > { %v6004_v13 = vpop.eup %6003  ;;  %5519 = vmatprep.mubr.msk.f32.mxu1 %vm6139_vm0, %v6140_v4 }
0x1cf2   : > { %v6956_v14 = vadd.f32 %v4804_v55, %v3986_v12  ;;  %v3980_v15 = vmul.f32 %v6004_v13, %v3956_v40 }
0x1cf4   : > { %5520 = vmatmul.mubr.msk.f32.gmra.mrb[92].mxu1 %vm216_vm2, %v6956_v14  ;;  %v3987_v16 = vmul.f32 %v4803_v56, %v3980_v15 }
0x1cf5   : > { %5522 = vmatprep.mubr.msk.f32.mxu1 %vm6139_vm0, %v6140_v4 }
0x1cf6   : > { %v6962_v18 = vadd.f32 %v4804_v55, %v3987_v16 }
0x1cf8   : > { %5523 = vmatmul.mubr.msk.f32.gmra.mrb[94].mxu1 %vm216_vm2, %v6962_v18 }
0x1cf9   : > { %5546 = vmatprep.mubr.msk.f32.mxu1 %vm6139_vm0, %v6140_v4 }
0x1dc3   : > { %v4074_v26 = vpop.f32.mrb[90].mxu1 }
0x1dc4   : > { %v4075_v28 = vadd.f32 %v4805_v25, %v4074_v26  ;;  %v5518_v27 = vpop.f32.mrb[91].mxu1 }
0x1dc6   : > { %v4088_v30 = vmul.f32 %v4075_v28, %v4075_v28 }
0x1dc7   : > { %v4079_v32 = vpop.f32.mrb[92].mxu1 }
0x1dc8   : > { %v4091_v33 = vmul.f32 %v4088_v30, %v4075_v28  ;;  %v4080_v34 = vadd.f32 %v4805_v25, %v4079_v32  ;;  %v5521_v35 = vpop.f32.mrb[93].mxu1 }
0x1dca   : > { %v4094_v36 = vmul.f32 0.044715, %v4091_v33  ;;  %v4089_v39 = vmul.f32 %v4080_v34, %v4080_v34  ;;  %v4289_v33 = vld [vmem:[#allocation2 + $0x190] sm:$0xff] }
0x1dcb   : > { %v4084_v29 = vpop.f32.mrb[94].mxu1 }
0x1dcc   : > { %v4097_v41 = vadd.f32 %v4094_v36, %v4075_v28  ;;  %v4092_v43 = vmul.f32 %v4089_v39, %v4080_v34  ;;  %v4085_v38 = vadd.f32 %v4805_v25, %v4084_v29  ;;  %v5524_v31 = vpop.f32.mrb[95].mxu1 }
0x1dce   : > { %v4100_v44 = vmul.f32 0.7978846, %v4097_v41  ;;  %v4095_v45 = vmul.f32 0.044715, %v4092_v43  ;;  %v4090_v48 = vmul.f32 %v4085_v38, %v4085_v38 }
0x1dd0   : > { %6005 = vtanh.f32 %v4100_v44  ;;  %v4098_v49 = vadd.f32 %v4095_v45, %v4080_v34  ;;  %v4093_v0 = vmul.f32 %v4090_v48, %v4085_v38 }
0x1dd2   : > { %v4101_v50 = vmul.f32 0.7978846, %v4098_v49  ;;  %v4096_v51 = vmul.f32 0.044715, %v4093_v0  ;;  %v4813_v0 = vld [vmem:[#allocation2 + $0x18e] ss:$0 sm:$0xff] }
0x1dd4   : > { %6007 = vtanh.f32 %v4101_v50  ;;  %v4099_v46 = vadd.f32 %v4096_v51, %v4085_v38 }
0x1dd6   : > { %v4102_v37 = vmul.f32 0.7978846, %v4099_v46 }
0x1dd8   : > { %6009 = vtanh.f32 %v4102_v37  ;;  %v4814_v37 = vld [vmem:[#allocation2 + $0x18f] ss:$0 sm:$0xff] }
0x1dda   : > { %v6006_v54 = vpop.eup %6005 }
0x1ddb   : > { %v4106_v40 = vadd.f32 1.0, %v6006_v54 }
0x1ddd   : > { %v4109_v42 = vmul.f32 0.5, %v4106_v40 }
0x1dde   : > { %v6008_v61 = vpop.eup %6007 }
0x1ddf   : > { %v4112_v57 = vmul.f32 %v4109_v42, %v4075_v28  ;;  %v4107_v58 = vadd.f32 1.0, %v6008_v61 }
0x1de1   : > { %5534 = vmatmul.mubr.msk.f32.vlgmr.msra.gmra.mrb[90].mxu0 %vm2346_vm4, %v4112_v57  ;;  %v4110_v59 = vmul.f32 0.5, %v4107_v58 }
0x1de2   : > { %v6010_v60 = vpop.eup %6009  ;;  %5536 = vmatprep.mubr.msk.f32.mxu0 %vm6139_vm0, %v6140_v4 }
0x1de3   : > { %v4113_v62 = vmul.f32 %v4110_v59, %v4080_v34  ;;  %v4108_v1 = vadd.f32 1.0, %v6010_v60  ;;  %v4290_v34 = vld [vmem:[#allocation2 + $0x198] sm:$0xff] }
0x1de4   : > { %v5688_v35 = vpack.c.bf16 %v4290_v34, %v4289_v33 }
0x1de5   : > { %5537 = vmatmul.mubr.msk.f32.gmra.mrb[92].mxu0 %vm2346_vm4, %v4113_v62  ;;  %v4111_v17 = vmul.f32 0.5, %v4108_v1 }
0x1de6   : > { %5539 = vmatprep.mubr.msk.f32.mxu0 %vm6139_vm0, %v6140_v4  ;;  %5689 = vmatpush3.bf16.msra.mxu1 %v5688_v35 }
0x1de7   : > { %v4114_v53 = vmul.f32 %v4111_v17, %v4085_v38  ;;  %5696 = vmatprep.subr.bf16.mxu1 %v6138_v2 }
0x1de9   : > { %5540 = vmatmul.mubr.msk.f32.gmra.mrb[94].mxu0 %vm2346_vm4, %v4114_v53 }
0x1dea   : > { %5557 = vmatprep.mubr.msk.f32.mxu0 %vm6139_vm0, %v6140_v4 }
0x1eb4   : > { %v4194_v3 = vpop.f32.mrb[90].mxu0 }
0x1eb5   : > { %v4195_v6 = vadd.f32 %v4809_v63, %v4194_v3  ;;  %v5535_v8 = vpop.f32.mrb[91].mxu0 }
0x1eb7   : > { %v4208_v52 = vadd.f32 %v4195_v6, %v6950_v11 }
0x1eb8   : > { %v4199_v5 = vpop.f32.mrb[92].mxu0 }
0x1eb9   : > { %v4200_v56 = vadd.f32 %v4809_v63, %v4199_v5  ;;  %v5538_v9 = vpop.f32.mrb[93].mxu0  ;;  %v4211_v55 = vsel %vm216_vm2, %v4208_v52, 0.0 }
0x1eba   : > { %4212 = vadd.xlane.f32.xlu0 %v4211_v55 }
0x1ebb   : > { %v4209_v10 = vadd.f32 %v4200_v56, %v6956_v14 }
0x1ebc   : > { %v4204_v47 = vpop.f32.mrb[94].mxu0 }
0x1ebd   : > { %v4205_v7 = vadd.f32 %v4809_v63, %v4204_v47  ;;  %v5541_v12 = vpop.f32.mrb[95].mxu0  ;;  %v4214_v13 = vsel %vm216_vm2, %v4209_v10, 0.0 }
0x1ebe   : > { %4215 = vadd.xlane.f32.xlu1 %v4214_v13 }
0x1ebf   : > { %v4210_v15 = vadd.f32 %v4205_v7, %v6962_v18 }
0x1ec1   : > { %v4217_v16 = vsel %vm2173_vm3, %v4210_v15, 0.0 }
0x1ec2   : > { %4218 = vadd.xlane.f32.xlu0 %v4217_v16 }
0x1f47   : > { %v4213_v11 = vpop.xlane.xlu0 %4212 }
0x1f48   : > { %v4220_v19 = vmul.f32 0.0625, %v4213_v11 }
0x1f4a   : > { %v4223_v20 = vsub.f32 %v4208_v52, %v4220_v19 }
0x1f4b   : > { %v4216_v21 = vpop.xlane.xlu1 %4215 }
0x1f4c   : > { %v4221_v22 = vmul.f32 0.0625, %v4216_v21  ;;  %v4226_v23 = vmul.f32 %v4223_v20, %v4223_v20  ;;  %v4291_v21 = vld [vmem:[#allocation2 + $0x1a0] sm:$0xff] }
0x1f4e   : > { %v4224_v24 = vsub.f32 %v4209_v10, %v4221_v22  ;;  %v4229_v14 = vsel %vm216_vm2, %v4226_v23, 0.0  ;;  %v4292_v22 = vld [vmem:[#allocation2 + $0x1a8] sm:$0xff] }
0x1f4f   : > { %4230 = vadd.xlane.f32.xlu1 %v4229_v14  ;;  %v4219_v25 = vpop.xlane.xlu0 %4218  ;;  %v5691_v23 = vpack.c.bf16 %v4292_v22, %v4291_v21  ;;  %v4294_v14 = vld [vmem:[#allocation2 + $0x1b8] sm:$0xff] }
0x1f50   : > { %v4222_v26 = vmul.f32 0.0625, %v4219_v25  ;;  %v4227_v28 = vmul.f32 %v4224_v24, %v4224_v24 }
0x1f51   : > { %5692 = vmatpush3.bf16.msra.mxu0 %v5691_v23 }
0x1f52   : > { %v4225_v27 = vsub.f32 %v4210_v15, %v4222_v26  ;;  %v4232_v30 = vsel %vm216_vm2, %v4227_v28, 0.0  ;;  %5693 = vmatprep.subr.bf16.mxu0 %v6138_v2  ;;  %v4295_v26 = vld [vmem:[#allocation2 + $0x1c0] sm:$0xff]  ;;  %v4296_v28 = vld [vmem:[#allocation2 + $0x1c8] sm:$0xff] }
0x1f53   : > { %4233 = vadd.xlane.f32.xlu0 %v4232_v30  ;;  %v4303_v30 = vld [vmem:[#allocation2 + $0x1e4] sm:$0x1] }
0x1f54   : > { %v4228_v18 = vmul.f32 %v4225_v27, %v4225_v27 }
0x1f56   : > { %v4235_v32 = vsel %vm2173_vm3, %v4228_v18, 0.0  ;;  %v4379_v18 = vadd.f32 1e-05, %v4303_v30 }
0x1f57   : > { %4236 = vadd.xlane.f32.xlu1 %v4235_v32  ;;  %v4302_v32 = vld [vmem:[#allocation2 + $0x1e3] sm:$0x1] }
0x1fdc   : > { %v4231_v36 = vpop.xlane.xlu1 %4230 }
0x1fdd   : > { %v4238_v39 = vmul.f32 0.0625, %v4231_v36 }
0x1fdf   : > { %v4241_v29 = vadd.f32 1e-05, %v4238_v39 }
0x1fe0   : > { %v4234_v41 = vpop.xlane.xlu0 %4233 }
0x1fe1   : > { %6011 = vrsqrt.f32 %v4241_v29  ;;  %v4239_v43 = vmul.f32 0.0625, %v4234_v41  ;;  %v4300_v29 = vld [vmem:[#allocation2 + $0x1e1] sm:$0x1] }
0x1fe3   : > { %v4242_v38 = vadd.f32 1e-05, %v4239_v43  ;;  %v4301_v43 = vld [vmem:[#allocation2 + $0x1e2] sm:$0x1] }
0x1fe4   : > { %v4237_v31 = vpop.xlane.xlu1 %4236 }
0x1fe5   : > { %6013 = vrsqrt.f32 %v4242_v38  ;;  %v4240_v44 = vmul.f32 0.0625, %v4237_v31  ;;  %v4385_v31 = vstv %s197_s28 }
0x1fe7   : > { %v4243_v45 = vadd.f32 1e-05, %v4240_v44 }
0x1fe9   : > { %6015 = vrsqrt.f32 %v4243_v45 }
0x1fea   : > { %6017 = vrsqrt.f32 %v4379_v18 }
0x1feb   : > { %v6012_v48 = vpop.eup %6011 }
0x1fec   : > { %v4247_v49 = vmul.f32 %v6012_v48, %v4223_v20  ;;  %v4297_v48 = vld [vmem:[#allocation2 + $0x1d0] sm:$0xff] }
0x1fee   : > { %v4254_v51 = vmul.f32 %v4813_v0, %v4247_v49  ;;  %v4298_v49 = vld [vmem:[#allocation2 + $0x1d8] sm:$0xff] }
0x1fef   : > { %v6014_v50 = vpop.eup %6013 }
0x1ff0   : > { %v4248_v46 = vmul.f32 %v6014_v50, %v4224_v24  ;;  %v4261_v42 = vadd.f32 %v4814_v37, %v4254_v51  ;;  %v4293_v24 = vld [vmem:[#allocation2 + $0x1b0] sm:$0xff]  ;;  %v4304_v50 = vld [vmem:[#allocation2 + $0x1e5] sm:$0x1] }
0x1ff1   : > { %v5694_v25 = vpack.c.bf16 %v4294_v14, %v4293_v24 }
0x1ff2   : > { %v4255_v54 = vmul.f32 %v4813_v0, %v4248_v46  ;;  %v4264_v62 = vsel %vm216_vm2, %v4261_v42, 0.0  ;;  %v4277_v1 = vsel %vm216_vm2, %v4261_v42, -inf }
0x1ff3   : > { %v6016_v40 = vpop.eup %6015  ;;  %5695 = vmatpush3.bf16.msra.mxu0 %v5694_v25 }
0x1ff4   : > { %v4262_v61 = vadd.f32 %v4814_v37, %v4255_v54  ;;  %v4249_v57 = vmul.f32 %v6016_v40, %v4225_v27  ;;  %v5697_v27 = vpack.c.bf16 %v4296_v28, %v4295_v26  ;;  %v6018_v36 = vpop.eup %6017 }
0x1ff6   : > { %v4265_v58 = vsel %vm216_vm2, %v4262_v61, 0.0  ;;  %v4278_v59 = vsel %vm216_vm2, %v4262_v61, -inf  ;;  %v4256_v60 = vmul.f32 %v4813_v0, %v4249_v57  ;;  %v5700_v0 = vpack.c.bf16 %v4298_v49, %v4297_v48 }
0x1ff7   : > { %v4266_v53 = vadd.f32 %v4265_v58, %v4264_v62  ;;  %v4280_v63 = vmax.f32 %v4277_v1, %v4278_v59  ;;  %v4467_v59 = vstv %s4655_s26  ;;  %v4469_v62 = vstv %s4656_s29 }
0x1ff8   : > { %v4263_v17 = vadd.f32 %v4814_v37, %v4256_v60 }
0x1ffa   : > { %v4267_v3 = vsel %vm2173_vm3, %v4263_v17, 0.0  ;;  %v4279_v6 = vsel %vm2173_vm3, %v4263_v17, -inf }
0x1ffb   : > { %v4268_v8 = vadd.f32 %v4267_v3, %v4266_v53  ;;  %v4281_v52 = vmax.f32 %v4280_v63, %v4279_v6 }
0x1ffd   : > { %v4269_v5 = vrot.slane %v4268_v8, 4  ;;  %v4282_v56 = vrot.slane %v4281_v52, 4 }
0x1fff   : > { %v4270_v9 = vadd.f32 %v4269_v5, %v4268_v8  ;;  %v4283_v55 = vmax.f32 %v4281_v52, %v4282_v56 }
0x2001   : > { %v4271_v10 = vrot.slane %v4270_v9, 2  ;;  %v4284_v47 = vrot.slane %v4283_v55, 2 }
0x2003   : > { %v4272_v7 = vadd.f32 %v4271_v10, %v4270_v9  ;;  %v4285_v12 = vmax.f32 %v4283_v55, %v4284_v47 }
0x2005   : > { %v4273_v13 = vrot.slane %v4272_v7, 1  ;;  %v4286_v15 = vrot.slane %v4285_v12, 1 }
0x2007   : > { %v4274_v16 = vadd.f32 %v4273_v13, %v4272_v7  ;;  %v4287_v19 = vmax.f32 %v4285_v12, %v4286_v15 }
0x2009   : > { %v4276_v11 = vmul.f32 0.05882353, %v4274_v16 }
0x200b   : > { %v4288_v20 = vadd.f32 %v4287_v19, %v4276_v11 }
0x200d   : > { %5547 = vmatmul.mubr.msk.f32.vlgmr.msra.gmra.mrb[96].mxu1 %vm216_vm2, %v4288_v20  ;;  %vm4462_vm2 = vcmask 253952  }
0x200e   : > { %5568 = vmatprep.mubr.msk.f32.mxu1 %vm6139_vm0, %v6140_v4  ;;  %5698 = vmatpush3.bf16.msra.mxu1 %v5697_v27  ;;  %v4299_v4 = vld [vmem:[#allocation2 + $0x1e0] sm:$0x1] }
0x200f   : > { %5699 = vmatprep.subr.bf16.mxu1 %v6138_v2 }
0x2012   : > { %5701 = vmatpush3.bf16.msra.mxu1 %v5700_v0 }
0x20e0   : > { %v4374_v33 = vpop.f32.mrb[96].mxu1 }
0x20e1   : > { %v4375_v34 = vadd.f32 %v4374_v33, %v4299_v4  ;;  %v5548_v35 = vpop.f32.mrb[97].mxu1 }
0x20e3   : > { %v4378_v39 = vsub.f32 %v4375_v34, %v4302_v32 }
0x20e5   : > { %v4381_v41 = vmul.f32 %v6018_v36, %v4378_v39 }
0x20e7   : > { %v4382_v38 = vmul.f32 %v4381_v41, %v4300_v29 }
0x20e9   : > { %v4383_v44 = vadd.f32 %v4382_v38, %v4301_v43 }
0x20eb   : > { %vm4384_vm0 = vcmp.ge.f32.partialorder %v4383_v44, 0.0  ;;  %v4386_v45 = vmul.f32 %v4385_v31, %v4383_v44 }
0x20ed   : > { %v4387_v2 = vsel %vm4384_vm0, %v4383_v44, %v4386_v45 }
0x20ee   : > { %5558 = vmatmul.mubr.msk.f32.vlgmr.msra.gmra.mrb[96].mxu0 %vm2346_vm4, %v4387_v2 }
0x21c1   : > { %v4457_v51 = vpop.f32.mrb[96].mxu0 }
0x21c2   : > { %v4458_v46 = vadd.f32 %v4457_v51, %v4304_v50  ;;  %v5559_v37 = vpop.f32.mrb[97].mxu0 }
0x21c4   : > { %5569 = vmatmul.mubr.msk.f32.vlgmr.msra.gmra.mrb[98].mxu1 %vm2346_vm4, %v4458_v46  ;;  %v4461_v54 = vmul.f32 %v4458_v46, %v4458_v46 }
0x21c6   : > { %v4463_v40 = vsel %vm4462_vm2, %v4461_v54, 0.0 }
0x21c7   : > { %4464 = vadd.xlane.f32.xlu0 %v4463_v40 }
0x2254   : > { %v4465_v57 = vpop.xlane.xlu0 %4464 }
0x2255   : > { %v4466_v58 = vmul.f32 0.03125, %v4465_v57 }
0x2257   : > { %v4468_v60 = vmul.f32 %v4467_v59, %v4466_v58 }
0x2259   : > { %v4470_v1 = vadd.f32 %v4469_v62, %v4468_v60 }
0x225b   : > { %v4548_v53 = vsel %vm2346_vm4, %v4458_v46, %v4470_v1 }
0x2297   : > { %v4540_v42 = vpop.f32.mrb[98].mxu1 }
0x2298   : > { %4545 = vrot.lane.b32.xlu1 %v4540_v42, %s6153_s24  ;;  %v5570_v61 = vpop.f32.mrb[99].mxu1 }
0x230a   : > { %v4546_v17 = vpop.permute.xlu1 %4545 }
0x230b   : > { %v4550_v63 = vsel %vm4549_vm5, %v4548_v53, %v4546_v17 }
0x230c   : > { %v4552_v3 = vsel %vm4551_vm6, %v4550_v63, 0.0 }
0x230d   : > { %4553 = vst [vmem:[%s191_s5] sm:$0x1] %v4552_v3 }
0x230e   : > { %6075 = shalt.err (!%p6072_p2)
}
0x230f   : > { %s6076_s20 = scalar_lea.hbm %s7008_s9, 16  ;;  %s6080_s28 = scalar_lea.hbm %s7053_s3, 32 }
0x2310   : > { %p6077_p3 = scmp.ne.s32.totalorder %s7008_s9, %s6076_s20  ;;  %p6081_p7 = scmp.lt.u32.totalorder %s7008_s9, %s7053_s3 }
0x2311   : > { %p6082_p8 = scmp.lt.u32.totalorder %s6080_s28, %s6076_s20  ;;  %p6084_p11 = scmp.lt.u32.totalorder %s6076_s20, %s7008_s9 }
0x2312   : > { %p6078_p4 = pnand %p6077_p3, %p7068_p13 }
0x2313   : > { %p6083_p12 = por %p6082_p8, %p6081_p7 }
0x2314   : > { %p6079_p0 = pneg %p6078_p4 }
0x2315   : > { %p6085_p1 = por %p6084_p11, %p6083_p12 }
0x2317   : > { %p6086_p6 = pnand %p6085_p1, %p6079_p0 }
0x2319   : > { %6089 = shalt.err (!%p6086_p6)
}
0x231a   : > { %5729 = dma.vmem_to_hbm [thread:$0]  (%p7068_p13), %s7010_s6, 16, %s7008_s9, %s4555_s16  }
0x231b PF: > { %p5746_p5 = scmp.ge.s32.totalorder %s6132_s15, 2  ;;  %s4579_s29 = sand.u32 1, %s6120_s12  }
0x231c   : > { %p7069_p9 = scmp.ne.s32.totalorder %s7058_s23, 0  ;;  %s4580_s30 = scalar_lea.sflag [#allocation4], %s4579_s29 }
0x231e   : > { %p5739_p10 = pnand %p5746_p5, %p7069_p9 }
0x2320   : > { %6115 = dma.done.wait (!%p5739_p10), %s4580_s30, 16  }
0x2321   : > { %6117 = vsyncadd (!%p5739_p10), %s4580_s30, 4294967280  ;;  %p15_p2 = scmp.ge.s32.totalorder %s6200_s18, 4   ;;  %s7070_s12 = smov %s6124_s13 }
0x2322   : > { %s7071_s13 = smov %s6128_s14  ;;  %s7072_s14 = smov %s6211_s21 }
0x2323   : > { %s7073_s15 = smov %s6200_s18  ;;  %17 = sbr.rel (!%p15_p2) target bundleno = 5 (0x5), region = 77 }
0x232a   :  { %4584 = vsyncpa [#allocation3], 1 }
0x232b   :  { %4586 = vsyncpa [#allocation3 + $0x1], 1 }
0x232c   :  { %4587 = vsyncpa [#allocation4], 1 }
0x232d   :  { %4589 = vsyncpa [#allocation4 + $0x1], 1 }
0x232e   :  { %4590 = vsyncpa [#allocation5], 1 }
0x232f   :  { %4592 = vsyncpa [#allocation5 + $0x1], 1 }

</bundles_post_ra>
